<compile_context>
chip_gen: v7x
topology: tpu7x:2x2x1
jax: 0.10.0
libtpu: 0.0.40
codegen_flags: <defaults>
</compile_context>

<pallas_src>
import functools

import jax
import jax.numpy as jnp
from jax import lax
from jax.experimental import pallas as pl
from jax.experimental.pallas import tpu as pltpu


def _round_up(x, m):
    return ((x + m - 1) // m) * m


def _row_tile(m):
    """Row tile giving at most 2 grid steps: whole M if small, else two
    balanced blocks (multiple of 8) so both v7x TensorCores get equal work."""
    if m <= 512:
        return m
    return _round_up(pl.cdiv(m, 2), 8)


# ---------------------------------------------------------------------------
# Pallas kernel 1: fused  out = act(x @ w + b)   (bf16 in, f32 acc)
# ---------------------------------------------------------------------------
def _gemm_bias_act_kernel(x_ref, w_ref, b_ref, o_ref, *, apply_relu):
    acc = jnp.dot(x_ref[...], w_ref[...], preferred_element_type=jnp.float32)
    acc = acc + b_ref[...]                       # (1, N) broadcasts over rows
    if apply_relu:
        acc = jnp.maximum(acc, 0.0)
    o_ref[...] = acc.astype(o_ref.dtype)


def gemm_bias_act(x, w, b, *, apply_relu, out_dtype=jnp.bfloat16):
    """x:(M,K) bf16, w:(K,N) bf16, b:(1,N) f32 -> (M,N). N = real channels."""
    m, k = x.shape
    k2, n = w.shape
    assert k == k2 and b.shape == (1, n)
    tile_m = _row_tile(m)
    grid = pl.cdiv(m, tile_m)                    # 1 or 2 steps only
    return pl.pallas_call(
        functools.partial(_gemm_bias_act_kernel, apply_relu=apply_relu),
        out_shape=jax.ShapeDtypeStruct((m, n), out_dtype),
        grid_spec=pltpu.PrefetchScalarGridSpec(
            num_scalar_prefetch=0,
            grid=(grid,),
            in_specs=[
                pl.BlockSpec((tile_m, k), lambda i: (i, 0)),
                pl.BlockSpec((k, n), lambda i: (0, 0)),    # grid-invariant
                pl.BlockSpec((1, n), lambda i: (0, 0)),    # grid-invariant
            ],
            out_specs=pl.BlockSpec((tile_m, n), lambda i: (i, 0)),
        ),
        compiler_params=pltpu.CompilerParams(
            dimension_semantics=("parallel",),
            vmem_limit_bytes=32 * 1024 * 1024),
    )(x, w, b)


# ---------------------------------------------------------------------------
# Pallas kernel 2: fused FC head  out = relu(x @ w1 + b1) @ w2 + b2
# ---------------------------------------------------------------------------
def _fc_head_kernel(x_ref, w1_ref, b1_ref, w2_ref, b2_ref, o_ref):
    h = jnp.dot(x_ref[...], w1_ref[...], preferred_element_type=jnp.float32)
    h = jnp.maximum(h + b1_ref[...], 0.0)                    # fc1 + ReLU (f32)
    out = jnp.dot(h.astype(jnp.bfloat16), w2_ref[...],
                  preferred_element_type=jnp.float32)        # fc2
    o_ref[...] = out + b2_ref[...]


def fc_head(x, w1, b1, w2, b2):
    m, k1 = x.shape
    n1 = w1.shape[1]
    n2 = w2.shape[1]
    return pl.pallas_call(
        _fc_head_kernel,
        out_shape=jax.ShapeDtypeStruct((m, n2), jnp.float32),
        grid_spec=pltpu.PrefetchScalarGridSpec(
            num_scalar_prefetch=0,
            grid=(1,),
            in_specs=[
                pl.BlockSpec((m, k1), lambda i: (0, 0)),
                pl.BlockSpec((k1, n1), lambda i: (0, 0)),
                pl.BlockSpec((1, n1), lambda i: (0, 0)),
                pl.BlockSpec((n1, n2), lambda i: (0, 0)),
                pl.BlockSpec((1, n2), lambda i: (0, 0)),
            ],
            out_specs=pl.BlockSpec((m, n2), lambda i: (0, 0)),
        ),
        compiler_params=pltpu.CompilerParams(
            dimension_semantics=("arbitrary",),
            vmem_limit_bytes=32 * 1024 * 1024),
    )(x, w1, b1, w2, b2)


# ---------------------------------------------------------------------------
# im2col glue: one XLA op per conv, always NHWC (columns in (C, kh, kw) order)
# ---------------------------------------------------------------------------
def _extract_patches(x_nhwc, k, stride):
    dn = ("NHWC", "HWIO", "NHWC")
    p = lax.conv_general_dilated_patches(
        x_nhwc, (k, k), (stride, stride), "VALID", dimension_numbers=dn)
    n, ho, wo, ckk = p.shape                       # rows: b*Ho*Wo + oh*Wo + ow
    return p.reshape(n * ho * wo, ckk), ho, wo     # reshape = free bitcast


def _conv_out(s, k, stride):
    return (s - k) // stride + 1


def _trunk_hw(h, w):
    """Spatial dims after the conv trunk (k/s = 8/4, 4/2, 3/1)."""
    for k, s in ((8, 4), (4, 2), (3, 1)):
        h, w = _conv_out(h, k, s), _conv_out(w, k, s)
    return h, w


# ---------------------------------------------------------------------------
# Parameters: raw PyTorch-layout init + one-time Pallas-layout preparation
# ---------------------------------------------------------------------------
def _uinit(key, shape, fan_in):
    bound = 1.0 / jnp.sqrt(jnp.float32(fan_in))
    return jax.random.uniform(key, shape, jnp.float32, -bound, bound)


def init_birdnet_params(key, c, output_dim):
    """Raw parameters in PyTorch layout (Conv2d OIHW, Linear (out, in))."""
    ks = jax.random.split(key, 10)
    online = {
        "conv1_w": _uinit(ks[0], (32, c, 8, 8), c * 8 * 8),
        "conv1_b": _uinit(ks[1], (32,), c * 8 * 8),
        "conv2_w": _uinit(ks[2], (64, 32, 4, 4), 32 * 4 * 4),
        "conv2_b": _uinit(ks[3], (64,), 32 * 4 * 4),
        "conv3_w": _uinit(ks[4], (64, 64, 3, 3), 64 * 3 * 3),
        "conv3_b": _uinit(ks[5], (64,), 64 * 3 * 3),
        "fc1_w": _uinit(ks[6], (512, 64 * 9 * 6), 64 * 9 * 6),
        "fc1_b": _uinit(ks[7], (512,), 64 * 9 * 6),
        "fc2_w": _uinit(ks[8], (output_dim, 512), 512),
        "fc2_b": _uinit(ks[9], (output_dim,), 512),
    }
    # NOTE: arrays are immutable in JAX, so sharing online/target buffers is
    # safe for inference; a DQN target update must replace these arrays.
    target = {k: v for k, v in online.items()}
    return {"online": online, "target": target}


def _prep_conv(w_oihw, b):
    out_c, in_c, kh, kw = w_oihw.shape
    w = w_oihw.reshape(out_c, in_c * kh * kw).T            # (C*k*k, out_c)
    return w.astype(jnp.bfloat16), b.reshape(1, out_c).astype(jnp.float32)


def prepare_pallas_params(raw, input_hw):
    """One-time weight transform (at init, never per forward)."""
    h3, w3 = _trunk_hw(*input_hw)          # derived, not hard-coded (review)
    out = {}
    for model, p in raw.items():
        q = {}
        for i in (1, 2, 3):
            q[f"conv{i}_w"], q[f"conv{i}_b"] = _prep_conv(
                p[f"conv{i}_w"], p[f"conv{i}_b"])
        c3 = p["conv3_w"].shape[0]
        # fc1: permute columns from NCHW-flatten order to NHWC-flatten order
        # so a free bitcast reshape replaces the per-forward transpose+flatten.
        n1, k1 = p["fc1_w"].shape                           # (512, c3*h3*w3)
        assert k1 == c3 * h3 * w3
        fc1 = p["fc1_w"].reshape(n1, c3, h3, w3)
        fc1 = jnp.transpose(fc1, (0, 2, 3, 1)).reshape(n1, k1)
        q["fc1_w"] = fc1.T.astype(jnp.bfloat16)             # (K1, 512)
        q["fc1_b"] = p["fc1_b"].reshape(1, n1).astype(jnp.float32)
        # fc2: pre-transpose, real output_dim lanes (no padding, no slicing).
        q["fc2_w"] = p["fc2_w"].T.astype(jnp.bfloat16)       # (512, out_dim)
        q["fc2_b"] = p["fc2_b"].reshape(1, -1).astype(jnp.float32)
        out[model] = q
    return out


# ---------------------------------------------------------------------------
# Forward pass  (== BirdNet.forward(input, model))
# ---------------------------------------------------------------------------
def birdnet_forward(params, x_nchw, model):
    p = params[model]
    n = x_nchw.shape[0]
    # One explicit NHWC transpose so all three im2cols share the fast path.
    x = jnp.transpose(x_nchw, (0, 2, 3, 1)).astype(jnp.bfloat16)

    # conv1 (k=8, s=4) + ReLU  -> real 32 channels, no slicing
    patches, ho, wo = _extract_patches(x, 8, 4)
    y = gemm_bias_act(patches, p["conv1_w"], p["conv1_b"], apply_relu=True)
    y = y.reshape(n, ho, wo, y.shape[-1])                   # free bitcast

    # conv2 (k=4, s=2) + ReLU  -> real 64 channels
    patches, ho, wo = _extract_patches(y, 4, 2)
    y = gemm_bias_act(patches, p["conv2_w"], p["conv2_b"], apply_relu=True)
    y = y.reshape(n, ho, wo, y.shape[-1])

    # conv3 (k=3, s=1) + ReLU  -> real 64 channels
    patches, ho, wo = _extract_patches(y, 3, 1)
    y = gemm_bias_act(patches, p["conv3_w"], p["conv3_b"], apply_relu=True)

    # Flatten is a free bitcast ((n*Ho*Wo, 64) -> (n, Ho*Wo*64), NHWC order
    # matching the pre-permuted fc1 weight), then fused fc1+ReLU+fc2.
    flat = y.reshape(n, -1)
    return fc_head(flat, p["fc1_w"], p["fc1_b"], p["fc2_w"], p["fc2_b"])


# ---------------------------------------------------------------------------
# Pure-JAX f32 reference (raw PyTorch-layout params) for correctness check
# ---------------------------------------------------------------------------
def birdnet_reference(raw_params, x_nchw, model):
    p = raw_params[model]
    dn = ("NCHW", "OIHW", "NCHW")

    def conv(x, w, b, s):
        y = lax.conv_general_dilated(x, w, (s, s), "VALID",
                                     dimension_numbers=dn)
        return jnp.maximum(y + b[None, :, None, None], 0.0)

    x = conv(x_nchw, p["conv1_w"], p["conv1_b"], 4)
    x = conv(x, p["conv2_w"], p["conv2_b"], 2)
    x = conv(x, p["conv3_w"], p["conv3_b"], 1)
    x = x.reshape(x.shape[0], -1)
    x = jnp.maximum(x @ p["fc1_w"].T + p["fc1_b"], 0.0)
    return x @ p["fc2_w"].T + p["fc2_b"]


if __name__ == "__main__":
    batch, c = 2, 4
    h, w = 100, 76          # k/s of 8/4, 4/2, 3/1 -> 64 x 9 x 6 conv-trunk out
    output_dim = 6

    key = jax.random.PRNGKey(0)
    pkey, xkey = jax.random.split(key)
    raw = init_birdnet_params(pkey, c, output_dim)
    params = prepare_pallas_params(raw, input_hw=(h, w))
    x = jax.random.normal(xkey, (batch, c, h, w), jnp.float32)

    fwd = jax.jit(birdnet_forward, static_argnames=("model",))
    out_online = jax.block_until_ready(fwd(params, x, model="online"))
    out_target = jax.block_until_ready(fwd(params, x, model="target"))

    ref = birdnet_reference(raw, x, "online")
    assert out_online.shape == (batch, output_dim)
    assert out_target.shape == (batch, output_dim)
    max_err = float(jnp.max(jnp.abs(out_online - ref)))
    # bf16 MXU inputs with f32 accumulation -> relaxed tolerance vs f32 ref
    # (intentional: RL inference precision).
    assert jnp.allclose(out_online, ref, atol=5e-2, rtol=5e-2), max_err

    print("KERNEL_OK")
</pallas_src>

<mosaic_0001>
module attributes {stable_mosaic.version = 11 : i64} {
  func.func @_gemm_bias_act_kernel(%arg0: i32, %arg1: memref<432x256xbf16, #tpu.memory_space<vmem>>, %arg2: memref<256x32xbf16, #tpu.memory_space<vmem>>, %arg3: memref<1x32xf32, #tpu.memory_space<vmem>>, %arg4: memref<432x32xbf16, #tpu.memory_space<vmem>>) attributes {dimension_semantics = [#tpu.dimension_semantics<parallel>], iteration_bounds = array<i64: 2>, scalar_prefetch = 0 : i64, scratch_operands = 0 : i64, tpu.core_type = #tpu.core_type<tc>, window_params = [{transform_indices = @transform_0, window_bounds = array<i64: 432, 256>}, {pipeline_mode = #tpu.pipeline_mode<synchronous>, transform_indices = @transform_1, window_bounds = array<i64: 256, 32>}, {pipeline_mode = #tpu.pipeline_mode<synchronous>, transform_indices = @transform_2, window_bounds = array<i64: 1, 32>}, {transform_indices = @transform_3, window_bounds = array<i64: 432, 32>}]} {
    %c0 = arith.constant 0 : index
    %c0_0 = arith.constant 0 : index
    %0 = vector.load %arg1[%c0, %c0_0] : memref<432x256xbf16, #tpu.memory_space<vmem>>, vector<432x256xbf16>
    %c0_1 = arith.constant 0 : index
    %c0_2 = arith.constant 0 : index
    %1 = vector.load %arg2[%c0_1, %c0_2] : memref<256x32xbf16, #tpu.memory_space<vmem>>, vector<256x32xbf16>
    %cst = arith.constant dense<0.000000e+00> : vector<432x32xf32>
    %2 = tpu.matmul %0, %1, %cst {dimension_numbers = #tpu.dot_dimension_numbers<[1], [0], [0], [1], [0, 0, 1, 1], [], []>} : vector<432x256xbf16>, vector<256x32xbf16>, vector<432x32xf32> -> vector<432x32xf32>
    %c0_3 = arith.constant 0 : index
    %c0_4 = arith.constant 0 : index
    %3 = vector.load %arg3[%c0_3, %c0_4] : memref<1x32xf32, #tpu.memory_space<vmem>>, vector<1x32xf32>
    %4 = vector.broadcast %3 : vector<1x32xf32> to vector<432x32xf32>
    %5 = arith.addf %2, %4 : vector<432x32xf32>
    %cst_5 = arith.constant 0.000000e+00 : f32
    %6 = vector.broadcast %cst_5 : f32 to vector<432x32xf32>
    %7 = arith.maximumf %5, %6 : vector<432x32xf32>
    %8 = arith.truncf %7 : vector<432x32xf32> to vector<432x32xbf16>
    %c0_6 = arith.constant 0 : index
    %c0_7 = arith.constant 0 : index
    %9 = vector.load %arg4[%c0_6, %c0_7] : memref<432x32xbf16, #tpu.memory_space<vmem>>, vector<432x32xbf16>
    tpu.vector_store %arg4[%c0_6, %c0_7], %8 {strides = array<i32>} : memref<432x32xbf16, #tpu.memory_space<vmem>>, vector<432x32xbf16>,
    return
  }
  func.func @transform_0(%arg0: i32) -> (i32, i32) {
    %c0_i32 = arith.constant 0 : i32
    %c0_i32_0 = arith.constant 0 : i32
    return %arg0, %c0_i32 : i32, i32
  }
  func.func @transform_1(%arg0: i32) -> (i32, i32) {
    %c0_i32 = arith.constant 0 : i32
    %c0_i32_0 = arith.constant 0 : i32
    %c0_i32_1 = arith.constant 0 : i32
    return %c0_i32, %c0_i32_0 : i32, i32
  }
  func.func @transform_2(%arg0: i32) -> (i32, i32) {
    %c0_i32 = arith.constant 0 : i32
    %c0_i32_0 = arith.constant 0 : i32
    %c0_i32_1 = arith.constant 0 : i32
    return %c0_i32, %c0_i32_0 : i32, i32
  }
  func.func @transform_3(%arg0: i32) -> (i32, i32) {
    %c0_i32 = arith.constant 0 : i32
    %c0_i32_0 = arith.constant 0 : i32
    return %arg0, %c0_i32 : i32, i32
  }
}

module attributes {stable_mosaic.version = 11 : i64} {
  func.func @_gemm_bias_act_kernel(%arg0: i32, %arg1: memref<176x512xbf16, #tpu.memory_space<vmem>>, %arg2: memref<512x64xbf16, #tpu.memory_space<vmem>>, %arg3: memref<1x64xf32, #tpu.memory_space<vmem>>, %arg4: memref<176x64xbf16, #tpu.memory_space<vmem>>) attributes {dimension_semantics = [#tpu.dimension_semantics<parallel>], iteration_bounds = array<i64: 1>, scalar_prefetch = 0 : i64, scratch_operands = 0 : i64, tpu.core_type = #tpu.core_type<tc>, window_params = [{transform_indices = @transform_0, window_bounds = array<i64: 176, 512>}, {pipeline_mode = #tpu.pipeline_mode<synchronous>, transform_indices = @transform_1, window_bounds = array<i64: 512, 64>}, {pipeline_mode = #tpu.pipeline_mode<synchronous>, transform_indices = @transform_2, window_bounds = array<i64: 1, 64>}, {transform_indices = @transform_3, window_bounds = array<i64: 176, 64>}]} {
    %c0 = arith.constant 0 : index
    %c0_0 = arith.constant 0 : index
    %0 = vector.load %arg1[%c0, %c0_0] : memref<176x512xbf16, #tpu.memory_space<vmem>>, vector<176x512xbf16>
    %c0_1 = arith.constant 0 : index
    %c0_2 = arith.constant 0 : index
    %1 = vector.load %arg2[%c0_1, %c0_2] : memref<512x64xbf16, #tpu.memory_space<vmem>>, vector<512x64xbf16>
    %cst = arith.constant dense<0.000000e+00> : vector<176x64xf32>
    %2 = tpu.matmul %0, %1, %cst {dimension_numbers = #tpu.dot_dimension_numbers<[1], [0], [0], [1], [0, 0, 1, 1], [], []>} : vector<176x512xbf16>, vector<512x64xbf16>, vector<176x64xf32> -> vector<176x64xf32>
    %c0_3 = arith.constant 0 : index
    %c0_4 = arith.constant 0 : index
    %3 = vector.load %arg3[%c0_3, %c0_4] : memref<1x64xf32, #tpu.memory_space<vmem>>, vector<1x64xf32>
    %4 = vector.broadcast %3 : vector<1x64xf32> to vector<176x64xf32>
    %5 = arith.addf %2, %4 : vector<176x64xf32>
    %cst_5 = arith.constant 0.000000e+00 : f32
    %6 = vector.broadcast %cst_5 : f32 to vector<176x64xf32>
    %7 = arith.maximumf %5, %6 : vector<176x64xf32>
    %8 = arith.truncf %7 : vector<176x64xf32> to vector<176x64xbf16>
    %c0_6 = arith.constant 0 : index
    %c0_7 = arith.constant 0 : index
    %9 = vector.load %arg4[%c0_6, %c0_7] : memref<176x64xbf16, #tpu.memory_space<vmem>>, vector<176x64xbf16>
    tpu.vector_store %arg4[%c0_6, %c0_7], %8 {strides = array<i32>} : memref<176x64xbf16, #tpu.memory_space<vmem>>, vector<176x64xbf16>,
    return
  }
  func.func @transform_0(%arg0: i32) -> (i32, i32) {
    %c0_i32 = arith.constant 0 : i32
    %c0_i32_0 = arith.constant 0 : i32
    return %arg0, %c0_i32 : i32, i32
  }
  func.func @transform_1(%arg0: i32) -> (i32, i32) {
    %c0_i32 = arith.constant 0 : i32
    %c0_i32_0 = arith.constant 0 : i32
    %c0_i32_1 = arith.constant 0 : i32
    return %c0_i32, %c0_i32_0 : i32, i32
  }
  func.func @transform_2(%arg0: i32) -> (i32, i32) {
    %c0_i32 = arith.constant 0 : i32
    %c0_i32_0 = arith.constant 0 : i32
    %c0_i32_1 = arith.constant 0 : i32
    return %c0_i32, %c0_i32_0 : i32, i32
  }
  func.func @transform_3(%arg0: i32) -> (i32, i32) {
    %c0_i32 = arith.constant 0 : i32
    %c0_i32_0 = arith.constant 0 : i32
    return %arg0, %c0_i32 : i32, i32
  }
}

module attributes {stable_mosaic.version = 11 : i64} {
  func.func @_gemm_bias_act_kernel(%arg0: i32, %arg1: memref<108x576xbf16, #tpu.memory_space<vmem>>, %arg2: memref<576x64xbf16, #tpu.memory_space<vmem>>, %arg3: memref<1x64xf32, #tpu.memory_space<vmem>>, %arg4: memref<108x64xbf16, #tpu.memory_space<vmem>>) attributes {dimension_semantics = [#tpu.dimension_semantics<parallel>], iteration_bounds = array<i64: 1>, scalar_prefetch = 0 : i64, scratch_operands = 0 : i64, tpu.core_type = #tpu.core_type<tc>, window_params = [{transform_indices = @transform_0, window_bounds = array<i64: 108, 576>}, {pipeline_mode = #tpu.pipeline_mode<synchronous>, transform_indices = @transform_1, window_bounds = array<i64: 576, 64>}, {pipeline_mode = #tpu.pipeline_mode<synchronous>, transform_indices = @transform_2, window_bounds = array<i64: 1, 64>}, {transform_indices = @transform_3, window_bounds = array<i64: 108, 64>}]} {
    %c0 = arith.constant 0 : index
    %c0_0 = arith.constant 0 : index
    %0 = vector.load %arg1[%c0, %c0_0] : memref<108x576xbf16, #tpu.memory_space<vmem>>, vector<108x576xbf16>
    %c0_1 = arith.constant 0 : index
    %c0_2 = arith.constant 0 : index
    %1 = vector.load %arg2[%c0_1, %c0_2] : memref<576x64xbf16, #tpu.memory_space<vmem>>, vector<576x64xbf16>
    %cst = arith.constant dense<0.000000e+00> : vector<108x64xf32>
    %2 = tpu.matmul %0, %1, %cst {dimension_numbers = #tpu.dot_dimension_numbers<[1], [0], [0], [1], [0, 0, 1, 1], [], []>} : vector<108x576xbf16>, vector<576x64xbf16>, vector<108x64xf32> -> vector<108x64xf32>
    %c0_3 = arith.constant 0 : index
    %c0_4 = arith.constant 0 : index
    %3 = vector.load %arg3[%c0_3, %c0_4] : memref<1x64xf32, #tpu.memory_space<vmem>>, vector<1x64xf32>
    %4 = vector.broadcast %3 : vector<1x64xf32> to vector<108x64xf32>
    %5 = arith.addf %2, %4 : vector<108x64xf32>
    %cst_5 = arith.constant 0.000000e+00 : f32
    %6 = vector.broadcast %cst_5 : f32 to vector<108x64xf32>
    %7 = arith.maximumf %5, %6 : vector<108x64xf32>
    %8 = arith.truncf %7 : vector<108x64xf32> to vector<108x64xbf16>
    %c0_6 = arith.constant 0 : index
    %c0_7 = arith.constant 0 : index
    %9 = vector.load %arg4[%c0_6, %c0_7] : memref<108x64xbf16, #tpu.memory_space<vmem>>, vector<108x64xbf16>
    tpu.vector_store %arg4[%c0_6, %c0_7], %8 {strides = array<i32>} : memref<108x64xbf16, #tpu.memory_space<vmem>>, vector<108x64xbf16>,
    return
  }
  func.func @transform_0(%arg0: i32) -> (i32, i32) {
    %c0_i32 = arith.constant 0 : i32
    %c0_i32_0 = arith.constant 0 : i32
    return %arg0, %c0_i32 : i32, i32
  }
  func.func @transform_1(%arg0: i32) -> (i32, i32) {
    %c0_i32 = arith.constant 0 : i32
    %c0_i32_0 = arith.constant 0 : i32
    %c0_i32_1 = arith.constant 0 : i32
    return %c0_i32, %c0_i32_0 : i32, i32
  }
  func.func @transform_2(%arg0: i32) -> (i32, i32) {
    %c0_i32 = arith.constant 0 : i32
    %c0_i32_0 = arith.constant 0 : i32
    %c0_i32_1 = arith.constant 0 : i32
    return %c0_i32, %c0_i32_0 : i32, i32
  }
  func.func @transform_3(%arg0: i32) -> (i32, i32) {
    %c0_i32 = arith.constant 0 : i32
    %c0_i32_0 = arith.constant 0 : i32
    return %arg0, %c0_i32 : i32, i32
  }
}

module attributes {stable_mosaic.version = 11 : i64} {
  func.func @_fc_head_kernel(%arg0: i32, %arg1: memref<2x3456xbf16, #tpu.memory_space<vmem>>, %arg2: memref<3456x512xbf16, #tpu.memory_space<vmem>>, %arg3: memref<1x512xf32, #tpu.memory_space<vmem>>, %arg4: memref<512x6xbf16, #tpu.memory_space<vmem>>, %arg5: memref<1x6xf32, #tpu.memory_space<vmem>>, %arg6: memref<2x6xf32, #tpu.memory_space<vmem>>) attributes {dimension_semantics = [#tpu.dimension_semantics<arbitrary>], iteration_bounds = array<i64: 1>, scalar_prefetch = 0 : i64, scratch_operands = 0 : i64, tpu.core_type = #tpu.core_type<tc>, window_params = [{pipeline_mode = #tpu.pipeline_mode<synchronous>, transform_indices = @transform_0, window_bounds = array<i64: 2, 3456>}, {pipeline_mode = #tpu.pipeline_mode<synchronous>, transform_indices = @transform_1, window_bounds = array<i64: 3456, 512>}, {pipeline_mode = #tpu.pipeline_mode<synchronous>, transform_indices = @transform_2, window_bounds = array<i64: 1, 512>}, {pipeline_mode = #tpu.pipeline_mode<synchronous>, transform_indices = @transform_3, window_bounds = array<i64: 512, 6>}, {pipeline_mode = #tpu.pipeline_mode<synchronous>, transform_indices = @transform_4, window_bounds = array<i64: 1, 6>}, {pipeline_mode = #tpu.pipeline_mode<synchronous>, transform_indices = @transform_5, window_bounds = array<i64: 2, 6>}]} {
    %c0 = arith.constant 0 : index
    %c0_0 = arith.constant 0 : index
    %0 = vector.load %arg1[%c0, %c0_0] : memref<2x3456xbf16, #tpu.memory_space<vmem>>, vector<2x3456xbf16>
    %c0_1 = arith.constant 0 : index
    %c0_2 = arith.constant 0 : index
    %1 = vector.load %arg2[%c0_1, %c0_2] : memref<3456x512xbf16, #tpu.memory_space<vmem>>, vector<3456x512xbf16>
    %cst = arith.constant dense<0.000000e+00> : vector<2x512xf32>
    %2 = tpu.matmul %0, %1, %cst {dimension_numbers = #tpu.dot_dimension_numbers<[1], [0], [0], [1], [0, 0, 1, 1], [], []>} : vector<2x3456xbf16>, vector<3456x512xbf16>, vector<2x512xf32> -> vector<2x512xf32>
    %c0_3 = arith.constant 0 : index
    %c0_4 = arith.constant 0 : index
    %3 = vector.load %arg3[%c0_3, %c0_4] : memref<1x512xf32, #tpu.memory_space<vmem>>, vector<1x512xf32>
    %4 = vector.broadcast %3 : vector<1x512xf32> to vector<2x512xf32>
    %5 = arith.addf %2, %4 : vector<2x512xf32>
    %cst_5 = arith.constant 0.000000e+00 : f32
    %6 = vector.broadcast %cst_5 : f32 to vector<2x512xf32>
    %7 = arith.maximumf %5, %6 : vector<2x512xf32>
    %8 = arith.truncf %7 : vector<2x512xf32> to vector<2x512xbf16>
    %c0_6 = arith.constant 0 : index
    %c0_7 = arith.constant 0 : index
    %9 = vector.load %arg4[%c0_6, %c0_7] : memref<512x6xbf16, #tpu.memory_space<vmem>>, vector<512x6xbf16>
    %cst_8 = arith.constant dense<0.000000e+00> : vector<2x6xf32>
    %10 = tpu.matmul %8, %9, %cst_8 {dimension_numbers = #tpu.dot_dimension_numbers<[1], [0], [0], [1], [0, 0, 1, 1], [], []>} : vector<2x512xbf16>, vector<512x6xbf16>, vector<2x6xf32> -> vector<2x6xf32>
    %c0_9 = arith.constant 0 : index
    %c0_10 = arith.constant 0 : index
    %11 = vector.load %arg5[%c0_9, %c0_10] : memref<1x6xf32, #tpu.memory_space<vmem>>, vector<1x6xf32>
    %12 = vector.broadcast %11 : vector<1x6xf32> to vector<2x6xf32>
    %13 = arith.addf %10, %12 : vector<2x6xf32>
    %c0_11 = arith.constant 0 : index
    %c0_12 = arith.constant 0 : index
    %14 = vector.load %arg6[%c0_11, %c0_12] : memref<2x6xf32, #tpu.memory_space<vmem>>, vector<2x6xf32>
    tpu.vector_store %arg6[%c0_11, %c0_12], %13 {strides = array<i32>} : memref<2x6xf32, #tpu.memory_space<vmem>>, vector<2x6xf32>,
    return
  }
  func.func @transform_0(%arg0: i32) -> (i32, i32) {
    %c0_i32 = arith.constant 0 : i32
    %c0_i32_0 = arith.constant 0 : i32
    %c0_i32_1 = arith.constant 0 : i32
    return %c0_i32, %c0_i32_0 : i32, i32
  }
  func.func @transform_1(%arg0: i32) -> (i32, i32) {
    %c0_i32 = arith.constant 0 : i32
    %c0_i32_0 = arith.constant 0 : i32
    %c0_i32_1 = arith.constant 0 : i32
    return %c0_i32, %c0_i32_0 : i32, i32
  }
  func.func @transform_2(%arg0: i32) -> (i32, i32) {
    %c0_i32 = arith.constant 0 : i32
    %c0_i32_0 = arith.constant 0 : i32
    %c0_i32_1 = arith.constant 0 : i32
    return %c0_i32, %c0_i32_0 : i32, i32
  }
  func.func @transform_3(%arg0: i32) -> (i32, i32) {
    %c0_i32 = arith.constant 0 : i32
    %c0_i32_0 = arith.constant 0 : i32
    %c0_i32_1 = arith.constant 0 : i32
    return %c0_i32, %c0_i32_0 : i32, i32
  }
  func.func @transform_4(%arg0: i32) -> (i32, i32) {
    %c0_i32 = arith.constant 0 : i32
    %c0_i32_0 = arith.constant 0 : i32
    %c0_i32_1 = arith.constant 0 : i32
    return %c0_i32, %c0_i32_0 : i32, i32
  }
  func.func @transform_5(%arg0: i32) -> (i32, i32) {
    %c0_i32 = arith.constant 0 : i32
    %c0_i32_0 = arith.constant 0 : i32
    %c0_i32_1 = arith.constant 0 : i32
    return %c0_i32, %c0_i32_0 : i32, i32
  }
}

</mosaic_0001>

<bundles_post_ra>
// kernel: birdnet_forward.4
= control target key start
LH: loop header
LB: loop body
LE: loop exit
PB: predicated region body
PF: predicated region fallthrough
CT: control target
= control target key end

     0   :  { %s1624_s12 = smov 0   ;;  %s1950_s0 = inlined_call_operand.vmem [shape: bf16[864,256], index: 0, kind: input, shape index: {}]   ;;  %s1951_s1 = inlined_call_operand.vmem [shape: bf16[256,32], index: 1, kind: input, shape index: {}]   ;;  %s1952_s2 = inlined_call_operand.vmem [shape: f32[1,32], index: 2, kind: input, shape index: {}]   ;;  %s1953_s3 = inlined_call_operand.vmem [shape: bf16[864,32], index: 3, kind: output, shape index: {}]  }
   0x1 LB: > { %s1267_s13 = sadd.s32 4294967295, %s1601_s12   ;;  %p1271_p0 = scmp.ge.s32.totalorder %s1601_s12, 1  ;;  %s1601_s12 = sphi %s1624_s12, %s13_s12  }
   0x2   : > { %p139_p1 = scmp.lt.s32.totalorder %s1601_s12, 3 }
   0x4   : > { %p140_p2 = pnand %p1271_p0, %p139_p1 }
   0x5   : > { %v1498_v0 = vld [vmem:[%s1951_s1] sm:$0xff] (!%p140_p2)   ;;  %v1603_v1 = vmov (!%p140_p2), 0   ;;  %s164_s16 = smul.u32 (!%p140_p2), 54, %s1267_s13  ;;  %v1499_v2 = vld [vmem:[%s1951_s1 + $0x8] sm:$0xff] (!%p140_p2)   ;;  %v1500_v3 = vld [vmem:[%s1951_s1 + $0x10] sm:$0xff] (!%p140_p2)   ;;  %vm1156_vm0 = vcmask (!%p140_p2), 257024  }
   0x6   : > { %143 = sbr.rel (%p140_p2) target bundleno = 395 (0x18b), region = 32  ;;  %637 = vmatprep.subr.bf16.mxu0 (!%p140_p2), %v1603_v1  ;;  %1457 = vmatprep.subr.bf16.mxu1 (!%p140_p2), %v1603_v1  ;;  %v1501_v4 = vld [vmem:[%s1951_s1 + $0x18] sm:$0xff] (!%p140_p2)   ;;  %v1502_v5 = vld [vmem:[%s1951_s1 + $0x20] sm:$0xff] (!%p140_p2)   ;;  %v1503_v7 = vld [vmem:[%s1951_s1 + $0x28] sm:$0xff] (!%p140_p2)  }
   0x7   : > { %638 = vmatpush1.bf16.msra.mxu0 (!%p140_p2), %v1498_v0  ;;  %1473 = vmatpush1.bf16.msra.mxu1 (!%p140_p2), %v1498_v0  ;;  %p165_p3 = scmp.lt.s32.totalorder (!%p140_p2), %s164_s16, 107  ;;  %v1504_v9 = vld [vmem:[%s1951_s1 + $0x30] sm:$0xff] (!%p140_p2)   ;;  %v1505_v10 = vld [vmem:[%s1951_s1 + $0x38] sm:$0xff] (!%p140_p2)   ;;  %v1506_v11 = vld [vmem:[%s1951_s1 + $0x40] sm:$0xff] (!%p140_p2)  }
   0x8   : > { %639 = vmatprep.subr.bf16.mxu0 (!%p140_p2), %v1603_v1  ;;  %1458 = vmatprep.subr.bf16.mxu1 (!%p140_p2), %v1603_v1  ;;  %v1507_v12 = vld [vmem:[%s1951_s1 + $0x48] sm:$0xff] (!%p140_p2)   ;;  %v1508_v13 = vld [vmem:[%s1951_s1 + $0x50] sm:$0xff] (!%p140_p2)   ;;  %v1509_v14 = vld [vmem:[%s1951_s1 + $0x58] sm:$0xff] (!%p140_p2)  }
   0x9   : > { %v1510_v15 = vld [vmem:[%s1951_s1 + $0x60] sm:$0xff] (!%p140_p2)   ;;  %v1511_v16 = vld [vmem:[%s1951_s1 + $0x68] sm:$0xff] (!%p140_p2)   ;;  %v1512_v17 = vld [vmem:[%s1951_s1 + $0x70] sm:$0xff] (!%p140_p2)  }
   0xa   : > { %v1513_v18 = vld [vmem:[%s1951_s1 + $0x78] sm:$0xff] (!%p140_p2)  }
   0xb   : > { %640 = vmatpush1.bf16.msra.mxu0 (!%p140_p2), %v1499_v2  ;;  %1474 = vmatpush1.bf16.msra.mxu1 (!%p140_p2), %v1499_v2 }
   0xc   : > { %641 = vmatprep.subr.bf16.mxu0 (!%p140_p2), %v1603_v1  ;;  %1459 = vmatprep.subr.bf16.mxu1 (!%p140_p2), %v1603_v1 }
   0xd   : > { %s1955_s16 = smov (!%p165_p3, %s164_s16), 107 }
   0xe   : > { %s1402_s23 = sshll.u32 %s1955_s16, 3  ;;  %s1274_s29 = sshll.u32 %s1955_s16, 2 }
   0xf   : > { %642 = vmatpush1.bf16.msra.mxu0 %v1500_v3  ;;  %1475 = vmatpush1.bf16.msra.mxu1 %v1500_v3  ;;  %s1661_s28 = scalar_lea.vmem %s1950_s0, %s1402_s23  ;;  %s1787_s16 = scalar_lea.vmem %s1953_s3, %s1274_s29 }
  0x10   : > { %643 = vmatprep.subr.bf16.mxu0 %v1603_v1  ;;  %1460 = vmatprep.subr.bf16.mxu1 %v1603_v1  ;;  %v1516_v6 = vld [vmem:[%s1661_s28 + $0x4] ss:$8 sps:$4 sm:$0xff]   ;;  %v1514_v19 = vld [vmem:[%s1661_s28] ss:$8 sps:$4 sm:$0xff]   ;;  %v1520_v21 = vld [vmem:[%s1661_s28 + $0x14] ss:$8 sps:$4 sm:$0xff]  }
  0x11   : > { %v1519_v8 = vld [vmem:[%s1661_s28 + $0xe4] ss:$8 sps:$4 sm:$0xff]   ;;  %669 = vmatprep.mubr.bf16.mxu0 %v1516_v6  ;;  %v1517_v20 = vld [vmem:[%s1661_s28 + $0xe0] ss:$8 sps:$4 sm:$0xff]   ;;  %v1523_v22 = vld [vmem:[%s1661_s28 + $0xf4] ss:$8 sps:$4 sm:$0xff]  }
  0x12   : > { %781 = vmatprep.mubr.bf16.mxu1 %v1519_v8  ;;  %v1522_v23 = vld [vmem:[%s1661_s28 + $0x10] ss:$8 sps:$4 sm:$0xff]   ;;  %v1526_v25 = vld [vmem:[%s1661_s28 + $0x24] ss:$8 sps:$4 sm:$0xff]   ;;  %v1528_v27 = vld [vmem:[%s1661_s28 + $0x20] ss:$8 sps:$4 sm:$0xff]  }
  0x13   : > { %644 = vmatpush1.bf16.msra.mxu0 %v1501_v4  ;;  %1476 = vmatpush1.bf16.msra.mxu1 %v1501_v4  ;;  %v1525_v24 = vld [vmem:[%s1661_s28 + $0xf0] ss:$8 sps:$4 sm:$0xff]   ;;  %v1529_v26 = vld [vmem:[%s1661_s28 + $0x104] ss:$8 sps:$4 sm:$0xff]   ;;  %v1531_v28 = vld [vmem:[%s1661_s28 + $0x100] ss:$8 sps:$4 sm:$0xff]  }
  0x14   : > { %645 = vmatprep.subr.bf16.mxu0 %v1603_v1  ;;  %1461 = vmatprep.subr.bf16.mxu1 %v1603_v1  ;;  %v1532_v29 = vld [vmem:[%s1661_s28 + $0x34] ss:$8 sps:$4 sm:$0xff]   ;;  %v1534_v31 = vld [vmem:[%s1661_s28 + $0x30] ss:$8 sps:$4 sm:$0xff]   ;;  %v1538_v33 = vld [vmem:[%s1661_s28 + $0x44] ss:$8 sps:$4 sm:$0xff]  }
  0x15   : > { %v1535_v30 = vld [vmem:[%s1661_s28 + $0x114] ss:$8 sps:$4 sm:$0xff]   ;;  %v1537_v32 = vld [vmem:[%s1661_s28 + $0x110] ss:$8 sps:$4 sm:$0xff]   ;;  %v1541_v34 = vld [vmem:[%s1661_s28 + $0x124] ss:$8 sps:$4 sm:$0xff]  }
  0x16   : > { %v1540_v35 = vld [vmem:[%s1661_s28 + $0x40] ss:$8 sps:$4 sm:$0xff]   ;;  %v1544_v37 = vld [vmem:[%s1661_s28 + $0x54] ss:$8 sps:$4 sm:$0xff]   ;;  %v1546_v39 = vld [vmem:[%s1661_s28 + $0x50] ss:$8 sps:$4 sm:$0xff]  }
  0x17   : > { %646 = vmatpush1.bf16.msra.mxu0 %v1502_v5  ;;  %1477 = vmatpush1.bf16.msra.mxu1 %v1502_v5  ;;  %v1543_v36 = vld [vmem:[%s1661_s28 + $0x120] ss:$8 sps:$4 sm:$0xff]   ;;  %v1547_v38 = vld [vmem:[%s1661_s28 + $0x134] ss:$8 sps:$4 sm:$0xff]   ;;  %v1549_v40 = vld [vmem:[%s1661_s28 + $0x130] ss:$8 sps:$4 sm:$0xff]  }
  0x18   : > { %647 = vmatprep.subr.bf16.mxu0 %v1603_v1  ;;  %1462 = vmatprep.subr.bf16.mxu1 %v1603_v1  ;;  %v1550_v41 = vld [vmem:[%s1661_s28 + $0x64] ss:$8 sps:$4 sm:$0xff]   ;;  %v1552_v43 = vld [vmem:[%s1661_s28 + $0x60] ss:$8 sps:$4 sm:$0xff]   ;;  %v1556_v45 = vld [vmem:[%s1661_s28 + $0x74] ss:$8 sps:$4 sm:$0xff]  }
  0x19   : > { %v1553_v42 = vld [vmem:[%s1661_s28 + $0x144] ss:$8 sps:$4 sm:$0xff]   ;;  %v1555_v44 = vld [vmem:[%s1661_s28 + $0x140] ss:$8 sps:$4 sm:$0xff]   ;;  %v1559_v46 = vld [vmem:[%s1661_s28 + $0x154] ss:$8 sps:$4 sm:$0xff]  }
  0x1a   : > { %v1558_v47 = vld [vmem:[%s1661_s28 + $0x70] ss:$8 sps:$4 sm:$0xff]   ;;  %v1562_v49 = vld [vmem:[%s1661_s28 + $0x84] ss:$8 sps:$4 sm:$0xff]   ;;  %v1564_v51 = vld [vmem:[%s1661_s28 + $0x80] ss:$8 sps:$4 sm:$0xff]  }
  0x1b   : > { %648 = vmatpush1.bf16.msra.mxu0 %v1503_v7  ;;  %1478 = vmatpush1.bf16.msra.mxu1 %v1503_v7  ;;  %v1561_v48 = vld [vmem:[%s1661_s28 + $0x150] ss:$8 sps:$4 sm:$0xff]   ;;  %v1565_v50 = vld [vmem:[%s1661_s28 + $0x164] ss:$8 sps:$4 sm:$0xff]   ;;  %v1567_v52 = vld [vmem:[%s1661_s28 + $0x160] ss:$8 sps:$4 sm:$0xff]  }
  0x1c   : > { %649 = vmatprep.subr.bf16.mxu0 %v1603_v1  ;;  %1463 = vmatprep.subr.bf16.mxu1 %v1603_v1  ;;  %v1568_v53 = vld [vmem:[%s1661_s28 + $0x94] ss:$8 sps:$4 sm:$0xff]   ;;  %v1570_v55 = vld [vmem:[%s1661_s28 + $0x90] ss:$8 sps:$4 sm:$0xff]   ;;  %v1574_v57 = vld [vmem:[%s1661_s28 + $0xa4] ss:$8 sps:$4 sm:$0xff]  }
  0x1d   : > { %v1571_v54 = vld [vmem:[%s1661_s28 + $0x174] ss:$8 sps:$4 sm:$0xff]   ;;  %v1573_v56 = vld [vmem:[%s1661_s28 + $0x170] ss:$8 sps:$4 sm:$0xff]   ;;  %v1577_v58 = vld [vmem:[%s1661_s28 + $0x184] ss:$8 sps:$4 sm:$0xff]  }
  0x1e   : > { %v1576_v59 = vld [vmem:[%s1661_s28 + $0xa0] ss:$8 sps:$4 sm:$0xff]   ;;  %v1580_v61 = vld [vmem:[%s1661_s28 + $0xb4] ss:$8 sps:$4 sm:$0xff]   ;;  %v1582_v63 = vld [vmem:[%s1661_s28 + $0xb0] ss:$8 sps:$4 sm:$0xff]  }
  0x1f   : > { %650 = vmatpush1.bf16.msra.mxu0 %v1504_v9  ;;  %1479 = vmatpush1.bf16.msra.mxu1 %v1504_v9  ;;  %v1579_v60 = vld [vmem:[%s1661_s28 + $0x180] ss:$8 sps:$4 sm:$0xff]   ;;  %v1583_v62 = vld [vmem:[%s1661_s28 + $0x194] ss:$8 sps:$4 sm:$0xff]   ;;  %v1585_v0 = vld [vmem:[%s1661_s28 + $0x190] ss:$8 sps:$4 sm:$0xff]  }
  0x20   : > { %651 = vmatprep.subr.bf16.mxu0 %v1603_v1  ;;  %1464 = vmatprep.subr.bf16.mxu1 %v1603_v1  ;;  %v1589_v2 = vld [vmem:[%s1661_s28 + $0x1a4] ss:$8 sps:$4 sm:$0xff]   ;;  %v1588_v3 = vld [vmem:[%s1661_s28 + $0xc0] ss:$8 sps:$4 sm:$0xff]   ;;  %v1592_v5 = vld [vmem:[%s1661_s28 + $0xd4] ss:$8 sps:$4 sm:$0xff]  }
  0x21   : > { %v1591_v4 = vld [vmem:[%s1661_s28 + $0x1a0] ss:$8 sps:$4 sm:$0xff]   ;;  %v1594_v6 = vld [vmem:[%s1661_s28 + $0xd0] ss:$8 sps:$4 sm:$0xff]  }
  0x22   : > { %v1777_v7 = vld [vmem:[%s1952_s2] ss:$0 sm:$0xff] }
  0x23   : > { %652 = vmatpush1.bf16.msra.mxu0 %v1505_v10  ;;  %1480 = vmatpush1.bf16.msra.mxu1 %v1505_v10 }
  0x24   : > { %653 = vmatprep.subr.bf16.mxu0 %v1603_v1  ;;  %1465 = vmatprep.subr.bf16.mxu1 %v1603_v1 }
  0x27   : > { %654 = vmatpush1.bf16.msra.mxu0 %v1506_v11  ;;  %1481 = vmatpush1.bf16.msra.mxu1 %v1506_v11 }
  0x28   : > { %655 = vmatprep.subr.bf16.mxu0 %v1603_v1  ;;  %1466 = vmatprep.subr.bf16.mxu1 %v1603_v1 }
  0x2b   : > { %656 = vmatpush1.bf16.msra.mxu0 %v1507_v12  ;;  %1482 = vmatpush1.bf16.msra.mxu1 %v1507_v12 }
  0x2c   : > { %657 = vmatprep.subr.bf16.mxu0 %v1603_v1  ;;  %1467 = vmatprep.subr.bf16.mxu1 %v1603_v1 }
  0x2f   : > { %658 = vmatpush1.bf16.msra.mxu0 %v1508_v13  ;;  %1483 = vmatpush1.bf16.msra.mxu1 %v1508_v13 }
  0x30   : > { %659 = vmatprep.subr.bf16.mxu0 %v1603_v1  ;;  %1468 = vmatprep.subr.bf16.mxu1 %v1603_v1 }
  0x33   : > { %660 = vmatpush1.bf16.msra.mxu0 %v1509_v14  ;;  %1484 = vmatpush1.bf16.msra.mxu1 %v1509_v14 }
  0x34   : > { %661 = vmatprep.subr.bf16.mxu0 %v1603_v1  ;;  %1469 = vmatprep.subr.bf16.mxu1 %v1603_v1 }
  0x37   : > { %662 = vmatpush1.bf16.msra.mxu0 %v1510_v15  ;;  %1485 = vmatpush1.bf16.msra.mxu1 %v1510_v15 }
  0x38   : > { %663 = vmatprep.subr.bf16.mxu0 %v1603_v1  ;;  %1470 = vmatprep.subr.bf16.mxu1 %v1603_v1 }
  0x3b   : > { %664 = vmatpush1.bf16.msra.mxu0 %v1511_v16  ;;  %1486 = vmatpush1.bf16.msra.mxu1 %v1511_v16 }
  0x3c   : > { %665 = vmatprep.subr.bf16.mxu0 %v1603_v1  ;;  %1471 = vmatprep.subr.bf16.mxu1 %v1603_v1 }
  0x3f   : > { %666 = vmatpush1.bf16.msra.mxu0 %v1512_v17  ;;  %1487 = vmatpush1.bf16.msra.mxu1 %v1512_v17 }
  0x40   : > { %667 = vmatprep.subr.bf16.mxu0 %v1603_v1  ;;  %1472 = vmatprep.subr.bf16.mxu1 %v1603_v1  ;;  %v1586_v1 = vld [vmem:[%s1661_s28 + $0xc4] ss:$8 sps:$4 sm:$0xff]  }
  0x43   : > { %668 = vmatpush1.bf16.msra.mxu0 %v1513_v18  ;;  %1488 = vmatpush1.bf16.msra.mxu1 %v1513_v18 }
  0x46   : > { %670 = vmatmul.mubr.bf16.vlgmr.msra.gmra.mrb[0].mxu0 %v1514_v19  ;;  %782 = vmatmul.mubr.bf16.vlgmr.msra.gmra.mrb[0].mxu1 %v1517_v20 }
  0x47   : > { %677 = vmatprep.mubr.bf16.mxu0 %v1520_v21  ;;  %789 = vmatprep.mubr.bf16.mxu1 %v1523_v22 }
  0x4e   : > { %678 = vmatmul.mubr.bf16.gmra.mrb[4].mxu0 %v1522_v23  ;;  %790 = vmatmul.mubr.bf16.gmra.mrb[4].mxu1 %v1525_v24 }
  0x4f   : > { %685 = vmatprep.mubr.bf16.mxu0 %v1526_v25  ;;  %797 = vmatprep.mubr.bf16.mxu1 %v1529_v26 }
  0x56   : > { %686 = vmatmul.mubr.bf16.gmra.mrb[8].mxu0 %v1528_v27  ;;  %798 = vmatmul.mubr.bf16.gmra.mrb[8].mxu1 %v1531_v28 }
  0x57   : > { %693 = vmatprep.mubr.bf16.mxu0 %v1532_v29  ;;  %805 = vmatprep.mubr.bf16.mxu1 %v1535_v30 }
  0x5e   : > { %694 = vmatmul.mubr.bf16.gmra.mrb[12].mxu0 %v1534_v31  ;;  %806 = vmatmul.mubr.bf16.gmra.mrb[12].mxu1 %v1537_v32 }
  0x5f   : > { %701 = vmatprep.mubr.bf16.mxu0 %v1538_v33  ;;  %813 = vmatprep.mubr.bf16.mxu1 %v1541_v34 }
  0x66   : > { %702 = vmatmul.mubr.bf16.gmra.mrb[16].mxu0 %v1540_v35  ;;  %814 = vmatmul.mubr.bf16.gmra.mrb[16].mxu1 %v1543_v36 }
  0x67   : > { %709 = vmatprep.mubr.bf16.mxu0 %v1544_v37  ;;  %821 = vmatprep.mubr.bf16.mxu1 %v1547_v38 }
  0x6e   : > { %710 = vmatmul.mubr.bf16.gmra.mrb[20].mxu0 %v1546_v39  ;;  %822 = vmatmul.mubr.bf16.gmra.mrb[20].mxu1 %v1549_v40 }
  0x6f   : > { %717 = vmatprep.mubr.bf16.mxu0 %v1550_v41  ;;  %829 = vmatprep.mubr.bf16.mxu1 %v1553_v42 }
  0x76   : > { %718 = vmatmul.mubr.bf16.gmra.mrb[24].mxu0 %v1552_v43  ;;  %830 = vmatmul.mubr.bf16.gmra.mrb[24].mxu1 %v1555_v44 }
  0x77   : > { %725 = vmatprep.mubr.bf16.mxu0 %v1556_v45  ;;  %837 = vmatprep.mubr.bf16.mxu1 %v1559_v46 }
  0x7e   : > { %726 = vmatmul.mubr.bf16.gmra.mrb[28].mxu0 %v1558_v47  ;;  %838 = vmatmul.mubr.bf16.gmra.mrb[28].mxu1 %v1561_v48 }
  0x7f   : > { %733 = vmatprep.mubr.bf16.mxu0 %v1562_v49  ;;  %845 = vmatprep.mubr.bf16.mxu1 %v1565_v50 }
  0x86   : > { %734 = vmatmul.mubr.bf16.gmra.mrb[32].mxu0 %v1564_v51  ;;  %846 = vmatmul.mubr.bf16.gmra.mrb[32].mxu1 %v1567_v52 }
  0x87   : > { %741 = vmatprep.mubr.bf16.mxu0 %v1568_v53  ;;  %853 = vmatprep.mubr.bf16.mxu1 %v1571_v54 }
  0x8e   : > { %742 = vmatmul.mubr.bf16.gmra.mrb[36].mxu0 %v1570_v55  ;;  %854 = vmatmul.mubr.bf16.gmra.mrb[36].mxu1 %v1573_v56 }
  0x8f   : > { %749 = vmatprep.mubr.bf16.mxu0 %v1574_v57  ;;  %861 = vmatprep.mubr.bf16.mxu1 %v1577_v58 }
  0x96   : > { %750 = vmatmul.mubr.bf16.gmra.mrb[40].mxu0 %v1576_v59  ;;  %862 = vmatmul.mubr.bf16.gmra.mrb[40].mxu1 %v1579_v60 }
  0x97   : > { %757 = vmatprep.mubr.bf16.mxu0 %v1580_v61  ;;  %869 = vmatprep.mubr.bf16.mxu1 %v1583_v62 }
  0x9e   : > { %758 = vmatmul.mubr.bf16.gmra.mrb[44].mxu0 %v1582_v63  ;;  %870 = vmatmul.mubr.bf16.gmra.mrb[44].mxu1 %v1585_v0 }
  0x9f   : > { %765 = vmatprep.mubr.bf16.mxu0 %v1586_v1  ;;  %877 = vmatprep.mubr.bf16.mxu1 %v1589_v2 }
  0xa6   : > { %766 = vmatmul.mubr.bf16.gmra.mrb[48].mxu0 %v1588_v3  ;;  %878 = vmatmul.mubr.bf16.gmra.mrb[48].mxu1 %v1591_v4 }
  0xa7   : > { %773 = vmatprep.mubr.bf16.mxu0 %v1592_v5 }
  0xae   : > { %774 = vmatmul.mubr.bf16.gmra.mrb[52].mxu0 %v1594_v6 }
 0x119   : > { %v671_v8 = vpop.f32.mrb[0].mxu0  ;;  %v783_v9 = vpop.f32.mrb[0].mxu1 }
 0x11a   : > { %v672_v10 = vadd.f32 %v1777_v7, %v671_v8  ;;  %v673_v11 = vpop.f32.mrb[1].mxu0  ;;  %v784_v12 = vadd.f32 %v1777_v7, %v783_v9  ;;  %v785_v13 = vpop.f32.mrb[1].mxu1 }
 0x11b   : > { %v674_v14 = vpop.f32.mrb[2].mxu0  ;;  %v786_v15 = vpop.f32.mrb[2].mxu1 }
 0x11c   : > { %v886_v16 = vmax.f32 %v672_v10, 0.0  ;;  %v675_v17 = vadd.f32 %v1777_v7, %v674_v14  ;;  %v676_v18 = vpop.f32.mrb[3].mxu0  ;;  %v914_v19 = vmax.f32 %v784_v12, 0.0  ;;  %v787_v20 = vadd.f32 %v1777_v7, %v786_v15  ;;  %v788_v21 = vpop.f32.mrb[3].mxu1 }
 0x11e   : > { %v1403_v22 = vpack.c.bf16 %v886_v16, %v886_v16  ;;  %v887_v23 = vmax.f32 %v675_v17, 0.0  ;;  %v1431_v24 = vpack.c.bf16 %v914_v19, %v914_v19  ;;  %v915_v25 = vmax.f32 %v787_v20, 0.0 }
 0x120   : > { %1157 = vst.msk [vmem:[%s1787_s16] sm:$0xf] %vm1156_vm0, %v1403_v22  ;;  %v1404_v26 = vpack.c.bf16 %v887_v23, %v887_v23  ;;  %1185 = vst.msk [vmem:[%s1787_s16 + $0x70] sm:$0xf] %vm1156_vm0, %v1431_v24  ;;  %v1432_v27 = vpack.c.bf16 %v915_v25, %v915_v25 }
 0x121   : > { %v679_v28 = vpop.f32.mrb[4].mxu0  ;;  %v791_v29 = vpop.f32.mrb[4].mxu1 }
 0x122   : > { %1158 = vst.msk [vmem:[%s1787_s16 + $0x4] sm:$0xf] %vm1156_vm0, %v1404_v26  ;;  %1186 = vst.msk [vmem:[%s1787_s16 + $0x74] sm:$0xf] %vm1156_vm0, %v1432_v27  ;;  %v680_v30 = vadd.f32 %v1777_v7, %v679_v28  ;;  %v681_v31 = vpop.f32.mrb[5].mxu0  ;;  %v792_v32 = vadd.f32 %v1777_v7, %v791_v29  ;;  %v793_v33 = vpop.f32.mrb[5].mxu1 }
 0x123   : > { %v682_v34 = vpop.f32.mrb[6].mxu0  ;;  %v794_v35 = vpop.f32.mrb[6].mxu1 }
 0x124   : > { %v888_v36 = vmax.f32 %v680_v30, 0.0  ;;  %v683_v37 = vadd.f32 %v1777_v7, %v682_v34  ;;  %v684_v38 = vpop.f32.mrb[7].mxu0  ;;  %v916_v39 = vmax.f32 %v792_v32, 0.0  ;;  %v795_v40 = vadd.f32 %v1777_v7, %v794_v35  ;;  %v796_v41 = vpop.f32.mrb[7].mxu1 }
 0x126   : > { %v1405_v42 = vpack.c.bf16 %v888_v36, %v888_v36  ;;  %v889_v43 = vmax.f32 %v683_v37, 0.0  ;;  %v1433_v44 = vpack.c.bf16 %v916_v39, %v916_v39  ;;  %v917_v45 = vmax.f32 %v795_v40, 0.0 }
 0x128   : > { %1159 = vst.msk [vmem:[%s1787_s16 + $0x8] sm:$0xf] %vm1156_vm0, %v1405_v42  ;;  %v1406_v46 = vpack.c.bf16 %v889_v43, %v889_v43  ;;  %1187 = vst.msk [vmem:[%s1787_s16 + $0x78] sm:$0xf] %vm1156_vm0, %v1433_v44  ;;  %v1434_v47 = vpack.c.bf16 %v917_v45, %v917_v45 }
 0x129   : > { %v687_v48 = vpop.f32.mrb[8].mxu0  ;;  %v799_v49 = vpop.f32.mrb[8].mxu1 }
 0x12a   : > { %1160 = vst.msk [vmem:[%s1787_s16 + $0xc] sm:$0xf] %vm1156_vm0, %v1406_v46  ;;  %1188 = vst.msk [vmem:[%s1787_s16 + $0x7c] sm:$0xf] %vm1156_vm0, %v1434_v47  ;;  %v688_v50 = vadd.f32 %v1777_v7, %v687_v48  ;;  %v689_v51 = vpop.f32.mrb[9].mxu0  ;;  %v800_v52 = vadd.f32 %v1777_v7, %v799_v49  ;;  %v801_v53 = vpop.f32.mrb[9].mxu1 }
 0x12b   : > { %v690_v54 = vpop.f32.mrb[10].mxu0  ;;  %v802_v55 = vpop.f32.mrb[10].mxu1 }
 0x12c   : > { %v890_v56 = vmax.f32 %v688_v50, 0.0  ;;  %v691_v57 = vadd.f32 %v1777_v7, %v690_v54  ;;  %v692_v58 = vpop.f32.mrb[11].mxu0  ;;  %v918_v59 = vmax.f32 %v800_v52, 0.0  ;;  %v803_v60 = vadd.f32 %v1777_v7, %v802_v55  ;;  %v804_v61 = vpop.f32.mrb[11].mxu1 }
 0x12e   : > { %v1407_v62 = vpack.c.bf16 %v890_v56, %v890_v56  ;;  %v891_v63 = vmax.f32 %v691_v57, 0.0  ;;  %v1435_v0 = vpack.c.bf16 %v918_v59, %v918_v59  ;;  %v919_v1 = vmax.f32 %v803_v60, 0.0 }
 0x130   : > { %1161 = vst.msk [vmem:[%s1787_s16 + $0x10] sm:$0xf] %vm1156_vm0, %v1407_v62  ;;  %v1408_v2 = vpack.c.bf16 %v891_v63, %v891_v63  ;;  %1189 = vst.msk [vmem:[%s1787_s16 + $0x80] sm:$0xf] %vm1156_vm0, %v1435_v0  ;;  %v1436_v3 = vpack.c.bf16 %v919_v1, %v919_v1 }
 0x131   : > { %v695_v4 = vpop.f32.mrb[12].mxu0  ;;  %v807_v5 = vpop.f32.mrb[12].mxu1 }
 0x132   : > { %1162 = vst.msk [vmem:[%s1787_s16 + $0x14] sm:$0xf] %vm1156_vm0, %v1408_v2  ;;  %1190 = vst.msk [vmem:[%s1787_s16 + $0x84] sm:$0xf] %vm1156_vm0, %v1436_v3  ;;  %v696_v6 = vadd.f32 %v1777_v7, %v695_v4  ;;  %v697_v8 = vpop.f32.mrb[13].mxu0  ;;  %v808_v9 = vadd.f32 %v1777_v7, %v807_v5  ;;  %v809_v10 = vpop.f32.mrb[13].mxu1 }
 0x133   : > { %v698_v11 = vpop.f32.mrb[14].mxu0  ;;  %v810_v12 = vpop.f32.mrb[14].mxu1 }
 0x134   : > { %v892_v13 = vmax.f32 %v696_v6, 0.0  ;;  %v699_v14 = vadd.f32 %v1777_v7, %v698_v11  ;;  %v700_v15 = vpop.f32.mrb[15].mxu0  ;;  %v920_v16 = vmax.f32 %v808_v9, 0.0  ;;  %v811_v17 = vadd.f32 %v1777_v7, %v810_v12  ;;  %v812_v18 = vpop.f32.mrb[15].mxu1 }
 0x136   : > { %v1409_v19 = vpack.c.bf16 %v892_v13, %v892_v13  ;;  %v893_v20 = vmax.f32 %v699_v14, 0.0  ;;  %v1437_v21 = vpack.c.bf16 %v920_v16, %v920_v16  ;;  %v921_v22 = vmax.f32 %v811_v17, 0.0 }
 0x138   : > { %1163 = vst.msk [vmem:[%s1787_s16 + $0x18] sm:$0xf] %vm1156_vm0, %v1409_v19  ;;  %v1410_v23 = vpack.c.bf16 %v893_v20, %v893_v20  ;;  %1191 = vst.msk [vmem:[%s1787_s16 + $0x88] sm:$0xf] %vm1156_vm0, %v1437_v21  ;;  %v1438_v24 = vpack.c.bf16 %v921_v22, %v921_v22 }
 0x139   : > { %v703_v25 = vpop.f32.mrb[16].mxu0  ;;  %v815_v26 = vpop.f32.mrb[16].mxu1 }
 0x13a   : > { %1164 = vst.msk [vmem:[%s1787_s16 + $0x1c] sm:$0xf] %vm1156_vm0, %v1410_v23  ;;  %1192 = vst.msk [vmem:[%s1787_s16 + $0x8c] sm:$0xf] %vm1156_vm0, %v1438_v24  ;;  %v704_v27 = vadd.f32 %v1777_v7, %v703_v25  ;;  %v705_v28 = vpop.f32.mrb[17].mxu0  ;;  %v816_v29 = vadd.f32 %v1777_v7, %v815_v26  ;;  %v817_v30 = vpop.f32.mrb[17].mxu1 }
 0x13b   : > { %v706_v31 = vpop.f32.mrb[18].mxu0  ;;  %v818_v32 = vpop.f32.mrb[18].mxu1 }
 0x13c   : > { %v894_v33 = vmax.f32 %v704_v27, 0.0  ;;  %v707_v34 = vadd.f32 %v1777_v7, %v706_v31  ;;  %v708_v35 = vpop.f32.mrb[19].mxu0  ;;  %v922_v36 = vmax.f32 %v816_v29, 0.0  ;;  %v819_v37 = vadd.f32 %v1777_v7, %v818_v32  ;;  %v820_v38 = vpop.f32.mrb[19].mxu1 }
 0x13e   : > { %v1411_v39 = vpack.c.bf16 %v894_v33, %v894_v33  ;;  %v895_v40 = vmax.f32 %v707_v34, 0.0  ;;  %v1439_v41 = vpack.c.bf16 %v922_v36, %v922_v36  ;;  %v923_v42 = vmax.f32 %v819_v37, 0.0 }
 0x140   : > { %1165 = vst.msk [vmem:[%s1787_s16 + $0x20] sm:$0xf] %vm1156_vm0, %v1411_v39  ;;  %v1412_v43 = vpack.c.bf16 %v895_v40, %v895_v40  ;;  %1193 = vst.msk [vmem:[%s1787_s16 + $0x90] sm:$0xf] %vm1156_vm0, %v1439_v41  ;;  %v1440_v44 = vpack.c.bf16 %v923_v42, %v923_v42 }
 0x141   : > { %v711_v45 = vpop.f32.mrb[20].mxu0  ;;  %v823_v46 = vpop.f32.mrb[20].mxu1 }
 0x142   : > { %1166 = vst.msk [vmem:[%s1787_s16 + $0x24] sm:$0xf] %vm1156_vm0, %v1412_v43  ;;  %1194 = vst.msk [vmem:[%s1787_s16 + $0x94] sm:$0xf] %vm1156_vm0, %v1440_v44  ;;  %v712_v47 = vadd.f32 %v1777_v7, %v711_v45  ;;  %v713_v48 = vpop.f32.mrb[21].mxu0  ;;  %v824_v49 = vadd.f32 %v1777_v7, %v823_v46  ;;  %v825_v50 = vpop.f32.mrb[21].mxu1 }
 0x143   : > { %v714_v51 = vpop.f32.mrb[22].mxu0  ;;  %v826_v52 = vpop.f32.mrb[22].mxu1 }
 0x144   : > { %v896_v53 = vmax.f32 %v712_v47, 0.0  ;;  %v715_v54 = vadd.f32 %v1777_v7, %v714_v51  ;;  %v716_v55 = vpop.f32.mrb[23].mxu0  ;;  %v924_v56 = vmax.f32 %v824_v49, 0.0  ;;  %v827_v57 = vadd.f32 %v1777_v7, %v826_v52  ;;  %v828_v58 = vpop.f32.mrb[23].mxu1 }
 0x146   : > { %v1413_v59 = vpack.c.bf16 %v896_v53, %v896_v53  ;;  %v897_v60 = vmax.f32 %v715_v54, 0.0  ;;  %v1441_v61 = vpack.c.bf16 %v924_v56, %v924_v56  ;;  %v925_v62 = vmax.f32 %v827_v57, 0.0 }
 0x148   : > { %1167 = vst.msk [vmem:[%s1787_s16 + $0x28] sm:$0xf] %vm1156_vm0, %v1413_v59  ;;  %v1414_v63 = vpack.c.bf16 %v897_v60, %v897_v60  ;;  %1195 = vst.msk [vmem:[%s1787_s16 + $0x98] sm:$0xf] %vm1156_vm0, %v1441_v61  ;;  %v1442_v0 = vpack.c.bf16 %v925_v62, %v925_v62 }
 0x149   : > { %v719_v1 = vpop.f32.mrb[24].mxu0  ;;  %v831_v2 = vpop.f32.mrb[24].mxu1 }
 0x14a   : > { %1168 = vst.msk [vmem:[%s1787_s16 + $0x2c] sm:$0xf] %vm1156_vm0, %v1414_v63  ;;  %1196 = vst.msk [vmem:[%s1787_s16 + $0x9c] sm:$0xf] %vm1156_vm0, %v1442_v0  ;;  %v720_v3 = vadd.f32 %v1777_v7, %v719_v1  ;;  %v721_v4 = vpop.f32.mrb[25].mxu0  ;;  %v832_v5 = vadd.f32 %v1777_v7, %v831_v2  ;;  %v833_v6 = vpop.f32.mrb[25].mxu1 }
 0x14b   : > { %v722_v8 = vpop.f32.mrb[26].mxu0  ;;  %v834_v9 = vpop.f32.mrb[26].mxu1 }
 0x14c   : > { %v898_v10 = vmax.f32 %v720_v3, 0.0  ;;  %v723_v11 = vadd.f32 %v1777_v7, %v722_v8  ;;  %v724_v12 = vpop.f32.mrb[27].mxu0  ;;  %v926_v13 = vmax.f32 %v832_v5, 0.0  ;;  %v835_v14 = vadd.f32 %v1777_v7, %v834_v9  ;;  %v836_v15 = vpop.f32.mrb[27].mxu1 }
 0x14e   : > { %v1415_v16 = vpack.c.bf16 %v898_v10, %v898_v10  ;;  %v899_v17 = vmax.f32 %v723_v11, 0.0  ;;  %v1443_v18 = vpack.c.bf16 %v926_v13, %v926_v13  ;;  %v927_v19 = vmax.f32 %v835_v14, 0.0 }
 0x150   : > { %1169 = vst.msk [vmem:[%s1787_s16 + $0x30] sm:$0xf] %vm1156_vm0, %v1415_v16  ;;  %v1416_v20 = vpack.c.bf16 %v899_v17, %v899_v17  ;;  %1197 = vst.msk [vmem:[%s1787_s16 + $0xa0] sm:$0xf] %vm1156_vm0, %v1443_v18  ;;  %v1444_v21 = vpack.c.bf16 %v927_v19, %v927_v19 }
 0x151   : > { %v727_v22 = vpop.f32.mrb[28].mxu0  ;;  %v839_v23 = vpop.f32.mrb[28].mxu1 }
 0x152   : > { %1170 = vst.msk [vmem:[%s1787_s16 + $0x34] sm:$0xf] %vm1156_vm0, %v1416_v20  ;;  %1198 = vst.msk [vmem:[%s1787_s16 + $0xa4] sm:$0xf] %vm1156_vm0, %v1444_v21  ;;  %v728_v24 = vadd.f32 %v1777_v7, %v727_v22  ;;  %v729_v25 = vpop.f32.mrb[29].mxu0  ;;  %v840_v26 = vadd.f32 %v1777_v7, %v839_v23  ;;  %v841_v27 = vpop.f32.mrb[29].mxu1 }
 0x153   : > { %v730_v28 = vpop.f32.mrb[30].mxu0  ;;  %v842_v29 = vpop.f32.mrb[30].mxu1 }
 0x154   : > { %v900_v30 = vmax.f32 %v728_v24, 0.0  ;;  %v731_v31 = vadd.f32 %v1777_v7, %v730_v28  ;;  %v732_v32 = vpop.f32.mrb[31].mxu0  ;;  %v928_v33 = vmax.f32 %v840_v26, 0.0  ;;  %v843_v34 = vadd.f32 %v1777_v7, %v842_v29  ;;  %v844_v35 = vpop.f32.mrb[31].mxu1 }
 0x156   : > { %v1417_v36 = vpack.c.bf16 %v900_v30, %v900_v30  ;;  %v901_v37 = vmax.f32 %v731_v31, 0.0  ;;  %v1445_v38 = vpack.c.bf16 %v928_v33, %v928_v33  ;;  %v929_v39 = vmax.f32 %v843_v34, 0.0 }
 0x158   : > { %1171 = vst.msk [vmem:[%s1787_s16 + $0x38] sm:$0xf] %vm1156_vm0, %v1417_v36  ;;  %v1418_v40 = vpack.c.bf16 %v901_v37, %v901_v37  ;;  %1199 = vst.msk [vmem:[%s1787_s16 + $0xa8] sm:$0xf] %vm1156_vm0, %v1445_v38  ;;  %v1446_v41 = vpack.c.bf16 %v929_v39, %v929_v39 }
 0x159   : > { %v735_v42 = vpop.f32.mrb[32].mxu0  ;;  %v847_v43 = vpop.f32.mrb[32].mxu1 }
 0x15a   : > { %1172 = vst.msk [vmem:[%s1787_s16 + $0x3c] sm:$0xf] %vm1156_vm0, %v1418_v40  ;;  %1200 = vst.msk [vmem:[%s1787_s16 + $0xac] sm:$0xf] %vm1156_vm0, %v1446_v41  ;;  %v736_v44 = vadd.f32 %v1777_v7, %v735_v42  ;;  %v737_v45 = vpop.f32.mrb[33].mxu0  ;;  %v848_v46 = vadd.f32 %v1777_v7, %v847_v43  ;;  %v849_v47 = vpop.f32.mrb[33].mxu1 }
 0x15b   : > { %v738_v48 = vpop.f32.mrb[34].mxu0  ;;  %v850_v49 = vpop.f32.mrb[34].mxu1 }
 0x15c   : > { %v902_v50 = vmax.f32 %v736_v44, 0.0  ;;  %v739_v51 = vadd.f32 %v1777_v7, %v738_v48  ;;  %v740_v52 = vpop.f32.mrb[35].mxu0  ;;  %v930_v53 = vmax.f32 %v848_v46, 0.0  ;;  %v851_v54 = vadd.f32 %v1777_v7, %v850_v49  ;;  %v852_v55 = vpop.f32.mrb[35].mxu1 }
 0x15e   : > { %v1419_v56 = vpack.c.bf16 %v902_v50, %v902_v50  ;;  %v903_v57 = vmax.f32 %v739_v51, 0.0  ;;  %v1447_v58 = vpack.c.bf16 %v930_v53, %v930_v53  ;;  %v931_v59 = vmax.f32 %v851_v54, 0.0 }
 0x160   : > { %1173 = vst.msk [vmem:[%s1787_s16 + $0x40] sm:$0xf] %vm1156_vm0, %v1419_v56  ;;  %v1420_v60 = vpack.c.bf16 %v903_v57, %v903_v57  ;;  %1201 = vst.msk [vmem:[%s1787_s16 + $0xb0] sm:$0xf] %vm1156_vm0, %v1447_v58  ;;  %v1448_v61 = vpack.c.bf16 %v931_v59, %v931_v59 }
 0x161   : > { %v743_v62 = vpop.f32.mrb[36].mxu0  ;;  %v855_v63 = vpop.f32.mrb[36].mxu1 }
 0x162   : > { %1174 = vst.msk [vmem:[%s1787_s16 + $0x44] sm:$0xf] %vm1156_vm0, %v1420_v60  ;;  %1202 = vst.msk [vmem:[%s1787_s16 + $0xb4] sm:$0xf] %vm1156_vm0, %v1448_v61  ;;  %v744_v0 = vadd.f32 %v1777_v7, %v743_v62  ;;  %v745_v1 = vpop.f32.mrb[37].mxu0  ;;  %v856_v2 = vadd.f32 %v1777_v7, %v855_v63  ;;  %v857_v3 = vpop.f32.mrb[37].mxu1 }
 0x163   : > { %v746_v4 = vpop.f32.mrb[38].mxu0  ;;  %v858_v5 = vpop.f32.mrb[38].mxu1 }
 0x164   : > { %v904_v6 = vmax.f32 %v744_v0, 0.0  ;;  %v747_v8 = vadd.f32 %v1777_v7, %v746_v4  ;;  %v748_v9 = vpop.f32.mrb[39].mxu0  ;;  %v932_v10 = vmax.f32 %v856_v2, 0.0  ;;  %v859_v11 = vadd.f32 %v1777_v7, %v858_v5  ;;  %v860_v12 = vpop.f32.mrb[39].mxu1 }
 0x166   : > { %v1421_v13 = vpack.c.bf16 %v904_v6, %v904_v6  ;;  %v905_v14 = vmax.f32 %v747_v8, 0.0  ;;  %v1449_v15 = vpack.c.bf16 %v932_v10, %v932_v10  ;;  %v933_v16 = vmax.f32 %v859_v11, 0.0 }
 0x168   : > { %1175 = vst.msk [vmem:[%s1787_s16 + $0x48] sm:$0xf] %vm1156_vm0, %v1421_v13  ;;  %v1422_v17 = vpack.c.bf16 %v905_v14, %v905_v14  ;;  %1203 = vst.msk [vmem:[%s1787_s16 + $0xb8] sm:$0xf] %vm1156_vm0, %v1449_v15  ;;  %v1450_v18 = vpack.c.bf16 %v933_v16, %v933_v16 }
 0x169   : > { %v751_v19 = vpop.f32.mrb[40].mxu0  ;;  %v863_v20 = vpop.f32.mrb[40].mxu1 }
 0x16a   : > { %1176 = vst.msk [vmem:[%s1787_s16 + $0x4c] sm:$0xf] %vm1156_vm0, %v1422_v17  ;;  %1204 = vst.msk [vmem:[%s1787_s16 + $0xbc] sm:$0xf] %vm1156_vm0, %v1450_v18  ;;  %v752_v21 = vadd.f32 %v1777_v7, %v751_v19  ;;  %v753_v22 = vpop.f32.mrb[41].mxu0  ;;  %v864_v23 = vadd.f32 %v1777_v7, %v863_v20  ;;  %v865_v24 = vpop.f32.mrb[41].mxu1 }
 0x16b   : > { %v754_v25 = vpop.f32.mrb[42].mxu0  ;;  %v866_v26 = vpop.f32.mrb[42].mxu1 }
 0x16c   : > { %v906_v27 = vmax.f32 %v752_v21, 0.0  ;;  %v755_v28 = vadd.f32 %v1777_v7, %v754_v25  ;;  %v756_v29 = vpop.f32.mrb[43].mxu0  ;;  %v934_v30 = vmax.f32 %v864_v23, 0.0  ;;  %v867_v31 = vadd.f32 %v1777_v7, %v866_v26  ;;  %v868_v32 = vpop.f32.mrb[43].mxu1 }
 0x16e   : > { %v1423_v33 = vpack.c.bf16 %v906_v27, %v906_v27  ;;  %v907_v34 = vmax.f32 %v755_v28, 0.0  ;;  %v1451_v35 = vpack.c.bf16 %v934_v30, %v934_v30  ;;  %v935_v36 = vmax.f32 %v867_v31, 0.0 }
 0x170   : > { %1177 = vst.msk [vmem:[%s1787_s16 + $0x50] sm:$0xf] %vm1156_vm0, %v1423_v33  ;;  %v1424_v37 = vpack.c.bf16 %v907_v34, %v907_v34  ;;  %1205 = vst.msk [vmem:[%s1787_s16 + $0xc0] sm:$0xf] %vm1156_vm0, %v1451_v35  ;;  %v1452_v38 = vpack.c.bf16 %v935_v36, %v935_v36 }
 0x171   : > { %v759_v39 = vpop.f32.mrb[44].mxu0  ;;  %v871_v40 = vpop.f32.mrb[44].mxu1 }
 0x172   : > { %1178 = vst.msk [vmem:[%s1787_s16 + $0x54] sm:$0xf] %vm1156_vm0, %v1424_v37  ;;  %1206 = vst.msk [vmem:[%s1787_s16 + $0xc4] sm:$0xf] %vm1156_vm0, %v1452_v38  ;;  %v760_v41 = vadd.f32 %v1777_v7, %v759_v39  ;;  %v761_v42 = vpop.f32.mrb[45].mxu0  ;;  %v872_v43 = vadd.f32 %v1777_v7, %v871_v40  ;;  %v873_v44 = vpop.f32.mrb[45].mxu1 }
 0x173   : > { %v762_v45 = vpop.f32.mrb[46].mxu0  ;;  %v874_v46 = vpop.f32.mrb[46].mxu1 }
 0x174   : > { %v908_v47 = vmax.f32 %v760_v41, 0.0  ;;  %v763_v48 = vadd.f32 %v1777_v7, %v762_v45  ;;  %v764_v49 = vpop.f32.mrb[47].mxu0  ;;  %v936_v50 = vmax.f32 %v872_v43, 0.0  ;;  %v875_v51 = vadd.f32 %v1777_v7, %v874_v46  ;;  %v876_v52 = vpop.f32.mrb[47].mxu1 }
 0x176   : > { %v1425_v53 = vpack.c.bf16 %v908_v47, %v908_v47  ;;  %v909_v54 = vmax.f32 %v763_v48, 0.0  ;;  %v1453_v55 = vpack.c.bf16 %v936_v50, %v936_v50  ;;  %v937_v56 = vmax.f32 %v875_v51, 0.0 }
 0x178   : > { %1179 = vst.msk [vmem:[%s1787_s16 + $0x58] sm:$0xf] %vm1156_vm0, %v1425_v53  ;;  %v1426_v57 = vpack.c.bf16 %v909_v54, %v909_v54  ;;  %1207 = vst.msk [vmem:[%s1787_s16 + $0xc8] sm:$0xf] %vm1156_vm0, %v1453_v55  ;;  %v1454_v58 = vpack.c.bf16 %v937_v56, %v937_v56 }
 0x179   : > { %v767_v59 = vpop.f32.mrb[48].mxu0  ;;  %v879_v60 = vpop.f32.mrb[48].mxu1 }
 0x17a   : > { %1180 = vst.msk [vmem:[%s1787_s16 + $0x5c] sm:$0xf] %vm1156_vm0, %v1426_v57  ;;  %1208 = vst.msk [vmem:[%s1787_s16 + $0xcc] sm:$0xf] %vm1156_vm0, %v1454_v58  ;;  %v768_v61 = vadd.f32 %v1777_v7, %v767_v59  ;;  %v769_v62 = vpop.f32.mrb[49].mxu0  ;;  %v880_v63 = vadd.f32 %v1777_v7, %v879_v60  ;;  %v881_v0 = vpop.f32.mrb[49].mxu1 }
 0x17b   : > { %v770_v1 = vpop.f32.mrb[50].mxu0  ;;  %v882_v2 = vpop.f32.mrb[50].mxu1 }
 0x17c   : > { %v910_v3 = vmax.f32 %v768_v61, 0.0  ;;  %v771_v4 = vadd.f32 %v1777_v7, %v770_v1  ;;  %v772_v5 = vpop.f32.mrb[51].mxu0  ;;  %v938_v6 = vmax.f32 %v880_v63, 0.0  ;;  %v883_v8 = vadd.f32 %v1777_v7, %v882_v2  ;;  %v884_v9 = vpop.f32.mrb[51].mxu1 }
 0x17e   : > { %v1427_v10 = vpack.c.bf16 %v910_v3, %v910_v3  ;;  %v911_v11 = vmax.f32 %v771_v4, 0.0  ;;  %v1455_v12 = vpack.c.bf16 %v938_v6, %v938_v6  ;;  %v939_v13 = vmax.f32 %v883_v8, 0.0 }
 0x180   : > { %1181 = vst.msk [vmem:[%s1787_s16 + $0x60] sm:$0xf] %vm1156_vm0, %v1427_v10  ;;  %v1428_v14 = vpack.c.bf16 %v911_v11, %v911_v11  ;;  %1209 = vst.msk [vmem:[%s1787_s16 + $0xd0] sm:$0xf] %vm1156_vm0, %v1455_v12  ;;  %v1456_v15 = vpack.c.bf16 %v939_v13, %v939_v13 }
 0x181   : > { %v775_v16 = vpop.f32.mrb[52].mxu0 }
 0x182   : > { %1182 = vst.msk [vmem:[%s1787_s16 + $0x64] sm:$0xf] %vm1156_vm0, %v1428_v14  ;;  %1210 = vst.msk [vmem:[%s1787_s16 + $0xd4] sm:$0xf] %vm1156_vm0, %v1456_v15  ;;  %v776_v17 = vadd.f32 %v1777_v7, %v775_v16  ;;  %v777_v18 = vpop.f32.mrb[53].mxu0 }
 0x183   : > { %v778_v19 = vpop.f32.mrb[54].mxu0 }
 0x184   : > { %v912_v20 = vmax.f32 %v776_v17, 0.0  ;;  %v779_v21 = vadd.f32 %v1777_v7, %v778_v19  ;;  %v780_v22 = vpop.f32.mrb[55].mxu0 }
 0x186   : > { %v1429_v23 = vpack.c.bf16 %v912_v20, %v912_v20  ;;  %v913_v24 = vmax.f32 %v779_v21, 0.0 }
 0x188   : > { %1183 = vst.msk [vmem:[%s1787_s16 + $0x68] sm:$0xf] %vm1156_vm0, %v1429_v23  ;;  %v1430_v25 = vpack.c.bf16 %v913_v24, %v913_v24 }
 0x18a   : > { %1184 = vst.msk [vmem:[%s1787_s16 + $0x6c] sm:$0xf] %vm1156_vm0, %v1430_v25 }
 0x18b PF: > { %s13_s12 = sadd.s32 1, %s1601_s12  }
 0x18c   : > { %p10_p4 = scmp.ge.s32.totalorder %s13_s12, 4  }
 0x18e   :  { %12 = sbr.rel (!%p10_p4) target bundleno = 1 (0x1), region = 62 }

// kernel: birdnet_forward.5
= control target key start
LH: loop header
LB: loop body
LE: loop exit
PB: predicated region body
PF: predicated region fallthrough
CT: control target
= control target key end

     0   :  { %vm894_vm0 = vcmask 519168   ;;  %s1667_s1 = inlined_call_operand.vmem [shape: bf16[512,64], index: 1, kind: input, shape index: {}]   ;;  %s1668_s0 = inlined_call_operand.vmem [shape: bf16[176,512], index: 0, kind: input, shape index: {}]   ;;  %s1669_s2 = inlined_call_operand.vmem [shape: f32[1,64], index: 2, kind: input, shape index: {}]   ;;  %s1670_s3 = inlined_call_operand.vmem [shape: bf16[176,64], index: 3, kind: output, shape index: {}]  }
   0x1   :  { %v1206_v0 = vld [vmem:[%s1667_s1 + $0x40] sm:$0xff]   ;;  %v1210_v4 = vld [vmem:[%s1667_s1 + $0x48] sm:$0xff]   ;;  %v1214_v8 = vld [vmem:[%s1667_s1 + $0x50] sm:$0xff]  }
   0x2   :  { %v1207_v1 = vld [vmem:[%s1667_s1 + $0xc0] sm:$0xff]   ;;  %1042 = vmatprep.subr.bf16.mxu0 %v1206_v0  ;;  %v1211_v5 = vld [vmem:[%s1667_s1 + $0xc8] sm:$0xff]   ;;  %v1215_v9 = vld [vmem:[%s1667_s1 + $0xd0] sm:$0xff]  }
   0x3   :  { %v1208_v2 = vld [vmem:[%s1667_s1] sm:$0xff]   ;;  %1124 = vmatprep.subr.bf16.mxu1 %v1207_v1  ;;  %v1212_v6 = vld [vmem:[%s1667_s1 + $0x8] sm:$0xff]   ;;  %v1216_v10 = vld [vmem:[%s1667_s1 + $0x10] sm:$0xff]  }
   0x4   :  { %v1209_v3 = vld [vmem:[%s1667_s1 + $0x80] sm:$0xff]   ;;  %1043 = vmatpush3.bf16.msra.mxu0 %v1208_v2  ;;  %v1213_v7 = vld [vmem:[%s1667_s1 + $0x88] sm:$0xff]   ;;  %v1217_v11 = vld [vmem:[%s1667_s1 + $0x90] sm:$0xff]  }
   0x5   :  { %1125 = vmatpush3.bf16.msra.mxu1 %v1209_v3  ;;  %1044 = vmatprep.subr.bf16.mxu0 %v1210_v4  ;;  %v1218_v12 = vld [vmem:[%s1667_s1 + $0x58] sm:$0xff]   ;;  %v1222_v16 = vld [vmem:[%s1667_s1 + $0x60] sm:$0xff]   ;;  %v1226_v20 = vld [vmem:[%s1667_s1 + $0x68] sm:$0xff]  }
   0x6   :  { %1126 = vmatprep.subr.bf16.mxu1 %v1211_v5  ;;  %v1219_v13 = vld [vmem:[%s1667_s1 + $0xd8] sm:$0xff]   ;;  %v1223_v17 = vld [vmem:[%s1667_s1 + $0xe0] sm:$0xff]   ;;  %v1227_v21 = vld [vmem:[%s1667_s1 + $0xe8] sm:$0xff]  }
   0x7   :  { %v1220_v14 = vld [vmem:[%s1667_s1 + $0x18] sm:$0xff]   ;;  %v1224_v18 = vld [vmem:[%s1667_s1 + $0x20] sm:$0xff]   ;;  %v1228_v22 = vld [vmem:[%s1667_s1 + $0x28] sm:$0xff]  }
   0x8   :  { %1045 = vmatpush3.bf16.msra.mxu0 %v1212_v6  ;;  %v1221_v15 = vld [vmem:[%s1667_s1 + $0x98] sm:$0xff]   ;;  %v1225_v19 = vld [vmem:[%s1667_s1 + $0xa0] sm:$0xff]   ;;  %v1229_v23 = vld [vmem:[%s1667_s1 + $0xa8] sm:$0xff]  }
   0x9   :  { %1127 = vmatpush3.bf16.msra.mxu1 %v1213_v7  ;;  %1046 = vmatprep.subr.bf16.mxu0 %v1214_v8  ;;  %v1230_v24 = vld [vmem:[%s1667_s1 + $0x70] sm:$0xff]   ;;  %v1234_v28 = vld [vmem:[%s1667_s1 + $0x78] sm:$0xff]  }
   0xa   :  { %1128 = vmatprep.subr.bf16.mxu1 %v1215_v9  ;;  %v1231_v25 = vld [vmem:[%s1667_s1 + $0xf0] sm:$0xff]   ;;  %v1235_v29 = vld [vmem:[%s1667_s1 + $0xf8] sm:$0xff]  }
   0xb   :  { %v1232_v26 = vld [vmem:[%s1667_s1 + $0x30] sm:$0xff]   ;;  %v1236_v30 = vld [vmem:[%s1667_s1 + $0x38] sm:$0xff]  }
   0xc   :  { %1047 = vmatpush3.bf16.msra.mxu0 %v1216_v10  ;;  %v1233_v27 = vld [vmem:[%s1667_s1 + $0xb0] sm:$0xff]   ;;  %v1237_v31 = vld [vmem:[%s1667_s1 + $0xb8] sm:$0xff]  }
   0xd   :  { %1129 = vmatpush3.bf16.msra.mxu1 %v1217_v11  ;;  %1048 = vmatprep.subr.bf16.mxu0 %v1218_v12  ;;  %v1238_v32 = vld [vmem:[%s1668_s0] ss:$16 sps:$4 sm:$0xff]   ;;  %v1240_v33 = vld [vmem:[%s1668_s0 + $0x4] ss:$16 sps:$4 sm:$0xff]   ;;  %v1241_v34 = vld [vmem:[%s1668_s0 + $0x8] ss:$16 sps:$4 sm:$0xff]  }
   0xe   :  { %1130 = vmatprep.subr.bf16.mxu1 %v1219_v13  ;;  %v1243_v35 = vld [vmem:[%s1668_s0 + $0xc] ss:$16 sps:$4 sm:$0xff]   ;;  %574 = vmatprep.mubr.bf16.mxu0 %v1240_v33  ;;  %v1244_v36 = vld [vmem:[%s1668_s0 + $0x24] ss:$16 sps:$4 sm:$0xff]   ;;  %v1248_v38 = vld [vmem:[%s1668_s0 + $0x20] ss:$16 sps:$4 sm:$0xff]  }
   0xf   :  { %695 = vmatprep.mubr.bf16.mxu1 %v1243_v35  ;;  %v1246_v37 = vld [vmem:[%s1668_s0 + $0x2c] ss:$16 sps:$4 sm:$0xff]   ;;  %v1249_v39 = vld [vmem:[%s1668_s0 + $0x28] ss:$16 sps:$4 sm:$0xff]   ;;  %v1250_v40 = vld [vmem:[%s1668_s0 + $0x44] ss:$16 sps:$4 sm:$0xff]  }
  0x10   :  { %1049 = vmatpush3.bf16.msra.mxu0 %v1220_v14  ;;  %v1252_v41 = vld [vmem:[%s1668_s0 + $0x4c] ss:$16 sps:$4 sm:$0xff]   ;;  %v1254_v42 = vld [vmem:[%s1668_s0 + $0x40] ss:$16 sps:$4 sm:$0xff]   ;;  %v1255_v43 = vld [vmem:[%s1668_s0 + $0x48] ss:$16 sps:$4 sm:$0xff]  }
  0x11   :  { %1131 = vmatpush3.bf16.msra.mxu1 %v1221_v15  ;;  %1050 = vmatprep.subr.bf16.mxu0 %v1222_v16  ;;  %v1256_v44 = vld [vmem:[%s1668_s0 + $0x64] ss:$16 sps:$4 sm:$0xff]   ;;  %v1258_v45 = vld [vmem:[%s1668_s0 + $0x6c] ss:$16 sps:$4 sm:$0xff]   ;;  %v1260_v46 = vld [vmem:[%s1668_s0 + $0x60] ss:$16 sps:$4 sm:$0xff]  }
  0x12   :  { %1132 = vmatprep.subr.bf16.mxu1 %v1223_v17  ;;  %v1261_v47 = vld [vmem:[%s1668_s0 + $0x68] ss:$16 sps:$4 sm:$0xff]   ;;  %v1262_v48 = vld [vmem:[%s1668_s0 + $0x84] ss:$16 sps:$4 sm:$0xff]   ;;  %v1264_v49 = vld [vmem:[%s1668_s0 + $0x8c] ss:$16 sps:$4 sm:$0xff]  }
  0x13   :  { %v1266_v50 = vld [vmem:[%s1668_s0 + $0x80] ss:$16 sps:$4 sm:$0xff]   ;;  %v1267_v51 = vld [vmem:[%s1668_s0 + $0x88] ss:$16 sps:$4 sm:$0xff]   ;;  %v1268_v52 = vld [vmem:[%s1668_s0 + $0xa4] ss:$16 sps:$4 sm:$0xff]  }
  0x14   :  { %1051 = vmatpush3.bf16.msra.mxu0 %v1224_v18  ;;  %v1270_v53 = vld [vmem:[%s1668_s0 + $0xac] ss:$16 sps:$4 sm:$0xff]   ;;  %v1272_v54 = vld [vmem:[%s1668_s0 + $0xa0] ss:$16 sps:$4 sm:$0xff]   ;;  %v1273_v55 = vld [vmem:[%s1668_s0 + $0xa8] ss:$16 sps:$4 sm:$0xff]  }
  0x15   :  { %1133 = vmatpush3.bf16.msra.mxu1 %v1225_v19  ;;  %1052 = vmatprep.subr.bf16.mxu0 %v1226_v20  ;;  %v1274_v56 = vld [vmem:[%s1668_s0 + $0xc4] ss:$16 sps:$4 sm:$0xff]   ;;  %v1276_v57 = vld [vmem:[%s1668_s0 + $0xcc] ss:$16 sps:$4 sm:$0xff]   ;;  %v1278_v58 = vld [vmem:[%s1668_s0 + $0xc0] ss:$16 sps:$4 sm:$0xff]  }
  0x16   :  { %1134 = vmatprep.subr.bf16.mxu1 %v1227_v21  ;;  %v1279_v59 = vld [vmem:[%s1668_s0 + $0xc8] ss:$16 sps:$4 sm:$0xff]   ;;  %v1280_v60 = vld [vmem:[%s1668_s0 + $0xe4] ss:$16 sps:$4 sm:$0xff]   ;;  %v1282_v61 = vld [vmem:[%s1668_s0 + $0xec] ss:$16 sps:$4 sm:$0xff]  }
  0x17   :  { %v1284_v62 = vld [vmem:[%s1668_s0 + $0xe0] ss:$16 sps:$4 sm:$0xff]   ;;  %v1285_v63 = vld [vmem:[%s1668_s0 + $0xe8] ss:$16 sps:$4 sm:$0xff]   ;;  %v1286_v0 = vld [vmem:[%s1668_s0 + $0x104] ss:$16 sps:$4 sm:$0xff]  }
  0x18   :  { %1053 = vmatpush3.bf16.msra.mxu0 %v1228_v22  ;;  %v1288_v1 = vld [vmem:[%s1668_s0 + $0x10c] ss:$16 sps:$4 sm:$0xff]   ;;  %v1290_v2 = vld [vmem:[%s1668_s0 + $0x100] ss:$16 sps:$4 sm:$0xff]   ;;  %v1291_v3 = vld [vmem:[%s1668_s0 + $0x108] ss:$16 sps:$4 sm:$0xff]  }
  0x19   :  { %1135 = vmatpush3.bf16.msra.mxu1 %v1229_v23  ;;  %1054 = vmatprep.subr.bf16.mxu0 %v1230_v24  ;;  %v1292_v4 = vld [vmem:[%s1668_s0 + $0x124] ss:$16 sps:$4 sm:$0xff]   ;;  %v1294_v5 = vld [vmem:[%s1668_s0 + $0x12c] ss:$16 sps:$4 sm:$0xff]   ;;  %v1296_v6 = vld [vmem:[%s1668_s0 + $0x120] ss:$16 sps:$4 sm:$0xff]  }
  0x1a   :  { %1136 = vmatprep.subr.bf16.mxu1 %v1231_v25  ;;  %v1297_v7 = vld [vmem:[%s1668_s0 + $0x128] ss:$16 sps:$4 sm:$0xff]   ;;  %v1298_v8 = vld [vmem:[%s1668_s0 + $0x144] ss:$16 sps:$4 sm:$0xff]   ;;  %v1300_v9 = vld [vmem:[%s1668_s0 + $0x14c] ss:$16 sps:$4 sm:$0xff]  }
  0x1b   :  { %v1302_v10 = vld [vmem:[%s1668_s0 + $0x140] ss:$16 sps:$4 sm:$0xff]   ;;  %v1303_v11 = vld [vmem:[%s1668_s0 + $0x148] ss:$16 sps:$4 sm:$0xff]  }
  0x1c   :  { %1055 = vmatpush3.bf16.msra.mxu0 %v1232_v26  ;;  %v1555_v14 = vld [vmem:[%s1669_s2] ss:$0 sm:$0xff] }
  0x1d   :  { %1137 = vmatpush3.bf16.msra.mxu1 %v1233_v27  ;;  %1056 = vmatprep.subr.bf16.mxu0 %v1234_v28 }
  0x1e   :  { %1138 = vmatprep.subr.bf16.mxu1 %v1235_v29 }
  0x20   :  { %1057 = vmatpush3.bf16.msra.mxu0 %v1236_v30 }
  0x21   :  { %1139 = vmatpush3.bf16.msra.mxu1 %v1237_v31 }
  0x23   :  { %575 = vmatmul.mubr.bf16.vlgmr.msra.gmra.mrb[0].mxu0 %v1238_v32 }
  0x24   :  { %696 = vmatmul.mubr.bf16.vlgmr.msra.gmra.mrb[0].mxu1 %v1241_v34  ;;  %582 = vmatprep.mubr.bf16.mxu0 %v1244_v36 }
  0x25   :  { %703 = vmatprep.mubr.bf16.mxu1 %v1246_v37 }
  0x2b   :  { %583 = vmatmul.mubr.bf16.gmra.mrb[4].mxu0 %v1248_v38 }
  0x2c   :  { %704 = vmatmul.mubr.bf16.gmra.mrb[4].mxu1 %v1249_v39  ;;  %590 = vmatprep.mubr.bf16.mxu0 %v1250_v40 }
  0x2d   :  { %711 = vmatprep.mubr.bf16.mxu1 %v1252_v41 }
  0x33   :  { %591 = vmatmul.mubr.bf16.gmra.mrb[8].mxu0 %v1254_v42 }
  0x34   :  { %712 = vmatmul.mubr.bf16.gmra.mrb[8].mxu1 %v1255_v43  ;;  %598 = vmatprep.mubr.bf16.mxu0 %v1256_v44 }
  0x35   :  { %719 = vmatprep.mubr.bf16.mxu1 %v1258_v45 }
  0x3b   :  { %599 = vmatmul.mubr.bf16.gmra.mrb[12].mxu0 %v1260_v46 }
  0x3c   :  { %720 = vmatmul.mubr.bf16.gmra.mrb[12].mxu1 %v1261_v47  ;;  %606 = vmatprep.mubr.bf16.mxu0 %v1262_v48 }
  0x3d   :  { %727 = vmatprep.mubr.bf16.mxu1 %v1264_v49 }
  0x43   :  { %607 = vmatmul.mubr.bf16.gmra.mrb[16].mxu0 %v1266_v50 }
  0x44   :  { %728 = vmatmul.mubr.bf16.gmra.mrb[16].mxu1 %v1267_v51  ;;  %614 = vmatprep.mubr.bf16.mxu0 %v1268_v52 }
  0x45   :  { %735 = vmatprep.mubr.bf16.mxu1 %v1270_v53 }
  0x4b   :  { %615 = vmatmul.mubr.bf16.gmra.mrb[20].mxu0 %v1272_v54 }
  0x4c   :  { %736 = vmatmul.mubr.bf16.gmra.mrb[20].mxu1 %v1273_v55  ;;  %622 = vmatprep.mubr.bf16.mxu0 %v1274_v56 }
  0x4d   :  { %743 = vmatprep.mubr.bf16.mxu1 %v1276_v57 }
  0x53   :  { %623 = vmatmul.mubr.bf16.gmra.mrb[24].mxu0 %v1278_v58 }
  0x54   :  { %744 = vmatmul.mubr.bf16.gmra.mrb[24].mxu1 %v1279_v59  ;;  %630 = vmatprep.mubr.bf16.mxu0 %v1280_v60 }
  0x55   :  { %751 = vmatprep.mubr.bf16.mxu1 %v1282_v61 }
  0x5b   :  { %631 = vmatmul.mubr.bf16.gmra.mrb[28].mxu0 %v1284_v62 }
  0x5c   :  { %752 = vmatmul.mubr.bf16.gmra.mrb[28].mxu1 %v1285_v63  ;;  %638 = vmatprep.mubr.bf16.mxu0 %v1286_v0 }
  0x5d   :  { %759 = vmatprep.mubr.bf16.mxu1 %v1288_v1 }
  0x63   :  { %639 = vmatmul.mubr.bf16.gmra.mrb[32].mxu0 %v1290_v2 }
  0x64   :  { %760 = vmatmul.mubr.bf16.gmra.mrb[32].mxu1 %v1291_v3  ;;  %646 = vmatprep.mubr.bf16.mxu0 %v1292_v4 }
  0x65   :  { %767 = vmatprep.mubr.bf16.mxu1 %v1294_v5 }
  0x6b   :  { %647 = vmatmul.mubr.bf16.gmra.mrb[36].mxu0 %v1296_v6 }
  0x6c   :  { %768 = vmatmul.mubr.bf16.gmra.mrb[36].mxu1 %v1297_v7  ;;  %654 = vmatprep.mubr.bf16.mxu0 %v1298_v8 }
  0x6d   :  { %775 = vmatprep.mubr.bf16.mxu1 %v1300_v9 }
  0x73   :  { %655 = vmatmul.mubr.bf16.gmra.mrb[40].mxu0 %v1302_v10 }
  0x74   :  { %776 = vmatmul.mubr.bf16.gmra.mrb[40].mxu1 %v1303_v11 }
  0xf6   :  { %v1058_v12 = vpop.f32.mrb[0].mxu0 }
  0xf7   :  { %v1140_v13 = vpop.f32.mrb[0].mxu1  ;;  %v1059_v15 = vpop.f32.mrb[1].mxu0 }
  0xf8   :  { %v1060_v16 = vadd.f32 %v1059_v15, %v1058_v12  ;;  %v1141_v17 = vpop.f32.mrb[1].mxu1  ;;  %v1061_v18 = vpop.f32.mrb[2].mxu0 }
  0xf9   :  { %v1142_v19 = vadd.f32 %v1141_v17, %v1140_v13  ;;  %v1143_v20 = vpop.f32.mrb[2].mxu1  ;;  %v1062_v21 = vpop.f32.mrb[3].mxu0 }
  0xfa   :  { %v577_v22 = vadd.f32 %v1060_v16, %v1555_v14  ;;  %v1063_v23 = vadd.f32 %v1062_v21, %v1061_v18  ;;  %v1144_v24 = vpop.f32.mrb[3].mxu1 }
  0xfb   :  { %v1145_v25 = vadd.f32 %v1144_v24, %v1143_v20 }
  0xfc   :  { %v698_v26 = vadd.f32 %v1142_v19, %v577_v22  ;;  %v580_v27 = vadd.f32 %v1063_v23, %v1555_v14 }
  0xfe   :  { %v784_v28 = vmax.f32 %v698_v26, 0.0  ;;  %v701_v29 = vadd.f32 %v1145_v25, %v580_v27  ;;  %v1064_v30 = vpop.f32.mrb[4].mxu0 }
  0xff   :  { %v1146_v31 = vpop.f32.mrb[4].mxu1  ;;  %v1065_v32 = vpop.f32.mrb[5].mxu0 }
 0x100   :  { %v1020_v33 = vpack.c.bf16 %v784_v28, %v784_v28  ;;  %v785_v34 = vmax.f32 %v701_v29, 0.0  ;;  %v1066_v35 = vadd.f32 %v1065_v32, %v1064_v30  ;;  %v1147_v36 = vpop.f32.mrb[5].mxu1  ;;  %v1067_v37 = vpop.f32.mrb[6].mxu0 }
 0x101   :  { %v1148_v38 = vadd.f32 %v1147_v36, %v1146_v31  ;;  %v1149_v39 = vpop.f32.mrb[6].mxu1  ;;  %v1068_v40 = vpop.f32.mrb[7].mxu0 }
 0x102   :  { %895 = vst.msk [vmem:[%s1670_s3] sm:$0xf] %vm894_vm0, %v1020_v33  ;;  %v1021_v41 = vpack.c.bf16 %v785_v34, %v785_v34  ;;  %v585_v42 = vadd.f32 %v1066_v35, %v1555_v14  ;;  %v1069_v43 = vadd.f32 %v1068_v40, %v1067_v37  ;;  %v1150_v44 = vpop.f32.mrb[7].mxu1 }
 0x103   :  { %v1151_v45 = vadd.f32 %v1150_v44, %v1149_v39 }
 0x104   :  { %896 = vst.msk [vmem:[%s1670_s3 + $0x4] sm:$0xf] %vm894_vm0, %v1021_v41  ;;  %v706_v46 = vadd.f32 %v1148_v38, %v585_v42  ;;  %v588_v47 = vadd.f32 %v1069_v43, %v1555_v14 }
 0x106   :  { %v786_v48 = vmax.f32 %v706_v46, 0.0  ;;  %v709_v49 = vadd.f32 %v1151_v45, %v588_v47  ;;  %v1070_v50 = vpop.f32.mrb[8].mxu0 }
 0x107   :  { %v1152_v51 = vpop.f32.mrb[8].mxu1  ;;  %v1071_v52 = vpop.f32.mrb[9].mxu0 }
 0x108   :  { %v1022_v53 = vpack.c.bf16 %v786_v48, %v786_v48  ;;  %v787_v54 = vmax.f32 %v709_v49, 0.0  ;;  %v1072_v55 = vadd.f32 %v1071_v52, %v1070_v50  ;;  %v1153_v56 = vpop.f32.mrb[9].mxu1  ;;  %v1073_v57 = vpop.f32.mrb[10].mxu0 }
 0x109   :  { %v1154_v58 = vadd.f32 %v1153_v56, %v1152_v51  ;;  %v1155_v59 = vpop.f32.mrb[10].mxu1  ;;  %v1074_v60 = vpop.f32.mrb[11].mxu0 }
 0x10a   :  { %897 = vst.msk [vmem:[%s1670_s3 + $0x8] sm:$0xf] %vm894_vm0, %v1022_v53  ;;  %v1023_v61 = vpack.c.bf16 %v787_v54, %v787_v54  ;;  %v593_v62 = vadd.f32 %v1072_v55, %v1555_v14  ;;  %v1075_v63 = vadd.f32 %v1074_v60, %v1073_v57  ;;  %v1156_v0 = vpop.f32.mrb[11].mxu1 }
 0x10b   :  { %v1157_v1 = vadd.f32 %v1156_v0, %v1155_v59 }
 0x10c   :  { %898 = vst.msk [vmem:[%s1670_s3 + $0xc] sm:$0xf] %vm894_vm0, %v1023_v61  ;;  %v714_v2 = vadd.f32 %v1154_v58, %v593_v62  ;;  %v596_v3 = vadd.f32 %v1075_v63, %v1555_v14 }
 0x10e   :  { %v788_v4 = vmax.f32 %v714_v2, 0.0  ;;  %v717_v5 = vadd.f32 %v1157_v1, %v596_v3  ;;  %v1076_v6 = vpop.f32.mrb[12].mxu0 }
 0x10f   :  { %v1158_v7 = vpop.f32.mrb[12].mxu1  ;;  %v1077_v8 = vpop.f32.mrb[13].mxu0 }
 0x110   :  { %v1024_v9 = vpack.c.bf16 %v788_v4, %v788_v4  ;;  %v789_v10 = vmax.f32 %v717_v5, 0.0  ;;  %v1078_v11 = vadd.f32 %v1077_v8, %v1076_v6  ;;  %v1159_v12 = vpop.f32.mrb[13].mxu1  ;;  %v1079_v13 = vpop.f32.mrb[14].mxu0 }
 0x111   :  { %v1160_v15 = vadd.f32 %v1159_v12, %v1158_v7  ;;  %v1161_v16 = vpop.f32.mrb[14].mxu1  ;;  %v1080_v17 = vpop.f32.mrb[15].mxu0 }
 0x112   :  { %899 = vst.msk [vmem:[%s1670_s3 + $0x10] sm:$0xf] %vm894_vm0, %v1024_v9  ;;  %v1025_v18 = vpack.c.bf16 %v789_v10, %v789_v10  ;;  %v601_v19 = vadd.f32 %v1078_v11, %v1555_v14  ;;  %v1081_v20 = vadd.f32 %v1080_v17, %v1079_v13  ;;  %v1162_v21 = vpop.f32.mrb[15].mxu1 }
 0x113   :  { %v1163_v22 = vadd.f32 %v1162_v21, %v1161_v16 }
 0x114   :  { %900 = vst.msk [vmem:[%s1670_s3 + $0x14] sm:$0xf] %vm894_vm0, %v1025_v18  ;;  %v722_v23 = vadd.f32 %v1160_v15, %v601_v19  ;;  %v604_v24 = vadd.f32 %v1081_v20, %v1555_v14 }
 0x116   :  { %v790_v25 = vmax.f32 %v722_v23, 0.0  ;;  %v725_v26 = vadd.f32 %v1163_v22, %v604_v24  ;;  %v1082_v27 = vpop.f32.mrb[16].mxu0 }
 0x117   :  { %v1164_v28 = vpop.f32.mrb[16].mxu1  ;;  %v1083_v29 = vpop.f32.mrb[17].mxu0 }
 0x118   :  { %v1026_v30 = vpack.c.bf16 %v790_v25, %v790_v25  ;;  %v791_v31 = vmax.f32 %v725_v26, 0.0  ;;  %v1084_v32 = vadd.f32 %v1083_v29, %v1082_v27  ;;  %v1165_v33 = vpop.f32.mrb[17].mxu1  ;;  %v1085_v34 = vpop.f32.mrb[18].mxu0 }
 0x119   :  { %v1166_v35 = vadd.f32 %v1165_v33, %v1164_v28  ;;  %v1167_v36 = vpop.f32.mrb[18].mxu1  ;;  %v1086_v37 = vpop.f32.mrb[19].mxu0 }
 0x11a   :  { %901 = vst.msk [vmem:[%s1670_s3 + $0x18] sm:$0xf] %vm894_vm0, %v1026_v30  ;;  %v1027_v38 = vpack.c.bf16 %v791_v31, %v791_v31  ;;  %v609_v39 = vadd.f32 %v1084_v32, %v1555_v14  ;;  %v1087_v40 = vadd.f32 %v1086_v37, %v1085_v34  ;;  %v1168_v41 = vpop.f32.mrb[19].mxu1 }
 0x11b   :  { %v1169_v42 = vadd.f32 %v1168_v41, %v1167_v36 }
 0x11c   :  { %902 = vst.msk [vmem:[%s1670_s3 + $0x1c] sm:$0xf] %vm894_vm0, %v1027_v38  ;;  %v730_v43 = vadd.f32 %v1166_v35, %v609_v39  ;;  %v612_v44 = vadd.f32 %v1087_v40, %v1555_v14 }
 0x11e   :  { %v792_v45 = vmax.f32 %v730_v43, 0.0  ;;  %v733_v46 = vadd.f32 %v1169_v42, %v612_v44  ;;  %v1088_v47 = vpop.f32.mrb[20].mxu0 }
 0x11f   :  { %v1170_v48 = vpop.f32.mrb[20].mxu1  ;;  %v1089_v49 = vpop.f32.mrb[21].mxu0 }
 0x120   :  { %v1028_v50 = vpack.c.bf16 %v792_v45, %v792_v45  ;;  %v793_v51 = vmax.f32 %v733_v46, 0.0  ;;  %v1090_v52 = vadd.f32 %v1089_v49, %v1088_v47  ;;  %v1171_v53 = vpop.f32.mrb[21].mxu1  ;;  %v1091_v54 = vpop.f32.mrb[22].mxu0 }
 0x121   :  { %v1172_v55 = vadd.f32 %v1171_v53, %v1170_v48  ;;  %v1173_v56 = vpop.f32.mrb[22].mxu1  ;;  %v1092_v57 = vpop.f32.mrb[23].mxu0 }
 0x122   :  { %903 = vst.msk [vmem:[%s1670_s3 + $0x20] sm:$0xf] %vm894_vm0, %v1028_v50  ;;  %v1029_v58 = vpack.c.bf16 %v793_v51, %v793_v51  ;;  %v617_v59 = vadd.f32 %v1090_v52, %v1555_v14  ;;  %v1093_v60 = vadd.f32 %v1092_v57, %v1091_v54  ;;  %v1174_v61 = vpop.f32.mrb[23].mxu1 }
 0x123   :  { %v1175_v62 = vadd.f32 %v1174_v61, %v1173_v56 }
 0x124   :  { %904 = vst.msk [vmem:[%s1670_s3 + $0x24] sm:$0xf] %vm894_vm0, %v1029_v58  ;;  %v738_v63 = vadd.f32 %v1172_v55, %v617_v59  ;;  %v620_v0 = vadd.f32 %v1093_v60, %v1555_v14 }
 0x126   :  { %v794_v1 = vmax.f32 %v738_v63, 0.0  ;;  %v741_v2 = vadd.f32 %v1175_v62, %v620_v0  ;;  %v1094_v3 = vpop.f32.mrb[24].mxu0 }
 0x127   :  { %v1176_v4 = vpop.f32.mrb[24].mxu1  ;;  %v1095_v5 = vpop.f32.mrb[25].mxu0 }
 0x128   :  { %v1030_v6 = vpack.c.bf16 %v794_v1, %v794_v1  ;;  %v795_v7 = vmax.f32 %v741_v2, 0.0  ;;  %v1096_v8 = vadd.f32 %v1095_v5, %v1094_v3  ;;  %v1177_v9 = vpop.f32.mrb[25].mxu1  ;;  %v1097_v10 = vpop.f32.mrb[26].mxu0 }
 0x129   :  { %v1178_v11 = vadd.f32 %v1177_v9, %v1176_v4  ;;  %v1179_v12 = vpop.f32.mrb[26].mxu1  ;;  %v1098_v13 = vpop.f32.mrb[27].mxu0 }
 0x12a   :  { %905 = vst.msk [vmem:[%s1670_s3 + $0x28] sm:$0xf] %vm894_vm0, %v1030_v6  ;;  %v1031_v15 = vpack.c.bf16 %v795_v7, %v795_v7  ;;  %v625_v16 = vadd.f32 %v1096_v8, %v1555_v14  ;;  %v1099_v17 = vadd.f32 %v1098_v13, %v1097_v10  ;;  %v1180_v18 = vpop.f32.mrb[27].mxu1 }
 0x12b   :  { %v1181_v19 = vadd.f32 %v1180_v18, %v1179_v12 }
 0x12c   :  { %906 = vst.msk [vmem:[%s1670_s3 + $0x2c] sm:$0xf] %vm894_vm0, %v1031_v15  ;;  %v746_v20 = vadd.f32 %v1178_v11, %v625_v16  ;;  %v628_v21 = vadd.f32 %v1099_v17, %v1555_v14 }
 0x12e   :  { %v796_v22 = vmax.f32 %v746_v20, 0.0  ;;  %v749_v23 = vadd.f32 %v1181_v19, %v628_v21  ;;  %v1100_v24 = vpop.f32.mrb[28].mxu0 }
 0x12f   :  { %v1182_v25 = vpop.f32.mrb[28].mxu1  ;;  %v1101_v26 = vpop.f32.mrb[29].mxu0 }
 0x130   :  { %v1032_v27 = vpack.c.bf16 %v796_v22, %v796_v22  ;;  %v797_v28 = vmax.f32 %v749_v23, 0.0  ;;  %v1102_v29 = vadd.f32 %v1101_v26, %v1100_v24  ;;  %v1183_v30 = vpop.f32.mrb[29].mxu1  ;;  %v1103_v31 = vpop.f32.mrb[30].mxu0 }
 0x131   :  { %v1184_v32 = vadd.f32 %v1183_v30, %v1182_v25  ;;  %v1185_v33 = vpop.f32.mrb[30].mxu1  ;;  %v1104_v34 = vpop.f32.mrb[31].mxu0 }
 0x132   :  { %907 = vst.msk [vmem:[%s1670_s3 + $0x30] sm:$0xf] %vm894_vm0, %v1032_v27  ;;  %v1033_v35 = vpack.c.bf16 %v797_v28, %v797_v28  ;;  %v633_v36 = vadd.f32 %v1102_v29, %v1555_v14  ;;  %v1105_v37 = vadd.f32 %v1104_v34, %v1103_v31  ;;  %v1186_v38 = vpop.f32.mrb[31].mxu1 }
 0x133   :  { %v1187_v39 = vadd.f32 %v1186_v38, %v1185_v33 }
 0x134   :  { %908 = vst.msk [vmem:[%s1670_s3 + $0x34] sm:$0xf] %vm894_vm0, %v1033_v35  ;;  %v754_v40 = vadd.f32 %v1184_v32, %v633_v36  ;;  %v636_v41 = vadd.f32 %v1105_v37, %v1555_v14 }
 0x136   :  { %v798_v42 = vmax.f32 %v754_v40, 0.0  ;;  %v757_v43 = vadd.f32 %v1187_v39, %v636_v41  ;;  %v1106_v44 = vpop.f32.mrb[32].mxu0 }
 0x137   :  { %v1188_v45 = vpop.f32.mrb[32].mxu1  ;;  %v1107_v46 = vpop.f32.mrb[33].mxu0 }
 0x138   :  { %v1034_v47 = vpack.c.bf16 %v798_v42, %v798_v42  ;;  %v799_v48 = vmax.f32 %v757_v43, 0.0  ;;  %v1108_v49 = vadd.f32 %v1107_v46, %v1106_v44  ;;  %v1189_v50 = vpop.f32.mrb[33].mxu1  ;;  %v1109_v51 = vpop.f32.mrb[34].mxu0 }
 0x139   :  { %v1190_v52 = vadd.f32 %v1189_v50, %v1188_v45  ;;  %v1191_v53 = vpop.f32.mrb[34].mxu1  ;;  %v1110_v54 = vpop.f32.mrb[35].mxu0 }
 0x13a   :  { %909 = vst.msk [vmem:[%s1670_s3 + $0x38] sm:$0xf] %vm894_vm0, %v1034_v47  ;;  %v1035_v55 = vpack.c.bf16 %v799_v48, %v799_v48  ;;  %v641_v56 = vadd.f32 %v1108_v49, %v1555_v14  ;;  %v1111_v57 = vadd.f32 %v1110_v54, %v1109_v51  ;;  %v1192_v58 = vpop.f32.mrb[35].mxu1 }
 0x13b   :  { %v1193_v59 = vadd.f32 %v1192_v58, %v1191_v53 }
 0x13c   :  { %910 = vst.msk [vmem:[%s1670_s3 + $0x3c] sm:$0xf] %vm894_vm0, %v1035_v55  ;;  %v762_v60 = vadd.f32 %v1190_v52, %v641_v56  ;;  %v644_v61 = vadd.f32 %v1111_v57, %v1555_v14 }
 0x13e   :  { %v800_v62 = vmax.f32 %v762_v60, 0.0  ;;  %v765_v63 = vadd.f32 %v1193_v59, %v644_v61  ;;  %v1112_v0 = vpop.f32.mrb[36].mxu0 }
 0x13f   :  { %v1194_v1 = vpop.f32.mrb[36].mxu1  ;;  %v1113_v2 = vpop.f32.mrb[37].mxu0 }
 0x140   :  { %v1036_v3 = vpack.c.bf16 %v800_v62, %v800_v62  ;;  %v801_v4 = vmax.f32 %v765_v63, 0.0  ;;  %v1114_v5 = vadd.f32 %v1113_v2, %v1112_v0  ;;  %v1195_v6 = vpop.f32.mrb[37].mxu1  ;;  %v1115_v7 = vpop.f32.mrb[38].mxu0 }
 0x141   :  { %v1196_v8 = vadd.f32 %v1195_v6, %v1194_v1  ;;  %v1197_v9 = vpop.f32.mrb[38].mxu1  ;;  %v1116_v10 = vpop.f32.mrb[39].mxu0 }
 0x142   :  { %911 = vst.msk [vmem:[%s1670_s3 + $0x40] sm:$0xf] %vm894_vm0, %v1036_v3  ;;  %v1037_v11 = vpack.c.bf16 %v801_v4, %v801_v4  ;;  %v649_v12 = vadd.f32 %v1114_v5, %v1555_v14  ;;  %v1117_v13 = vadd.f32 %v1116_v10, %v1115_v7  ;;  %v1198_v15 = vpop.f32.mrb[39].mxu1 }
 0x143   :  { %v1199_v16 = vadd.f32 %v1198_v15, %v1197_v9 }
 0x144   :  { %912 = vst.msk [vmem:[%s1670_s3 + $0x44] sm:$0xf] %vm894_vm0, %v1037_v11  ;;  %v770_v17 = vadd.f32 %v1196_v8, %v649_v12  ;;  %v652_v18 = vadd.f32 %v1117_v13, %v1555_v14 }
 0x146   :  { %v802_v19 = vmax.f32 %v770_v17, 0.0  ;;  %v773_v20 = vadd.f32 %v1199_v16, %v652_v18  ;;  %v1118_v21 = vpop.f32.mrb[40].mxu0 }
 0x147   :  { %v1200_v22 = vpop.f32.mrb[40].mxu1  ;;  %v1119_v23 = vpop.f32.mrb[41].mxu0 }
 0x148   :  { %v1038_v24 = vpack.c.bf16 %v802_v19, %v802_v19  ;;  %v803_v25 = vmax.f32 %v773_v20, 0.0  ;;  %v1120_v26 = vadd.f32 %v1119_v23, %v1118_v21  ;;  %v1201_v27 = vpop.f32.mrb[41].mxu1  ;;  %v1121_v28 = vpop.f32.mrb[42].mxu0 }
 0x149   :  { %v1202_v29 = vadd.f32 %v1201_v27, %v1200_v22  ;;  %v1203_v30 = vpop.f32.mrb[42].mxu1  ;;  %v1122_v31 = vpop.f32.mrb[43].mxu0 }
 0x14a   :  { %913 = vst.msk [vmem:[%s1670_s3 + $0x48] sm:$0xf] %vm894_vm0, %v1038_v24  ;;  %v1039_v32 = vpack.c.bf16 %v803_v25, %v803_v25  ;;  %v657_v33 = vadd.f32 %v1120_v26, %v1555_v14  ;;  %v1123_v34 = vadd.f32 %v1122_v31, %v1121_v28  ;;  %v1204_v35 = vpop.f32.mrb[43].mxu1 }
 0x14b   :  { %v1205_v36 = vadd.f32 %v1204_v35, %v1203_v30 }
 0x14c   :  { %914 = vst.msk [vmem:[%s1670_s3 + $0x4c] sm:$0xf] %vm894_vm0, %v1039_v32  ;;  %v778_v37 = vadd.f32 %v1202_v29, %v657_v33  ;;  %v660_v38 = vadd.f32 %v1123_v34, %v1555_v14 }
 0x14e   :  { %v804_v39 = vmax.f32 %v778_v37, 0.0  ;;  %v781_v40 = vadd.f32 %v1205_v36, %v660_v38 }
 0x150   :  { %v1040_v41 = vpack.c.bf16 %v804_v39, %v804_v39  ;;  %v805_v42 = vmax.f32 %v781_v40, 0.0 }
 0x152   :  { %915 = vst.msk [vmem:[%s1670_s3 + $0x50] sm:$0xf] %vm894_vm0, %v1040_v41  ;;  %v1041_v43 = vpack.c.bf16 %v805_v42, %v805_v42 }
 0x154   :  { %916 = vst.msk [vmem:[%s1670_s3 + $0x54] sm:$0xf] %vm894_vm0, %v1041_v43 }

// kernel: birdnet_forward.6
= control target key start
LH: loop header
LB: loop body
LE: loop exit
PB: predicated region body
PF: predicated region fallthrough
CT: control target
= control target key end

     0   :  { %v1271_v34 = vmov 0.0   ;;  %vm1272_vm0 = vmmov 0   ;;  %vm527_vm1 = vcmask 523264   ;;  %vm886_vm2 = vcmask 519168   ;;  %s1633_s1 = inlined_call_operand.vmem [shape: bf16[576,64], index: 1, kind: input, shape index: {}]   ;;  %s1634_s0 = inlined_call_operand.vmem [shape: bf16[108,576], index: 0, kind: input, shape index: {}]   ;;  %s1635_s2 = inlined_call_operand.vmem [shape: f32[1,64], index: 2, kind: input, shape index: {}]   ;;  %s1636_s3 = inlined_call_operand.vmem [shape: bf16[108,64], index: 3, kind: output, shape index: {}]  }
   0x1   :  { %v1186_v0 = vld [vmem:[%s1633_s1 + $0x40] sm:$0xff]   ;;  %v1190_v4 = vld [vmem:[%s1633_s1 + $0x48] sm:$0xff]   ;;  %v1194_v8 = vld [vmem:[%s1633_s1 + $0x50] sm:$0xff]   ;;  %vm900_vm3 = vcmask 517120  }
   0x2   :  { %v1187_v1 = vld [vmem:[%s1633_s1 + $0xc0] sm:$0xff]   ;;  %1013 = vmatprep.subr.bf16.mxu0 %v1186_v0  ;;  %v1191_v5 = vld [vmem:[%s1633_s1 + $0xc8] sm:$0xff]   ;;  %v1195_v9 = vld [vmem:[%s1633_s1 + $0xd0] sm:$0xff]  }
   0x3   :  { %v1188_v2 = vld [vmem:[%s1633_s1] sm:$0xff]   ;;  %1071 = vmatprep.subr.bf16.mxu1 %v1187_v1  ;;  %v1192_v6 = vld [vmem:[%s1633_s1 + $0x8] sm:$0xff]   ;;  %v1196_v10 = vld [vmem:[%s1633_s1 + $0x10] sm:$0xff]  }
   0x4   :  { %v1189_v3 = vld [vmem:[%s1633_s1 + $0x80] sm:$0xff]   ;;  %1014 = vmatpush3.bf16.msra.mxu0 %v1188_v2  ;;  %v1193_v7 = vld [vmem:[%s1633_s1 + $0x88] sm:$0xff]   ;;  %v1197_v11 = vld [vmem:[%s1633_s1 + $0x90] sm:$0xff]  }
   0x5   :  { %1072 = vmatpush3.bf16.msra.mxu1 %v1189_v3  ;;  %1015 = vmatprep.subr.bf16.mxu0 %v1190_v4  ;;  %v1198_v12 = vld [vmem:[%s1633_s1 + $0x58] sm:$0xff]   ;;  %v1202_v16 = vld [vmem:[%s1633_s1 + $0x60] sm:$0xff]   ;;  %v1206_v20 = vld [vmem:[%s1633_s1 + $0x68] sm:$0xff]  }
   0x6   :  { %1073 = vmatprep.subr.bf16.mxu1 %v1191_v5  ;;  %v1199_v13 = vld [vmem:[%s1633_s1 + $0xd8] sm:$0xff]   ;;  %v1203_v17 = vld [vmem:[%s1633_s1 + $0xe0] sm:$0xff]   ;;  %v1207_v21 = vld [vmem:[%s1633_s1 + $0xe8] sm:$0xff]  }
   0x7   :  { %v1200_v14 = vld [vmem:[%s1633_s1 + $0x18] sm:$0xff]   ;;  %v1204_v18 = vld [vmem:[%s1633_s1 + $0x20] sm:$0xff]   ;;  %v1208_v22 = vld [vmem:[%s1633_s1 + $0x28] sm:$0xff]  }
   0x8   :  { %1016 = vmatpush3.bf16.msra.mxu0 %v1192_v6  ;;  %v1201_v15 = vld [vmem:[%s1633_s1 + $0x98] sm:$0xff]   ;;  %v1205_v19 = vld [vmem:[%s1633_s1 + $0xa0] sm:$0xff]   ;;  %v1209_v23 = vld [vmem:[%s1633_s1 + $0xa8] sm:$0xff]  }
   0x9   :  { %1074 = vmatpush3.bf16.msra.mxu1 %v1193_v7  ;;  %1017 = vmatprep.subr.bf16.mxu0 %v1194_v8  ;;  %v1210_v24 = vld [vmem:[%s1633_s1 + $0x70] sm:$0xff]   ;;  %v1214_v28 = vld [vmem:[%s1633_s1 + $0x78] sm:$0xff]   ;;  %v1223_v36 = vld [vmem:[%s1634_s0 + $0xc] ss:$20 sps:$4 sm:$0xff]  }
   0xa   :  { %1075 = vmatprep.subr.bf16.mxu1 %v1195_v9  ;;  %v1211_v25 = vld [vmem:[%s1633_s1 + $0xf0] sm:$0xff]   ;;  %v1215_v29 = vld [vmem:[%s1633_s1 + $0xf8] sm:$0xff]   ;;  %v1224_v37 = vld [vmem:[%s1633_s1 + $0x100] sm:$0xff]   ;;  %670 = vmatprep.mubr.bf16.mxu1 %v1223_v36 }
   0xb   :  { %v1212_v26 = vld [vmem:[%s1633_s1 + $0x30] sm:$0xff]   ;;  %v1216_v30 = vld [vmem:[%s1633_s1 + $0x38] sm:$0xff]   ;;  %v1225_v38 = vld [vmem:[%s1634_s0 + $0x2c] ss:$20 sps:$4 sm:$0xff]  }
   0xc   :  { %1018 = vmatpush3.bf16.msra.mxu0 %v1196_v10  ;;  %v1213_v27 = vld [vmem:[%s1633_s1 + $0xb0] sm:$0xff]   ;;  %v1217_v31 = vld [vmem:[%s1633_s1 + $0xb8] sm:$0xff]   ;;  %v1235_v43 = vld [vmem:[%s1633_s1 + $0x108] sm:$0xff]  }
   0xd   :  { %1076 = vmatpush3.bf16.msra.mxu1 %v1197_v11  ;;  %1019 = vmatprep.subr.bf16.mxu0 %v1198_v12  ;;  %v1218_v32 = vld [vmem:[%s1634_s0] ss:$20 sps:$4 sm:$0xff]   ;;  %v1220_v33 = vld [vmem:[%s1634_s0 + $0x4] ss:$20 sps:$4 sm:$0xff]   ;;  %v1221_v35 = vld [vmem:[%s1634_s0 + $0x8] ss:$20 sps:$4 sm:$0xff]  }
   0xe   :  { %1077 = vmatprep.subr.bf16.mxu1 %v1199_v13  ;;  %581 = vmatprep.mubr.bf16.mxu0 %v1220_v33  ;;  %v1227_v39 = vld [vmem:[%s1634_s0 + $0x34] ss:$20 sps:$4 sm:$0xff]   ;;  %v1230_v41 = vld [vmem:[%s1634_s0 + $0x30] ss:$20 sps:$4 sm:$0xff]   ;;  %v1237_v47 = vld [vmem:[%s1634_s0 + $0x58] ss:$20 sps:$4 sm:$0xff]  }
   0xf   :  { %v1229_v40 = vld [vmem:[%s1634_s0 + $0x28] ss:$20 sps:$4 sm:$0xff]   ;;  %v1244_v45 = vld [vmem:[%s1633_s1 + $0x110] sm:$0xff]   ;;  %v1240_v49 = vld [vmem:[%s1634_s0 + $0x84] ss:$20 sps:$4 sm:$0xff]  }
  0x10   :  { %1020 = vmatpush3.bf16.msra.mxu0 %v1200_v14  ;;  %v1231_v42 = vld [vmem:[%s1634_s0 + $0x54] ss:$20 sps:$4 sm:$0xff]   ;;  %v1233_v44 = vld [vmem:[%s1634_s0 + $0x5c] ss:$20 sps:$4 sm:$0xff]   ;;  %v1242_v51 = vld [vmem:[%s1634_s0 + $0x78] ss:$20 sps:$4 sm:$0xff]  }
  0x11   :  { %1078 = vmatpush3.bf16.msra.mxu1 %v1201_v15  ;;  %1021 = vmatprep.subr.bf16.mxu0 %v1202_v16  ;;  %v1236_v46 = vld [vmem:[%s1634_s0 + $0x50] ss:$20 sps:$4 sm:$0xff]   ;;  %v1257_v50 = vld [vmem:[%s1633_s1 + $0x118] sm:$0xff]   ;;  %v1243_v52 = vld [vmem:[%s1634_s0 + $0x80] ss:$20 sps:$4 sm:$0xff]  }
  0x12   :  { %1079 = vmatprep.subr.bf16.mxu1 %v1203_v17  ;;  %v1238_v48 = vld [vmem:[%s1634_s0 + $0x7c] ss:$20 sps:$4 sm:$0xff]   ;;  %v1245_v53 = vld [vmem:[%s1634_s0 + $0xa4] ss:$20 sps:$4 sm:$0xff]   ;;  %v1247_v54 = vld [vmem:[%s1634_s0 + $0xac] ss:$20 sps:$4 sm:$0xff]  }
  0x13   :  { %v1249_v55 = vld [vmem:[%s1634_s0 + $0xa0] ss:$20 sps:$4 sm:$0xff]   ;;  %v1250_v56 = vld [vmem:[%s1634_s0 + $0xa8] ss:$20 sps:$4 sm:$0xff]   ;;  %v1256_v60 = vld [vmem:[%s1634_s0 + $0xd0] ss:$20 sps:$4 sm:$0xff]  }
  0x14   :  { %1022 = vmatpush3.bf16.msra.mxu0 %v1204_v18  ;;  %v1251_v57 = vld [vmem:[%s1634_s0 + $0xcc] ss:$20 sps:$4 sm:$0xff]   ;;  %v1253_v58 = vld [vmem:[%s1634_s0 + $0xd4] ss:$20 sps:$4 sm:$0xff]   ;;  %v1264_v1 = vld [vmem:[%s1634_s0 + $0x10] ss:$20 sps:$4 sm:$0xff]  }
  0x15   :  { %1080 = vmatpush3.bf16.msra.mxu1 %v1205_v19  ;;  %1023 = vmatprep.subr.bf16.mxu0 %v1206_v20  ;;  %v1255_v59 = vld [vmem:[%s1634_s0 + $0xc8] ss:$20 sps:$4 sm:$0xff]   ;;  %v1262_v63 = vld [vmem:[%s1634_s0 + $0xf0] ss:$20 sps:$4 sm:$0x3f]  }
  0x16   :  { %1081 = vmatprep.subr.bf16.mxu1 %v1207_v21  ;;  %v1258_v61 = vld [vmem:[%s1634_s0 + $0xf4] ss:$20 sps:$4 sm:$0x3f]   ;;  %v1260_v62 = vld [vmem:[%s1634_s0 + $0xfc] ss:$20 sps:$4 sm:$0x3f]  }
  0x17   :  { %v1263_v0 = vld [vmem:[%s1634_s0 + $0xf8] ss:$20 sps:$4 sm:$0x3f]   ;;  %v1265_v2 = vld [vmem:[%s1634_s0 + $0xb0] ss:$20 sps:$4 sm:$0xff]  }
  0x18   :  { %1024 = vmatpush3.bf16.msra.mxu0 %v1208_v22  ;;  %v1266_v3 = vld [vmem:[%s1634_s0 + $0x38] ss:$20 sps:$4 sm:$0xff]   ;;  %v1268_v5 = vld [vmem:[%s1634_s0 + $0x60] ss:$20 sps:$4 sm:$0xff]   ;;  %v1270_v7 = vld [vmem:[%s1634_s0 + $0x88] ss:$20 sps:$4 sm:$0xff]  }
  0x19   :  { %1082 = vmatpush3.bf16.msra.mxu1 %v1209_v23  ;;  %1025 = vmatprep.subr.bf16.mxu0 %v1210_v24  ;;  %v1267_v4 = vld [vmem:[%s1634_s0 + $0xd8] ss:$20 sps:$4 sm:$0xff]   ;;  %v1269_v6 = vld [vmem:[%s1634_s0 + $0x100] ss:$20 sps:$4 sm:$0x3f]  }
  0x1a   :  { %1083 = vmatprep.subr.bf16.mxu1 %v1211_v25  ;;  %v1538_v9 = vld [vmem:[%s1635_s2] ss:$0 sm:$0xff] }
  0x1c   :  { %1026 = vmatpush3.bf16.msra.mxu0 %v1212_v26 }
  0x1d   :  { %1084 = vmatpush3.bf16.msra.mxu1 %v1213_v27  ;;  %1027 = vmatprep.subr.bf16.mxu0 %v1214_v28 }
  0x1e   :  { %1085 = vmatprep.subr.bf16.mxu1 %v1215_v29 }
  0x20   :  { %1028 = vmatpush3.bf16.msra.mxu0 %v1216_v30 }
  0x21   :  { %1086 = vmatpush3.bf16.msra.mxu1 %v1217_v31  ;;  %1140 = vmatprep.subr.bf16.mxu0 %v1271_v34 }
  0x22   :  { %1176 = vmatprep.subr.bf16.mxu1 %v1271_v34 }
  0x23   :  { %582 = vmatmul.mubr.bf16.vlgmr.msra.gmra.mrb[0].mxu0 %v1218_v32 }
  0x24   :  { %671 = vmatmul.mubr.bf16.vlgmr.msra.gmra.mrb[0].mxu1 %v1221_v35  ;;  %1141 = vmatpush3.bf16.msra.mxu0 %v1224_v37 }
  0x25   :  { %589 = vmatprep.mubr.bf16.mxu0 %v1225_v38  ;;  %1180 = vmatpush3.bf16.msra.mxu1 %v1224_v37 }
  0x26   :  { %678 = vmatprep.mubr.bf16.mxu1 %v1227_v39  ;;  %1142 = vmatprep.subr.bf16.mxu0 %v1271_v34 }
  0x27   :  { %1177 = vmatprep.subr.bf16.mxu1 %v1271_v34 }
  0x28   :  { %1143 = vmatpush3.bf16.msra.mxu0 %v1235_v43 }
  0x29   :  { %1181 = vmatpush3.bf16.msra.mxu1 %v1235_v43  ;;  %1144 = vmatprep.subr.bf16.mxu0 %v1271_v34 }
  0x2a   :  { %1178 = vmatprep.subr.bf16.mxu1 %v1271_v34 }
  0x2b   :  { %590 = vmatmul.mubr.bf16.gmra.mrb[4].mxu0 %v1229_v40 }
  0x2c   :  { %679 = vmatmul.mubr.bf16.gmra.mrb[4].mxu1 %v1230_v41  ;;  %597 = vmatprep.mubr.bf16.mxu0 %v1231_v42 }
  0x2d   :  { %686 = vmatprep.mubr.bf16.mxu1 %v1233_v44  ;;  %1145 = vmatpush3.bf16.msra.mxu0 %v1244_v45 }
  0x2e   :  { %1182 = vmatpush3.bf16.msra.mxu1 %v1244_v45  ;;  %1146 = vmatprep.subr.bf16.mxu0 %v1271_v34 }
  0x2f   :  { %1179 = vmatprep.subr.bf16.mxu1 %v1271_v34 }
  0x31   :  { %1147 = vmatpush3.bf16.msra.mxu0 %v1257_v50 }
  0x32   :  { %1183 = vmatpush3.bf16.msra.mxu1 %v1257_v50 }
  0x33   :  { %598 = vmatmul.mubr.bf16.gmra.mrb[8].mxu0 %v1236_v46 }
  0x34   :  { %687 = vmatmul.mubr.bf16.gmra.mrb[8].mxu1 %v1237_v47  ;;  %605 = vmatprep.mubr.bf16.mxu0 %v1238_v48 }
  0x35   :  { %694 = vmatprep.mubr.bf16.mxu1 %v1240_v49 }
  0x3b   :  { %606 = vmatmul.mubr.bf16.gmra.mrb[12].mxu0 %v1242_v51 }
  0x3c   :  { %695 = vmatmul.mubr.bf16.gmra.mrb[12].mxu1 %v1243_v52  ;;  %613 = vmatprep.mubr.bf16.mxu0 %v1245_v53 }
  0x3d   :  { %702 = vmatprep.mubr.bf16.mxu1 %v1247_v54 }
  0x43   :  { %614 = vmatmul.mubr.bf16.gmra.mrb[16].mxu0 %v1249_v55 }
  0x44   :  { %703 = vmatmul.mubr.bf16.gmra.mrb[16].mxu1 %v1250_v56  ;;  %621 = vmatprep.mubr.bf16.mxu0 %v1251_v57 }
  0x45   :  { %710 = vmatprep.mubr.bf16.mxu1 %v1253_v58 }
  0x4b   :  { %622 = vmatmul.mubr.bf16.gmra.mrb[20].mxu0 %v1255_v59 }
  0x4c   :  { %711 = vmatmul.mubr.bf16.gmra.mrb[20].mxu1 %v1256_v60  ;;  %629 = vmatprep.mubr.bf16.mxu0 %v1258_v61 }
  0x4d   :  { %718 = vmatprep.mubr.bf16.mxu1 %v1260_v62 }
  0x53   :  { %630 = vmatmul.mubr.bf16.gmra.mrb[24].mxu0 %v1262_v63 }
  0x54   :  { %719 = vmatmul.mubr.bf16.gmra.mrb[24].mxu1 %v1263_v0  ;;  %1148 = vmatprep.mubr.msk.bf16.mxu0 %vm1272_vm0, %v1271_v34 }
  0x55   :  { %1164 = vmatprep.mubr.msk.bf16.mxu1 %vm1272_vm0, %v1271_v34 }
  0x5b   :  { %1149 = vmatmul.mubr.msk.bf16.vlgmr.msra.gmra.mrb[28].mxu0 %vm527_vm1, %v1264_v1 }
  0x5c   :  { %1165 = vmatmul.mubr.msk.bf16.vlgmr.msra.gmra.mrb[28].mxu1 %vm527_vm1, %v1265_v2  ;;  %1152 = vmatprep.mubr.msk.bf16.mxu0 %vm1272_vm0, %v1271_v34 }
  0x5d   :  { %1168 = vmatprep.mubr.msk.bf16.mxu1 %vm1272_vm0, %v1271_v34 }
  0x63   :  { %1153 = vmatmul.mubr.msk.bf16.gmra.mrb[32].mxu0 %vm527_vm1, %v1266_v3 }
  0x64   :  { %1169 = vmatmul.mubr.msk.bf16.gmra.mrb[32].mxu1 %vm527_vm1, %v1267_v4  ;;  %1156 = vmatprep.mubr.msk.bf16.mxu0 %vm1272_vm0, %v1271_v34 }
  0x65   :  { %1172 = vmatprep.mubr.msk.bf16.mxu1 %vm1272_vm0, %v1271_v34 }
  0x6b   :  { %1157 = vmatmul.mubr.msk.bf16.gmra.mrb[36].mxu0 %vm527_vm1, %v1268_v5 }
  0x6c   :  { %1173 = vmatmul.mubr.msk.bf16.gmra.mrb[36].mxu1 %vm527_vm1, %v1269_v6  ;;  %1160 = vmatprep.mubr.msk.bf16.mxu0 %vm1272_vm0, %v1271_v34 }
  0x73   :  { %1161 = vmatmul.mubr.msk.bf16.gmra.mrb[40].mxu0 %vm527_vm1, %v1270_v7 }
  0xf6   :  { %v1029_v8 = vpop.f32.mrb[0].mxu0 }
  0xf7   :  { %v1030_v10 = vpop.f32.mrb[1].mxu0  ;;  %v1087_v11 = vpop.f32.mrb[0].mxu1 }
  0xf8   :  { %v1031_v12 = vadd.f32 %v1030_v10, %v1029_v8  ;;  %v1032_v13 = vpop.f32.mrb[2].mxu0  ;;  %v1088_v14 = vpop.f32.mrb[1].mxu1 }
  0xf9   :  { %v1033_v15 = vpop.f32.mrb[3].mxu0  ;;  %v1089_v16 = vadd.f32 %v1088_v14, %v1087_v11  ;;  %v1090_v17 = vpop.f32.mrb[2].mxu1 }
  0xfa   :  { %v584_v18 = vadd.f32 %v1031_v12, %v1538_v9  ;;  %v1034_v19 = vadd.f32 %v1033_v15, %v1032_v13  ;;  %v1091_v20 = vpop.f32.mrb[3].mxu1 }
  0xfb   :  { %v1092_v21 = vadd.f32 %v1091_v20, %v1090_v17 }
  0xfc   :  { %v587_v22 = vadd.f32 %v1034_v19, %v1538_v9  ;;  %v1542_v23 = vadd.f32 %v1089_v16, %v584_v18 }
  0xfe   :  { %v1035_v24 = vpop.f32.mrb[4].mxu0  ;;  %v1544_v25 = vadd.f32 %v1092_v21, %v587_v22 }
  0xff   :  { %v1036_v26 = vpop.f32.mrb[5].mxu0  ;;  %v1093_v27 = vpop.f32.mrb[4].mxu1 }
 0x100   :  { %v1037_v28 = vadd.f32 %v1036_v26, %v1035_v24  ;;  %v1038_v29 = vpop.f32.mrb[6].mxu0  ;;  %v1094_v30 = vpop.f32.mrb[5].mxu1 }
 0x101   :  { %v1039_v31 = vpop.f32.mrb[7].mxu0  ;;  %v1095_v32 = vadd.f32 %v1094_v30, %v1093_v27  ;;  %v1096_v33 = vpop.f32.mrb[6].mxu1 }
 0x102   :  { %v592_v34 = vadd.f32 %v1037_v28, %v1538_v9  ;;  %v1040_v35 = vadd.f32 %v1039_v31, %v1038_v29  ;;  %v1097_v36 = vpop.f32.mrb[7].mxu1 }
 0x103   :  { %v1098_v37 = vadd.f32 %v1097_v36, %v1096_v33 }
 0x104   :  { %v595_v38 = vadd.f32 %v1040_v35, %v1538_v9  ;;  %v1548_v39 = vadd.f32 %v1095_v32, %v592_v34 }
 0x106   :  { %v1041_v40 = vpop.f32.mrb[8].mxu0  ;;  %v1550_v41 = vadd.f32 %v1098_v37, %v595_v38 }
 0x107   :  { %v1042_v42 = vpop.f32.mrb[9].mxu0  ;;  %v1099_v43 = vpop.f32.mrb[8].mxu1 }
 0x108   :  { %v1043_v44 = vadd.f32 %v1042_v42, %v1041_v40  ;;  %v1044_v45 = vpop.f32.mrb[10].mxu0  ;;  %v1100_v46 = vpop.f32.mrb[9].mxu1 }
 0x109   :  { %v1045_v47 = vpop.f32.mrb[11].mxu0  ;;  %v1101_v48 = vadd.f32 %v1100_v46, %v1099_v43  ;;  %v1102_v49 = vpop.f32.mrb[10].mxu1 }
 0x10a   :  { %v600_v50 = vadd.f32 %v1043_v44, %v1538_v9  ;;  %v1046_v51 = vadd.f32 %v1045_v47, %v1044_v45  ;;  %v1103_v52 = vpop.f32.mrb[11].mxu1 }
 0x10b   :  { %v1104_v53 = vadd.f32 %v1103_v52, %v1102_v49 }
 0x10c   :  { %v603_v54 = vadd.f32 %v1046_v51, %v1538_v9  ;;  %v1554_v55 = vadd.f32 %v1101_v48, %v600_v50 }
 0x10e   :  { %v1047_v56 = vpop.f32.mrb[12].mxu0  ;;  %v1556_v57 = vadd.f32 %v1104_v53, %v603_v54 }
 0x10f   :  { %v1048_v58 = vpop.f32.mrb[13].mxu0  ;;  %v1105_v59 = vpop.f32.mrb[12].mxu1 }
 0x110   :  { %v1049_v60 = vadd.f32 %v1048_v58, %v1047_v56  ;;  %v1050_v61 = vpop.f32.mrb[14].mxu0  ;;  %v1106_v62 = vpop.f32.mrb[13].mxu1 }
 0x111   :  { %v1051_v63 = vpop.f32.mrb[15].mxu0  ;;  %v1107_v0 = vadd.f32 %v1106_v62, %v1105_v59  ;;  %v1108_v1 = vpop.f32.mrb[14].mxu1 }
 0x112   :  { %v608_v2 = vadd.f32 %v1049_v60, %v1538_v9  ;;  %v1052_v3 = vadd.f32 %v1051_v63, %v1050_v61  ;;  %v1109_v4 = vpop.f32.mrb[15].mxu1 }
 0x113   :  { %v1110_v5 = vadd.f32 %v1109_v4, %v1108_v1 }
 0x114   :  { %v611_v6 = vadd.f32 %v1052_v3, %v1538_v9  ;;  %v1560_v7 = vadd.f32 %v1107_v0, %v608_v2 }
 0x116   :  { %v1053_v8 = vpop.f32.mrb[16].mxu0  ;;  %v1562_v10 = vadd.f32 %v1110_v5, %v611_v6 }
 0x117   :  { %v1054_v11 = vpop.f32.mrb[17].mxu0  ;;  %v1111_v12 = vpop.f32.mrb[16].mxu1 }
 0x118   :  { %v1055_v13 = vadd.f32 %v1054_v11, %v1053_v8  ;;  %v1056_v14 = vpop.f32.mrb[18].mxu0  ;;  %v1112_v15 = vpop.f32.mrb[17].mxu1 }
 0x119   :  { %v1057_v16 = vpop.f32.mrb[19].mxu0  ;;  %v1113_v17 = vadd.f32 %v1112_v15, %v1111_v12  ;;  %v1114_v18 = vpop.f32.mrb[18].mxu1 }
 0x11a   :  { %v616_v19 = vadd.f32 %v1055_v13, %v1538_v9  ;;  %v1058_v20 = vadd.f32 %v1057_v16, %v1056_v14  ;;  %v1115_v21 = vpop.f32.mrb[19].mxu1 }
 0x11b   :  { %v1116_v22 = vadd.f32 %v1115_v21, %v1114_v18 }
 0x11c   :  { %v619_v24 = vadd.f32 %v1058_v20, %v1538_v9  ;;  %v705_v26 = vadd.f32 %v1113_v17, %v616_v19 }
 0x11e   :  { %v1059_v27 = vpop.f32.mrb[20].mxu0  ;;  %v708_v28 = vadd.f32 %v1116_v22, %v619_v24 }
 0x11f   :  { %v1060_v29 = vpop.f32.mrb[21].mxu0  ;;  %v1117_v30 = vpop.f32.mrb[20].mxu1 }
 0x120   :  { %v1061_v31 = vadd.f32 %v1060_v29, %v1059_v27  ;;  %v1062_v32 = vpop.f32.mrb[22].mxu0  ;;  %v1118_v33 = vpop.f32.mrb[21].mxu1 }
 0x121   :  { %v1063_v34 = vpop.f32.mrb[23].mxu0  ;;  %v1119_v35 = vadd.f32 %v1118_v33, %v1117_v30  ;;  %v1120_v36 = vpop.f32.mrb[22].mxu1 }
 0x122   :  { %v624_v37 = vadd.f32 %v1061_v31, %v1538_v9  ;;  %v1064_v38 = vadd.f32 %v1063_v34, %v1062_v32  ;;  %v1121_v40 = vpop.f32.mrb[23].mxu1 }
 0x123   :  { %v1122_v42 = vadd.f32 %v1121_v40, %v1120_v36 }
 0x124   :  { %v627_v43 = vadd.f32 %v1064_v38, %v1538_v9  ;;  %v713_v44 = vadd.f32 %v1119_v35, %v624_v37 }
 0x126   :  { %v1065_v45 = vpop.f32.mrb[24].mxu0  ;;  %v716_v46 = vadd.f32 %v1122_v42, %v627_v43 }
 0x127   :  { %v1066_v47 = vpop.f32.mrb[25].mxu0  ;;  %v1123_v48 = vpop.f32.mrb[24].mxu1 }
 0x128   :  { %v1067_v49 = vadd.f32 %v1066_v47, %v1065_v45  ;;  %v1068_v50 = vpop.f32.mrb[26].mxu0  ;;  %v1124_v51 = vpop.f32.mrb[25].mxu1 }
 0x129   :  { %v1069_v52 = vpop.f32.mrb[27].mxu0  ;;  %v1125_v53 = vadd.f32 %v1124_v51, %v1123_v48  ;;  %v1126_v54 = vpop.f32.mrb[26].mxu1 }
 0x12a   :  { %v632_v56 = vadd.f32 %v1067_v49, %v1538_v9  ;;  %v1070_v58 = vadd.f32 %v1069_v52, %v1068_v50  ;;  %v1127_v59 = vpop.f32.mrb[27].mxu1 }
 0x12b   :  { %v1128_v60 = vadd.f32 %v1127_v59, %v1126_v54 }
 0x12c   :  { %v635_v61 = vadd.f32 %v1070_v58, %v1538_v9  ;;  %v721_v62 = vadd.f32 %v1125_v53, %v632_v56 }
 0x12e   :  { %v761_v63 = vpop.f32.mrb[28].mxu0  ;;  %v724_v0 = vadd.f32 %v1128_v60, %v635_v61 }
 0x12f   :  { %v762_v1 = vadd.f32 %v761_v63, %v1542_v23  ;;  %v793_v2 = vpop.f32.mrb[28].mxu1  ;;  %v1150_v3 = vpop.f32.mrb[29].mxu0 }
 0x130   :  { %v794_v4 = vadd.f32 %v793_v2, %v705_v26  ;;  %v1166_v5 = vpop.f32.mrb[29].mxu1  ;;  %v764_v6 = vpop.f32.mrb[30].mxu0 }
 0x131   :  { %v816_v8 = vmax.f32 %v762_v1, 0.0  ;;  %v765_v11 = vadd.f32 %v764_v6, %v1544_v25  ;;  %v796_v12 = vpop.f32.mrb[30].mxu1  ;;  %v1151_v13 = vpop.f32.mrb[31].mxu0 }
 0x132   :  { %v824_v14 = vmax.f32 %v794_v4, 0.0  ;;  %v797_v15 = vadd.f32 %v796_v12, %v708_v28  ;;  %v1167_v16 = vpop.f32.mrb[31].mxu1 }
 0x133   :  { %v999_v9 = vpack.c.bf16 %v816_v8, %v816_v8  ;;  %v817_v17 = vmax.f32 %v765_v11, 0.0 }
 0x134   :  { %v1007_v18 = vpack.c.bf16 %v824_v14, %v824_v14  ;;  %v825_v19 = vmax.f32 %v797_v15, 0.0 }
 0x135   :  { %887 = vst.msk [vmem:[%s1636_s3] sm:$0xf] %vm886_vm2, %v999_v9  ;;  %v1000_v23 = vpack.c.bf16 %v817_v17, %v817_v17 }
 0x136   :  { %895 = vst.msk [vmem:[%s1636_s3 + $0x20] sm:$0xf] %vm886_vm2, %v1007_v18  ;;  %v1008_v25 = vpack.c.bf16 %v825_v19, %v825_v19  ;;  %v769_v20 = vpop.f32.mrb[32].mxu0 }
 0x137   :  { %888 = vst.msk [vmem:[%s1636_s3 + $0x4] sm:$0xf] %vm886_vm2, %v1000_v23  ;;  %v770_v21 = vadd.f32 %v769_v20, %v1548_v39  ;;  %v801_v22 = vpop.f32.mrb[32].mxu1  ;;  %v1154_v24 = vpop.f32.mrb[33].mxu0 }
 0x138   :  { %896 = vst.msk [vmem:[%s1636_s3 + $0x24] sm:$0xf] %vm886_vm2, %v1008_v25  ;;  %v802_v26 = vadd.f32 %v801_v22, %v713_v44  ;;  %v1170_v27 = vpop.f32.mrb[33].mxu1  ;;  %v772_v28 = vpop.f32.mrb[34].mxu0 }
 0x139   :  { %v818_v29 = vmax.f32 %v770_v21, 0.0  ;;  %v773_v30 = vadd.f32 %v772_v28, %v1550_v41  ;;  %v804_v31 = vpop.f32.mrb[34].mxu1  ;;  %v1155_v32 = vpop.f32.mrb[35].mxu0 }
 0x13a   :  { %v826_v33 = vmax.f32 %v802_v26, 0.0  ;;  %v805_v34 = vadd.f32 %v804_v31, %v716_v46  ;;  %v1171_v35 = vpop.f32.mrb[35].mxu1 }
 0x13b   :  { %v1001_v36 = vpack.c.bf16 %v818_v29, %v818_v29  ;;  %v819_v39 = vmax.f32 %v773_v30, 0.0 }
 0x13c   :  { %v1009_v37 = vpack.c.bf16 %v826_v33, %v826_v33  ;;  %v827_v38 = vmax.f32 %v805_v34, 0.0 }
 0x13d   :  { %889 = vst.msk [vmem:[%s1636_s3 + $0x8] sm:$0xf] %vm886_vm2, %v1001_v36  ;;  %v1002_v40 = vpack.c.bf16 %v819_v39, %v819_v39 }
 0x13e   :  { %897 = vst.msk [vmem:[%s1636_s3 + $0x28] sm:$0xf] %vm886_vm2, %v1009_v37  ;;  %v1010_v41 = vpack.c.bf16 %v827_v38, %v827_v38  ;;  %v777_v42 = vpop.f32.mrb[36].mxu0 }
 0x13f   :  { %890 = vst.msk [vmem:[%s1636_s3 + $0xc] sm:$0xf] %vm886_vm2, %v1002_v40  ;;  %v778_v43 = vadd.f32 %v777_v42, %v1554_v55  ;;  %v809_v44 = vpop.f32.mrb[36].mxu1  ;;  %v1158_v45 = vpop.f32.mrb[37].mxu0 }
 0x140   :  { %898 = vst.msk [vmem:[%s1636_s3 + $0x2c] sm:$0xf] %vm886_vm2, %v1010_v41  ;;  %v810_v46 = vadd.f32 %v809_v44, %v721_v62  ;;  %v1174_v47 = vpop.f32.mrb[37].mxu1  ;;  %v780_v48 = vpop.f32.mrb[38].mxu0 }
 0x141   :  { %v820_v49 = vmax.f32 %v778_v43, 0.0  ;;  %v781_v50 = vadd.f32 %v780_v48, %v1556_v57  ;;  %v812_v51 = vpop.f32.mrb[38].mxu1  ;;  %v1159_v52 = vpop.f32.mrb[39].mxu0 }
 0x142   :  { %v828_v53 = vmax.f32 %v810_v46, 0.0  ;;  %v813_v54 = vadd.f32 %v812_v51, %v724_v0  ;;  %v1175_v56 = vpop.f32.mrb[39].mxu1 }
 0x143   :  { %v1003_v58 = vpack.c.bf16 %v820_v49, %v820_v49  ;;  %v821_v55 = vmax.f32 %v781_v50, 0.0 }
 0x144   :  { %v1011_v59 = vpack.c.bf16 %v828_v53, %v828_v53  ;;  %v829_v60 = vmax.f32 %v813_v54, 0.0 }
 0x145   :  { %891 = vst.msk [vmem:[%s1636_s3 + $0x10] sm:$0xf] %vm886_vm2, %v1003_v58  ;;  %v1004_v61 = vpack.c.bf16 %v821_v55, %v821_v55 }
 0x146   :  { %899 = vst.msk [vmem:[%s1636_s3 + $0x30] sm:$0xf] %vm886_vm2, %v1011_v59  ;;  %v1012_v57 = vpack.c.bf16 %v829_v60, %v829_v60  ;;  %v785_v62 = vpop.f32.mrb[40].mxu0 }
 0x147   :  { %892 = vst.msk [vmem:[%s1636_s3 + $0x14] sm:$0xf] %vm886_vm2, %v1004_v61  ;;  %v786_v63 = vadd.f32 %v785_v62, %v1560_v7  ;;  %v1162_v0 = vpop.f32.mrb[41].mxu0 }
 0x148   :  { %901 = vst.msk [vmem:[%s1636_s3 + $0x34] sm:$0x3] %vm900_vm3, %v1012_v57  ;;  %v788_v1 = vpop.f32.mrb[42].mxu0 }
 0x149   :  { %v822_v2 = vmax.f32 %v786_v63, 0.0  ;;  %v789_v3 = vadd.f32 %v788_v1, %v1562_v10  ;;  %v1163_v4 = vpop.f32.mrb[43].mxu0 }
 0x14b   :  { %v1005_v5 = vpack.c.bf16 %v822_v2, %v822_v2  ;;  %v823_v6 = vmax.f32 %v789_v3, 0.0 }
 0x14d   :  { %893 = vst.msk [vmem:[%s1636_s3 + $0x18] sm:$0xf] %vm886_vm2, %v1005_v5  ;;  %v1006_v8 = vpack.c.bf16 %v823_v6, %v823_v6 }
 0x14f   :  { %894 = vst.msk [vmem:[%s1636_s3 + $0x1c] sm:$0xf] %vm886_vm2, %v1006_v8 }

// kernel: birdnet_forward.7
= control target key start
LH: loop header
LB: loop body
LE: loop exit
PB: predicated region body
PF: predicated region fallthrough
CT: control target
= control target key end

     0   :  { %v892_v36 = vlaneseq  ;;  %v9358_v37 = vmov 1966171168   ;;  %s12252_s0 = inlined_call_operand.vmem [shape: bf16[2,3456], index: 0, kind: input, shape index: {}]   ;;  %s12253_s1 = inlined_call_operand.vmem [shape: bf16[3456,512], index: 1, kind: input, shape index: {}]   ;;  %s12254_s2 = inlined_call_operand.vmem [shape: f32[1,512], index: 2, kind: input, shape index: {}]   ;;  %s12255_s3 = inlined_call_operand.vmem [shape: bf16[512,6], index: 3, kind: input, shape index: {}]   ;;  %s12256_s4 = inlined_call_operand.vmem [shape: f32[1,6], index: 4, kind: input, shape index: {}]   ;;  %s12257_s5 = inlined_call_operand.hbm [shape: f32[2,6], index: 5, kind: output, shape index: {}]  }
   0x1   :  { %v8001_v0 = vld [vmem:[%s12253_s1 + $0x4] ss:$16 sps:$4 sm:$0xff]   ;;  %v8003_v1 = vld [vmem:[%s12253_s1 + $0xc] ss:$16 sps:$4 sm:$0xff]   ;;  %v8005_v2 = vld [vmem:[%s12253_s1] ss:$16 sps:$4 sm:$0xff]   ;;  %v918_v38 = vunpack.c.l.s4 %v9358_v37 }
   0x2   :  { %5433 = vmatprep.subr.bf16.mxu0 %v8001_v0  ;;  %v8006_v3 = vld [vmem:[%s12253_s1 + $0x8] ss:$16 sps:$4 sm:$0xff]   ;;  %6007 = vmatprep.subr.bf16.mxu1 %v8003_v1  ;;  %v8007_v4 = vld [vmem:[%s12253_s1 + $0x24] ss:$16 sps:$4 sm:$0xff]   ;;  %v8009_v5 = vld [vmem:[%s12253_s1 + $0x2c] ss:$16 sps:$4 sm:$0xff]  }
   0x3   :  { %5434 = vmatpush1.bf16.msra.mxu0 %v8005_v2  ;;  %6008 = vmatpush1.bf16.msra.mxu1 %v8006_v3  ;;  %v8011_v6 = vld [vmem:[%s12253_s1 + $0x20] ss:$16 sps:$4 sm:$0xff]   ;;  %v8012_v7 = vld [vmem:[%s12253_s1 + $0x28] ss:$16 sps:$4 sm:$0xff]   ;;  %v8013_v8 = vld [vmem:[%s12253_s1 + $0x44] ss:$16 sps:$4 sm:$0xff]   ;;  %v919_v43 = vunpack.c.0.s8 %v918_v38 }
   0x4   :  { %5435 = vmatprep.subr.bf16.mxu0 %v8007_v4  ;;  %6009 = vmatprep.subr.bf16.mxu1 %v8009_v5  ;;  %v8015_v9 = vld [vmem:[%s12253_s1 + $0x4c] ss:$16 sps:$4 sm:$0xff]   ;;  %v8017_v10 = vld [vmem:[%s12253_s1 + $0x40] ss:$16 sps:$4 sm:$0xff]   ;;  %v8018_v11 = vld [vmem:[%s12253_s1 + $0x48] ss:$16 sps:$4 sm:$0xff]  }
   0x5   :  { %v8019_v12 = vld [vmem:[%s12253_s1 + $0x64] ss:$16 sps:$4 sm:$0xff]   ;;  %v8021_v13 = vld [vmem:[%s12253_s1 + $0x6c] ss:$16 sps:$4 sm:$0xff]   ;;  %v8023_v14 = vld [vmem:[%s12253_s1 + $0x60] ss:$16 sps:$4 sm:$0xff]  }
   0x6   :  { %v8024_v15 = vld [vmem:[%s12253_s1 + $0x68] ss:$16 sps:$4 sm:$0xff]   ;;  %v8025_v16 = vld [vmem:[%s12253_s1 + $0x84] ss:$16 sps:$4 sm:$0xff]   ;;  %v8027_v17 = vld [vmem:[%s12253_s1 + $0x8c] ss:$16 sps:$4 sm:$0xff]  }
   0x7   :  { %5436 = vmatpush1.bf16.msra.mxu0 %v8011_v6  ;;  %6010 = vmatpush1.bf16.msra.mxu1 %v8012_v7  ;;  %v8029_v18 = vld [vmem:[%s12253_s1 + $0x80] ss:$16 sps:$4 sm:$0xff]   ;;  %v8030_v19 = vld [vmem:[%s12253_s1 + $0x88] ss:$16 sps:$4 sm:$0xff]   ;;  %v8031_v20 = vld [vmem:[%s12253_s1 + $0xa4] ss:$16 sps:$4 sm:$0xff]  }
   0x8   :  { %5437 = vmatprep.subr.bf16.mxu0 %v8013_v8  ;;  %6011 = vmatprep.subr.bf16.mxu1 %v8015_v9  ;;  %v8033_v21 = vld [vmem:[%s12253_s1 + $0xac] ss:$16 sps:$4 sm:$0xff]   ;;  %v8035_v22 = vld [vmem:[%s12253_s1 + $0xa0] ss:$16 sps:$4 sm:$0xff]   ;;  %v8036_v23 = vld [vmem:[%s12253_s1 + $0xa8] ss:$16 sps:$4 sm:$0xff]  }
   0x9   :  { %v8037_v24 = vld [vmem:[%s12253_s1 + $0xc4] ss:$16 sps:$4 sm:$0xff]   ;;  %v8039_v25 = vld [vmem:[%s12253_s1 + $0xcc] ss:$16 sps:$4 sm:$0xff]   ;;  %v8041_v26 = vld [vmem:[%s12253_s1 + $0xc0] ss:$16 sps:$4 sm:$0xff]  }
   0xa   :  { %v8042_v27 = vld [vmem:[%s12253_s1 + $0xc8] ss:$16 sps:$4 sm:$0xff]   ;;  %v8043_v28 = vld [vmem:[%s12253_s1 + $0xe4] ss:$16 sps:$4 sm:$0xff]   ;;  %v8045_v29 = vld [vmem:[%s12253_s1 + $0xec] ss:$16 sps:$4 sm:$0xff]  }
   0xb   :  { %5438 = vmatpush1.bf16.msra.mxu0 %v8017_v10  ;;  %6012 = vmatpush1.bf16.msra.mxu1 %v8018_v11  ;;  %v8047_v30 = vld [vmem:[%s12253_s1 + $0xe0] ss:$16 sps:$4 sm:$0xff]   ;;  %v8048_v31 = vld [vmem:[%s12253_s1 + $0xe8] ss:$16 sps:$4 sm:$0xff]   ;;  %v8049_v32 = vld [vmem:[%s12253_s1 + $0x104] ss:$16 sps:$4 sm:$0xff]  }
   0xc   :  { %5439 = vmatprep.subr.bf16.mxu0 %v8019_v12  ;;  %6013 = vmatprep.subr.bf16.mxu1 %v8021_v13  ;;  %v8051_v33 = vld [vmem:[%s12253_s1 + $0x10c] ss:$16 sps:$4 sm:$0xff]   ;;  %v8053_v34 = vld [vmem:[%s12253_s1 + $0x100] ss:$16 sps:$4 sm:$0xff]   ;;  %v8054_v35 = vld [vmem:[%s12253_s1 + $0x108] ss:$16 sps:$4 sm:$0xff]  }
   0xd   :  { %v8055_v39 = vld [vmem:[%s12253_s1 + $0x124] ss:$16 sps:$4 sm:$0xff]   ;;  %v8057_v40 = vld [vmem:[%s12253_s1 + $0x12c] ss:$16 sps:$4 sm:$0xff]   ;;  %v8059_v41 = vld [vmem:[%s12253_s1 + $0x120] ss:$16 sps:$4 sm:$0xff]  }
   0xe   :  { %v9508_v42 = vshrl.u32 %v892_v36, 7  ;;  %v8060_v44 = vld [vmem:[%s12253_s1 + $0x128] ss:$16 sps:$4 sm:$0xff]   ;;  %v8061_v45 = vld [vmem:[%s12253_s1 + $0x144] ss:$16 sps:$4 sm:$0xff]  }
   0xf   :  { %5440 = vmatpush1.bf16.msra.mxu0 %v8023_v14  ;;  %6014 = vmatpush1.bf16.msra.mxu1 %v8024_v15  ;;  %v8063_v46 = vld [vmem:[%s12253_s1 + $0x14c] ss:$16 sps:$4 sm:$0xff]   ;;  %v8065_v47 = vld [vmem:[%s12253_s1 + $0x140] ss:$16 sps:$4 sm:$0xff]   ;;  %v8066_v48 = vld [vmem:[%s12253_s1 + $0x148] ss:$16 sps:$4 sm:$0xff]  }
  0x10   :  { %5441 = vmatprep.subr.bf16.mxu0 %v8025_v16  ;;  %6015 = vmatprep.subr.bf16.mxu1 %v8027_v17  ;;  %v9526_v49 = vsub.s32 %v919_v43, %v9508_v42  ;;  %v8067_v50 = vld [vmem:[%s12253_s1 + $0x164] ss:$16 sps:$4 sm:$0xff]   ;;  %v8069_v51 = vld [vmem:[%s12253_s1 + $0x16c] ss:$16 sps:$4 sm:$0xff]   ;;  %v8071_v53 = vld [vmem:[%s12253_s1 + $0x160] ss:$16 sps:$4 sm:$0xff]  }
  0x11   :  { %v9537_v52 = vld [vmem:[%s12252_s0] sm:$0xff]  ;;  %v8072_v55 = vld [vmem:[%s12253_s1 + $0x168] ss:$16 sps:$4 sm:$0xff]   ;;  %v8075_v57 = vld [vmem:[%s12253_s1 + $0x18c] ss:$16 sps:$4 sm:$0xff]  }
  0x12   :  { %v923_v54 = vrot.slane %v9537_v52, %v9526_v49  ;;  %v8073_v56 = vld [vmem:[%s12253_s1 + $0x184] ss:$16 sps:$4 sm:$0xff]   ;;  %v8077_v59 = vld [vmem:[%s12253_s1 + $0x180] ss:$16 sps:$4 sm:$0xff]   ;;  %v8078_v61 = vld [vmem:[%s12253_s1 + $0x188] ss:$16 sps:$4 sm:$0xff]  }
  0x13   :  { %5442 = vmatpush1.bf16.msra.mxu0 %v8029_v18  ;;  %6016 = vmatpush1.bf16.msra.mxu1 %v8030_v19  ;;  %v8079_v62 = vld [vmem:[%s12253_s1 + $0x1a4] ss:$16 sps:$4 sm:$0xff]   ;;  %v8081_v63 = vld [vmem:[%s12253_s1 + $0x1ac] ss:$16 sps:$4 sm:$0xff]   ;;  %v8083_v0 = vld [vmem:[%s12253_s1 + $0x1a0] ss:$16 sps:$4 sm:$0xff]  }
  0x14   :  { %5443 = vmatprep.subr.bf16.mxu0 %v8031_v20  ;;  %6017 = vmatprep.subr.bf16.mxu1 %v8033_v21  ;;  %v931_v58 = vcombine.high %v923_v54, %v923_v54  ;;  %v8084_v1 = vld [vmem:[%s12253_s1 + $0x1a8] ss:$16 sps:$4 sm:$0xff]   ;;  %v8085_v2 = vld [vmem:[%s12253_s1 + $0x1c4] ss:$16 sps:$4 sm:$0xff]   ;;  %v8087_v3 = vld [vmem:[%s12253_s1 + $0x1cc] ss:$16 sps:$4 sm:$0xff]   ;;  %v9606_v13 = vrot.slane %v923_v54, %v9526_v49 }
  0x15   :  { %v8089_v4 = vld [vmem:[%s12253_s1 + $0x1c0] ss:$16 sps:$4 sm:$0xff]   ;;  %v8090_v5 = vld [vmem:[%s12253_s1 + $0x1c8] ss:$16 sps:$4 sm:$0xff]   ;;  %v8091_v6 = vld [vmem:[%s12253_s1 + $0x1e4] ss:$16 sps:$4 sm:$0xff]  }
  0x16   :  { %v953_v60 = vrot.slane %v931_v58, %v9526_v49  ;;  %v8093_v7 = vld [vmem:[%s12253_s1 + $0x1ec] ss:$16 sps:$4 sm:$0xff]   ;;  %v8095_v8 = vld [vmem:[%s12253_s1 + $0x1e0] ss:$16 sps:$4 sm:$0xff]   ;;  %v8096_v9 = vld [vmem:[%s12253_s1 + $0x1e8] ss:$16 sps:$4 sm:$0xff]  }
  0x17   :  { %5444 = vmatpush1.bf16.msra.mxu0 %v8035_v22  ;;  %6018 = vmatpush1.bf16.msra.mxu1 %v8036_v23  ;;  %v8099_v10 = vld [vmem:[%s12253_s1 + $0x204] ss:$16 sps:$4 sm:$0xff]   ;;  %v8102_v11 = vld [vmem:[%s12253_s1 + $0x20c] ss:$16 sps:$4 sm:$0xff]   ;;  %v8097_v12 = vld [vmem:[%s12253_s1 + $0x200] ss:$16 sps:$4 sm:$0xff]  }
  0x18   :  { %5445 = vmatprep.subr.bf16.mxu0 %v8037_v24  ;;  %6019 = vmatprep.subr.bf16.mxu1 %v8039_v25  ;;  %v8100_v14 = vld [vmem:[%s12253_s1 + $0x208] ss:$16 sps:$4 sm:$0xff]   ;;  %v8105_v15 = vld [vmem:[%s12253_s1 + $0x224] ss:$16 sps:$4 sm:$0xff]   ;;  %v8108_v16 = vld [vmem:[%s12253_s1 + $0x22c] ss:$16 sps:$4 sm:$0xff]   ;;  %v963_v17 = vcombine.high %v953_v60, %v953_v60 }
  0x19   :  { %5465 = vmatprep.mubr.bf16.mxu0 %v953_v60  ;;  %6039 = vmatprep.mubr.bf16.mxu1 %v953_v60  ;;  %v8103_v18 = vld [vmem:[%s12253_s1 + $0x220] ss:$16 sps:$4 sm:$0xff]   ;;  %v8106_v19 = vld [vmem:[%s12253_s1 + $0x228] ss:$16 sps:$4 sm:$0xff]   ;;  %v8111_v20 = vld [vmem:[%s12253_s1 + $0x244] ss:$16 sps:$4 sm:$0xff]  }
  0x1a   :  { %v8114_v21 = vld [vmem:[%s12253_s1 + $0x24c] ss:$16 sps:$4 sm:$0xff]   ;;  %v8109_v22 = vld [vmem:[%s12253_s1 + $0x240] ss:$16 sps:$4 sm:$0xff]   ;;  %v8112_v23 = vld [vmem:[%s12253_s1 + $0x248] ss:$16 sps:$4 sm:$0xff]  }
  0x1b   :  { %5446 = vmatpush1.bf16.msra.mxu0 %v8041_v26  ;;  %6020 = vmatpush1.bf16.msra.mxu1 %v8042_v27  ;;  %v8117_v24 = vld [vmem:[%s12253_s1 + $0x264] ss:$16 sps:$4 sm:$0xff]   ;;  %v8120_v25 = vld [vmem:[%s12253_s1 + $0x26c] ss:$16 sps:$4 sm:$0xff]   ;;  %v8115_v26 = vld [vmem:[%s12253_s1 + $0x260] ss:$16 sps:$4 sm:$0xff]  }
  0x1c   :  { %5447 = vmatprep.subr.bf16.mxu0 %v8043_v28  ;;  %6021 = vmatprep.subr.bf16.mxu1 %v8045_v29  ;;  %v8118_v27 = vld [vmem:[%s12253_s1 + $0x268] ss:$16 sps:$4 sm:$0xff]   ;;  %v8123_v28 = vld [vmem:[%s12253_s1 + $0x284] ss:$16 sps:$4 sm:$0xff]   ;;  %v8126_v29 = vld [vmem:[%s12253_s1 + $0x28c] ss:$16 sps:$4 sm:$0xff]  }
  0x1d   :  { %v8135_v36 = vld [vmem:[%s12253_s1 + $0x2c4] ss:$16 sps:$4 sm:$0xff]   ;;  %v8138_v37 = vld [vmem:[%s12253_s1 + $0x2cc] ss:$16 sps:$4 sm:$0xff]   ;;  %v8133_v38 = vld [vmem:[%s12253_s1 + $0x2c0] ss:$16 sps:$4 sm:$0xff]  }
  0x1e   :  { %v8139_v43 = vld [vmem:[%s12253_s1 + $0x2e0] ss:$16 sps:$4 sm:$0xff]   ;;  %v8154_v54 = vld [vmem:[%s12253_s1 + $0x328] ss:$16 sps:$4 sm:$0xff]   ;;  %v8168_v60 = vld [vmem:[%s12253_s1 + $0x36c] ss:$16 sps:$4 sm:$0xff]  }
  0x1f   :  { %5448 = vmatpush1.bf16.msra.mxu0 %v8047_v30  ;;  %6022 = vmatpush1.bf16.msra.mxu1 %v8048_v31  ;;  %v8121_v30 = vld [vmem:[%s12253_s1 + $0x280] ss:$16 sps:$4 sm:$0xff]   ;;  %v8124_v31 = vld [vmem:[%s12253_s1 + $0x288] ss:$16 sps:$4 sm:$0xff]  }
  0x20   :  { %5449 = vmatprep.subr.bf16.mxu0 %v8049_v32  ;;  %6023 = vmatprep.subr.bf16.mxu1 %v8051_v33  ;;  %v8129_v32 = vld [vmem:[%s12253_s1 + $0x2a4] ss:$16 sps:$4 sm:$0xff]   ;;  %v8132_v33 = vld [vmem:[%s12253_s1 + $0x2ac] ss:$16 sps:$4 sm:$0xff]   ;;  %v8160_v58 = vld [vmem:[%s12253_s1 + $0x348] ss:$16 sps:$4 sm:$0xff]  }
  0x23   :  { %5450 = vmatpush1.bf16.msra.mxu0 %v8053_v34  ;;  %6024 = vmatpush1.bf16.msra.mxu1 %v8054_v35  ;;  %v8127_v34 = vld [vmem:[%s12253_s1 + $0x2a0] ss:$16 sps:$4 sm:$0xff]   ;;  %v8130_v35 = vld [vmem:[%s12253_s1 + $0x2a8] ss:$16 sps:$4 sm:$0xff]  }
  0x24   :  { %5451 = vmatprep.subr.bf16.mxu0 %v8055_v39  ;;  %6025 = vmatprep.subr.bf16.mxu1 %v8057_v40  ;;  %v8136_v39 = vld [vmem:[%s12253_s1 + $0x2c8] ss:$16 sps:$4 sm:$0xff]   ;;  %v8141_v40 = vld [vmem:[%s12253_s1 + $0x2e4] ss:$16 sps:$4 sm:$0xff]  }
  0x27   :  { %5452 = vmatpush1.bf16.msra.mxu0 %v8059_v41  ;;  %6026 = vmatpush1.bf16.msra.mxu1 %v8060_v44  ;;  %v8144_v41 = vld [vmem:[%s12253_s1 + $0x2ec] ss:$16 sps:$4 sm:$0xff]   ;;  %v8142_v44 = vld [vmem:[%s12253_s1 + $0x2e8] ss:$16 sps:$4 sm:$0xff]  }
  0x28   :  { %5453 = vmatprep.subr.bf16.mxu0 %v8061_v45  ;;  %6027 = vmatprep.subr.bf16.mxu1 %v8063_v46  ;;  %v8147_v45 = vld [vmem:[%s12253_s1 + $0x304] ss:$16 sps:$4 sm:$0xff]   ;;  %v8150_v46 = vld [vmem:[%s12253_s1 + $0x30c] ss:$16 sps:$4 sm:$0xff]  }
  0x2b   :  { %5454 = vmatpush1.bf16.msra.mxu0 %v8065_v47  ;;  %6028 = vmatpush1.bf16.msra.mxu1 %v8066_v48  ;;  %v8145_v47 = vld [vmem:[%s12253_s1 + $0x300] ss:$16 sps:$4 sm:$0xff]   ;;  %v8148_v48 = vld [vmem:[%s12253_s1 + $0x308] ss:$16 sps:$4 sm:$0xff]  }
  0x2c   :  { %5455 = vmatprep.subr.bf16.mxu0 %v8067_v50  ;;  %6029 = vmatprep.subr.bf16.mxu1 %v8069_v51  ;;  %v8153_v50 = vld [vmem:[%s12253_s1 + $0x324] ss:$16 sps:$4 sm:$0xff]   ;;  %v8156_v51 = vld [vmem:[%s12253_s1 + $0x32c] ss:$16 sps:$4 sm:$0xff]  }
  0x2f   :  { %5456 = vmatpush1.bf16.msra.mxu0 %v8071_v53  ;;  %6030 = vmatpush1.bf16.msra.mxu1 %v8072_v55  ;;  %v8151_v53 = vld [vmem:[%s12253_s1 + $0x320] ss:$16 sps:$4 sm:$0xff]   ;;  %v8159_v55 = vld [vmem:[%s12253_s1 + $0x344] ss:$16 sps:$4 sm:$0xff]  }
  0x30   :  { %5457 = vmatprep.subr.bf16.mxu0 %v8073_v56  ;;  %6031 = vmatprep.subr.bf16.mxu1 %v8075_v57  ;;  %v8162_v56 = vld [vmem:[%s12253_s1 + $0x34c] ss:$16 sps:$4 sm:$0xff]   ;;  %v8157_v57 = vld [vmem:[%s12253_s1 + $0x340] ss:$16 sps:$4 sm:$0xff]  }
  0x33   :  { %5458 = vmatpush1.bf16.msra.mxu0 %v8077_v59  ;;  %6032 = vmatpush1.bf16.msra.mxu1 %v8078_v61  ;;  %v8165_v59 = vld [vmem:[%s12253_s1 + $0x364] ss:$16 sps:$4 sm:$0xff]   ;;  %v8163_v61 = vld [vmem:[%s12253_s1 + $0x360] ss:$16 sps:$4 sm:$0xff]  }
  0x34   :  { %5459 = vmatprep.subr.bf16.mxu0 %v8079_v62  ;;  %6033 = vmatprep.subr.bf16.mxu1 %v8081_v63  ;;  %v8166_v62 = vld [vmem:[%s12253_s1 + $0x368] ss:$16 sps:$4 sm:$0xff]   ;;  %v8171_v63 = vld [vmem:[%s12253_s1 + $0x384] ss:$16 sps:$4 sm:$0xff]  }
  0x37   :  { %5460 = vmatpush1.bf16.msra.mxu0 %v8083_v0  ;;  %6034 = vmatpush1.bf16.msra.mxu1 %v8084_v1  ;;  %v8174_v0 = vld [vmem:[%s12253_s1 + $0x38c] ss:$16 sps:$4 sm:$0xff]   ;;  %v8169_v1 = vld [vmem:[%s12253_s1 + $0x380] ss:$16 sps:$4 sm:$0xff]  }
  0x38   :  { %5461 = vmatprep.subr.bf16.mxu0 %v8085_v2  ;;  %6035 = vmatprep.subr.bf16.mxu1 %v8087_v3  ;;  %v8172_v2 = vld [vmem:[%s12253_s1 + $0x388] ss:$16 sps:$4 sm:$0xff]   ;;  %v8177_v3 = vld [vmem:[%s12253_s1 + $0x3a4] ss:$16 sps:$4 sm:$0xff]  }
  0x3b   :  { %5462 = vmatpush1.bf16.msra.mxu0 %v8089_v4  ;;  %6036 = vmatpush1.bf16.msra.mxu1 %v8090_v5  ;;  %v8180_v4 = vld [vmem:[%s12253_s1 + $0x3ac] ss:$16 sps:$4 sm:$0xff]   ;;  %v8175_v5 = vld [vmem:[%s12253_s1 + $0x3a0] ss:$16 sps:$4 sm:$0xff]  }
  0x3c   :  { %5463 = vmatprep.subr.bf16.mxu0 %v8091_v6  ;;  %6037 = vmatprep.subr.bf16.mxu1 %v8093_v7  ;;  %v8178_v6 = vld [vmem:[%s12253_s1 + $0x3a8] ss:$16 sps:$4 sm:$0xff]   ;;  %v8183_v7 = vld [vmem:[%s12253_s1 + $0x3c4] ss:$16 sps:$4 sm:$0xff]  }
  0x3f   :  { %5464 = vmatpush1.bf16.msra.mxu0 %v8095_v8  ;;  %6038 = vmatpush1.bf16.msra.mxu1 %v8096_v9  ;;  %v8186_v8 = vld [vmem:[%s12253_s1 + $0x3cc] ss:$16 sps:$4 sm:$0xff]   ;;  %v916_v9 = vcombine.high %v9537_v52, %v9537_v52 }
  0x40   :  { %5474 = vmatprep.subr.bf16.mxu0 %v8099_v10  ;;  %6048 = vmatprep.subr.bf16.mxu1 %v8102_v11  ;;  %v8181_v10 = vld [vmem:[%s12253_s1 + $0x3c0] ss:$16 sps:$4 sm:$0xff]   ;;  %v8184_v11 = vld [vmem:[%s12253_s1 + $0x3c8] ss:$16 sps:$4 sm:$0xff]   ;;  %v8192_v52 = vld [vmem:[%s12253_s1 + $0x3ec] ss:$16 sps:$4 sm:$0xff]  }
  0x42   :  { %5466 = vmatmul.mubr.bf16.vlgmr.msra.gmra.mrb[0].mxu0 %v9606_v13  ;;  %6040 = vmatmul.mubr.bf16.vlgmr.msra.gmra.mrb[0].mxu1 %v9606_v13 }
  0x43   :  { %5475 = vmatpush1.bf16.msra.mxu0 %v8097_v12  ;;  %6049 = vmatpush1.bf16.msra.mxu1 %v8100_v14  ;;  %v8189_v12 = vld [vmem:[%s12253_s1 + $0x3e4] ss:$16 sps:$4 sm:$0xff]   ;;  %v9790_v14 = vrot.slane %v916_v9, %v9526_v49  ;;  %v8268_v9 = vld [vmem:[%s12253_s1 + $0x588] ss:$16 sps:$4 sm:$0xff]  }
  0x44   :  { %5476 = vmatprep.subr.bf16.mxu0 %v8105_v15  ;;  %6050 = vmatprep.subr.bf16.mxu1 %v8108_v16  ;;  %v8187_v15 = vld [vmem:[%s12253_s1 + $0x3e0] ss:$16 sps:$4 sm:$0xff]   ;;  %v8190_v16 = vld [vmem:[%s12253_s1 + $0x3e8] ss:$16 sps:$4 sm:$0xff]  }
  0x45   :  { %5506 = vmatprep.mubr.bf16.mxu0 %v963_v17  ;;  %6080 = vmatprep.mubr.bf16.mxu1 %v963_v17  ;;  %v8195_v17 = vld [vmem:[%s12253_s1 + $0x404] ss:$16 sps:$4 sm:$0xff]  }
  0x47   :  { %5477 = vmatpush1.bf16.msra.mxu0 %v8103_v18  ;;  %6051 = vmatpush1.bf16.msra.mxu1 %v8106_v19  ;;  %v8198_v18 = vld [vmem:[%s12253_s1 + $0x40c] ss:$16 sps:$4 sm:$0xff]   ;;  %v932_v19 = vcombine.high %v9790_v14, %v9790_v14 }
  0x48   :  { %5478 = vmatprep.subr.bf16.mxu0 %v8111_v20  ;;  %6052 = vmatprep.subr.bf16.mxu1 %v8114_v21  ;;  %v8193_v20 = vld [vmem:[%s12253_s1 + $0x400] ss:$16 sps:$4 sm:$0xff]   ;;  %v961_v21 = vcombine.high %v9606_v13, %v9606_v13 }
  0x49   :  { %v8199_v13 = vld [vmem:[%s12253_s1 + $0x420] ss:$16 sps:$4 sm:$0xff]  }
  0x4b   :  { %5479 = vmatpush1.bf16.msra.mxu0 %v8109_v22  ;;  %6053 = vmatpush1.bf16.msra.mxu1 %v8112_v23  ;;  %v8196_v22 = vld [vmem:[%s12253_s1 + $0x408] ss:$16 sps:$4 sm:$0xff]   ;;  %v8201_v23 = vld [vmem:[%s12253_s1 + $0x424] ss:$16 sps:$4 sm:$0xff]  }
  0x4c   :  { %5480 = vmatprep.subr.bf16.mxu0 %v8117_v24  ;;  %6054 = vmatprep.subr.bf16.mxu1 %v8120_v25  ;;  %v8204_v24 = vld [vmem:[%s12253_s1 + $0x42c] ss:$16 sps:$4 sm:$0xff]   ;;  %v9821_v25 = vrot.slane %v932_v19, %v9526_v49  ;;  %v8285_v19 = vld [vmem:[%s12253_s1 + $0x5e4] ss:$16 sps:$4 sm:$0xff]  }
  0x4f   :  { %5481 = vmatpush1.bf16.msra.mxu0 %v8115_v26  ;;  %6055 = vmatpush1.bf16.msra.mxu1 %v8118_v27  ;;  %v8202_v26 = vld [vmem:[%s12253_s1 + $0x428] ss:$16 sps:$4 sm:$0xff]   ;;  %v8207_v27 = vld [vmem:[%s12253_s1 + $0x444] ss:$16 sps:$4 sm:$0xff]  }
  0x50   :  { %5482 = vmatprep.subr.bf16.mxu0 %v8123_v28  ;;  %6056 = vmatprep.subr.bf16.mxu1 %v8126_v29  ;;  %v8210_v28 = vld [vmem:[%s12253_s1 + $0x44c] ss:$16 sps:$4 sm:$0xff]   ;;  %v8205_v29 = vld [vmem:[%s12253_s1 + $0x440] ss:$16 sps:$4 sm:$0xff]  }
  0x53   :  { %5483 = vmatpush1.bf16.msra.mxu0 %v8121_v30  ;;  %6057 = vmatpush1.bf16.msra.mxu1 %v8124_v31  ;;  %v8208_v30 = vld [vmem:[%s12253_s1 + $0x448] ss:$16 sps:$4 sm:$0xff]   ;;  %v8213_v31 = vld [vmem:[%s12253_s1 + $0x464] ss:$16 sps:$4 sm:$0xff]  }
  0x54   :  { %5484 = vmatprep.subr.bf16.mxu0 %v8129_v32  ;;  %6058 = vmatprep.subr.bf16.mxu1 %v8132_v33  ;;  %v8216_v32 = vld [vmem:[%s12253_s1 + $0x46c] ss:$16 sps:$4 sm:$0xff]   ;;  %v8211_v33 = vld [vmem:[%s12253_s1 + $0x460] ss:$16 sps:$4 sm:$0xff]  }
  0x57   :  { %5485 = vmatpush1.bf16.msra.mxu0 %v8127_v34  ;;  %6059 = vmatpush1.bf16.msra.mxu1 %v8130_v35  ;;  %v8214_v34 = vld [vmem:[%s12253_s1 + $0x468] ss:$16 sps:$4 sm:$0xff]   ;;  %v8219_v35 = vld [vmem:[%s12253_s1 + $0x484] ss:$16 sps:$4 sm:$0xff]  }
  0x58   :  { %5486 = vmatprep.subr.bf16.mxu0 %v8135_v36  ;;  %6060 = vmatprep.subr.bf16.mxu1 %v8138_v37  ;;  %v8222_v36 = vld [vmem:[%s12253_s1 + $0x48c] ss:$16 sps:$4 sm:$0xff]   ;;  %v8217_v37 = vld [vmem:[%s12253_s1 + $0x480] ss:$16 sps:$4 sm:$0xff]  }
  0x5b   :  { %5487 = vmatpush1.bf16.msra.mxu0 %v8133_v38  ;;  %6061 = vmatpush1.bf16.msra.mxu1 %v8136_v39  ;;  %v8220_v38 = vld [vmem:[%s12253_s1 + $0x488] ss:$16 sps:$4 sm:$0xff]   ;;  %v8225_v39 = vld [vmem:[%s12253_s1 + $0x4a4] ss:$16 sps:$4 sm:$0xff]  }
  0x5c   :  { %5488 = vmatprep.subr.bf16.mxu0 %v8141_v40  ;;  %6062 = vmatprep.subr.bf16.mxu1 %v8144_v41  ;;  %v8228_v40 = vld [vmem:[%s12253_s1 + $0x4ac] ss:$16 sps:$4 sm:$0xff]   ;;  %v8223_v41 = vld [vmem:[%s12253_s1 + $0x4a0] ss:$16 sps:$4 sm:$0xff]  }
  0x5f   :  { %5489 = vmatpush1.bf16.msra.mxu0 %v8139_v43  ;;  %6063 = vmatpush1.bf16.msra.mxu1 %v8142_v44  ;;  %v8226_v43 = vld [vmem:[%s12253_s1 + $0x4a8] ss:$16 sps:$4 sm:$0xff]   ;;  %v8231_v44 = vld [vmem:[%s12253_s1 + $0x4c4] ss:$16 sps:$4 sm:$0xff]  }
  0x60   :  { %5490 = vmatprep.subr.bf16.mxu0 %v8147_v45  ;;  %6064 = vmatprep.subr.bf16.mxu1 %v8150_v46  ;;  %v8234_v45 = vld [vmem:[%s12253_s1 + $0x4cc] ss:$16 sps:$4 sm:$0xff]   ;;  %v8229_v46 = vld [vmem:[%s12253_s1 + $0x4c0] ss:$16 sps:$4 sm:$0xff]  }
  0x63   :  { %5491 = vmatpush1.bf16.msra.mxu0 %v8145_v47  ;;  %6065 = vmatpush1.bf16.msra.mxu1 %v8148_v48  ;;  %v8232_v47 = vld [vmem:[%s12253_s1 + $0x4c8] ss:$16 sps:$4 sm:$0xff]   ;;  %v8237_v48 = vld [vmem:[%s12253_s1 + $0x4e4] ss:$16 sps:$4 sm:$0xff]  }
  0x64   :  { %5492 = vmatprep.subr.bf16.mxu0 %v8153_v50  ;;  %6066 = vmatprep.subr.bf16.mxu1 %v8156_v51  ;;  %v8240_v50 = vld [vmem:[%s12253_s1 + $0x4ec] ss:$16 sps:$4 sm:$0xff]   ;;  %v8235_v51 = vld [vmem:[%s12253_s1 + $0x4e0] ss:$16 sps:$4 sm:$0xff]  }
  0x67   :  { %5493 = vmatpush1.bf16.msra.mxu0 %v8151_v53  ;;  %6067 = vmatpush1.bf16.msra.mxu1 %v8154_v54  ;;  %v8238_v53 = vld [vmem:[%s12253_s1 + $0x4e8] ss:$16 sps:$4 sm:$0xff]   ;;  %v8243_v54 = vld [vmem:[%s12253_s1 + $0x504] ss:$16 sps:$4 sm:$0xff]  }
  0x68   :  { %5494 = vmatprep.subr.bf16.mxu0 %v8159_v55  ;;  %6068 = vmatprep.subr.bf16.mxu1 %v8162_v56  ;;  %v8246_v55 = vld [vmem:[%s12253_s1 + $0x50c] ss:$16 sps:$4 sm:$0xff]   ;;  %v8241_v56 = vld [vmem:[%s12253_s1 + $0x500] ss:$16 sps:$4 sm:$0xff]  }
  0x6b   :  { %5495 = vmatpush1.bf16.msra.mxu0 %v8157_v57  ;;  %6069 = vmatpush1.bf16.msra.mxu1 %v8160_v58  ;;  %v8244_v57 = vld [vmem:[%s12253_s1 + $0x508] ss:$16 sps:$4 sm:$0xff]   ;;  %v8249_v58 = vld [vmem:[%s12253_s1 + $0x524] ss:$16 sps:$4 sm:$0xff]  }
  0x6c   :  { %5496 = vmatprep.subr.bf16.mxu0 %v8165_v59  ;;  %6070 = vmatprep.subr.bf16.mxu1 %v8168_v60  ;;  %v8252_v59 = vld [vmem:[%s12253_s1 + $0x52c] ss:$16 sps:$4 sm:$0xff]   ;;  %v8247_v60 = vld [vmem:[%s12253_s1 + $0x520] ss:$16 sps:$4 sm:$0xff]  }
  0x6f   :  { %5497 = vmatpush1.bf16.msra.mxu0 %v8163_v61  ;;  %6071 = vmatpush1.bf16.msra.mxu1 %v8166_v62  ;;  %v8250_v61 = vld [vmem:[%s12253_s1 + $0x528] ss:$16 sps:$4 sm:$0xff]   ;;  %v8255_v62 = vld [vmem:[%s12253_s1 + $0x544] ss:$16 sps:$4 sm:$0xff]  }
  0x70   :  { %5498 = vmatprep.subr.bf16.mxu0 %v8171_v63  ;;  %6072 = vmatprep.subr.bf16.mxu1 %v8174_v0  ;;  %v8258_v63 = vld [vmem:[%s12253_s1 + $0x54c] ss:$16 sps:$4 sm:$0xff]   ;;  %v8253_v0 = vld [vmem:[%s12253_s1 + $0x540] ss:$16 sps:$4 sm:$0xff]  }
  0x73   :  { %5499 = vmatpush1.bf16.msra.mxu0 %v8169_v1  ;;  %6073 = vmatpush1.bf16.msra.mxu1 %v8172_v2  ;;  %v8256_v1 = vld [vmem:[%s12253_s1 + $0x548] ss:$16 sps:$4 sm:$0xff]   ;;  %v8261_v2 = vld [vmem:[%s12253_s1 + $0x564] ss:$16 sps:$4 sm:$0xff]  }
  0x74   :  { %5500 = vmatprep.subr.bf16.mxu0 %v8177_v3  ;;  %6074 = vmatprep.subr.bf16.mxu1 %v8180_v4  ;;  %v8264_v3 = vld [vmem:[%s12253_s1 + $0x56c] ss:$16 sps:$4 sm:$0xff]   ;;  %v8259_v4 = vld [vmem:[%s12253_s1 + $0x560] ss:$16 sps:$4 sm:$0xff]  }
  0x77   :  { %5501 = vmatpush1.bf16.msra.mxu0 %v8175_v5  ;;  %6075 = vmatpush1.bf16.msra.mxu1 %v8178_v6  ;;  %v8262_v5 = vld [vmem:[%s12253_s1 + $0x568] ss:$16 sps:$4 sm:$0xff]   ;;  %v8267_v6 = vld [vmem:[%s12253_s1 + $0x584] ss:$16 sps:$4 sm:$0xff]  }
  0x78   :  { %5502 = vmatprep.subr.bf16.mxu0 %v8183_v7  ;;  %6076 = vmatprep.subr.bf16.mxu1 %v8186_v8  ;;  %v8270_v7 = vld [vmem:[%s12253_s1 + $0x58c] ss:$16 sps:$4 sm:$0xff]   ;;  %v8265_v8 = vld [vmem:[%s12253_s1 + $0x580] ss:$16 sps:$4 sm:$0xff]  }
  0x7b   :  { %5503 = vmatpush1.bf16.msra.mxu0 %v8181_v10  ;;  %6077 = vmatpush1.bf16.msra.mxu1 %v8184_v11  ;;  %v8273_v10 = vld [vmem:[%s12253_s1 + $0x5a4] ss:$16 sps:$4 sm:$0xff]   ;;  %v8276_v11 = vld [vmem:[%s12253_s1 + $0x5ac] ss:$16 sps:$4 sm:$0xff]  }
  0x7c   :  { %5504 = vmatprep.subr.bf16.mxu0 %v8189_v12  ;;  %6078 = vmatprep.subr.bf16.mxu1 %v8192_v52  ;;  %v8271_v12 = vld [vmem:[%s12253_s1 + $0x5a0] ss:$16 sps:$4 sm:$0xff]   ;;  %v8274_v52 = vld [vmem:[%s12253_s1 + $0x5a8] ss:$16 sps:$4 sm:$0xff]  }
  0x7f   :  { %5505 = vmatpush1.bf16.msra.mxu0 %v8187_v15  ;;  %6079 = vmatpush1.bf16.msra.mxu1 %v8190_v16  ;;  %v8279_v15 = vld [vmem:[%s12253_s1 + $0x5c4] ss:$16 sps:$4 sm:$0xff]   ;;  %v8282_v16 = vld [vmem:[%s12253_s1 + $0x5cc] ss:$16 sps:$4 sm:$0xff]  }
  0x80   :  { %5515 = vmatprep.subr.bf16.mxu0 %v8195_v17  ;;  %6089 = vmatprep.subr.bf16.mxu1 %v8198_v18  ;;  %v8277_v17 = vld [vmem:[%s12253_s1 + $0x5c0] ss:$16 sps:$4 sm:$0xff]   ;;  %v8280_v18 = vld [vmem:[%s12253_s1 + $0x5c8] ss:$16 sps:$4 sm:$0xff]  }
  0x82   :  { %5507 = vmatmul.mubr.bf16.vlgmr.msra.gmra.mrb[0].mxu0 %v961_v21  ;;  %6081 = vmatmul.mubr.bf16.vlgmr.msra.gmra.mrb[0].mxu1 %v961_v21  ;;  %v8283_v21 = vld [vmem:[%s12253_s1 + $0x5e0] ss:$16 sps:$4 sm:$0xff]  }
  0x83   :  { %5516 = vmatpush1.bf16.msra.mxu0 %v8193_v20  ;;  %6090 = vmatpush1.bf16.msra.mxu1 %v8196_v22  ;;  %v8288_v20 = vld [vmem:[%s12253_s1 + $0x5ec] ss:$16 sps:$4 sm:$0xff]   ;;  %v8286_v22 = vld [vmem:[%s12253_s1 + $0x5e8] ss:$16 sps:$4 sm:$0xff]  }
  0x84   :  { %5517 = vmatprep.subr.bf16.mxu0 %v8201_v23  ;;  %6091 = vmatprep.subr.bf16.mxu1 %v8204_v24  ;;  %v8292_v23 = vld [vmem:[%s12253_s1 + $0x604] ss:$16 sps:$4 sm:$0xff]   ;;  %v8295_v24 = vld [vmem:[%s12253_s1 + $0x60c] ss:$16 sps:$4 sm:$0xff]  }
  0x85   :  { %5547 = vmatprep.mubr.bf16.mxu0 %v9821_v25  ;;  %6121 = vmatprep.mubr.bf16.mxu1 %v9821_v25 }
  0x87   :  { %5518 = vmatpush1.bf16.msra.mxu0 %v8199_v13  ;;  %6092 = vmatpush1.bf16.msra.mxu1 %v8202_v26  ;;  %v8290_v13 = vld [vmem:[%s12253_s1 + $0x600] ss:$16 sps:$4 sm:$0xff]   ;;  %v10010_v26 = vrot.slane %v9790_v14, %v9526_v49  ;;  %v964_v14 = vcombine.high %v9821_v25, %v9821_v25  ;;  %v8304_v25 = vld [vmem:[%s12253_s1 + $0x644] ss:$16 sps:$4 sm:$0xff]  }
  0x88   :  { %5519 = vmatprep.subr.bf16.mxu0 %v8207_v27  ;;  %6093 = vmatprep.subr.bf16.mxu1 %v8210_v28  ;;  %v8293_v27 = vld [vmem:[%s12253_s1 + $0x608] ss:$16 sps:$4 sm:$0xff]   ;;  %v8298_v28 = vld [vmem:[%s12253_s1 + $0x624] ss:$16 sps:$4 sm:$0xff]  }
  0x8b   :  { %5520 = vmatpush1.bf16.msra.mxu0 %v8205_v29  ;;  %6094 = vmatpush1.bf16.msra.mxu1 %v8208_v30  ;;  %v8301_v29 = vld [vmem:[%s12253_s1 + $0x62c] ss:$16 sps:$4 sm:$0xff]   ;;  %v8296_v30 = vld [vmem:[%s12253_s1 + $0x620] ss:$16 sps:$4 sm:$0xff]  }
  0x8c   :  { %5521 = vmatprep.subr.bf16.mxu0 %v8213_v31  ;;  %6095 = vmatprep.subr.bf16.mxu1 %v8216_v32  ;;  %v8299_v31 = vld [vmem:[%s12253_s1 + $0x628] ss:$16 sps:$4 sm:$0xff]   ;;  %v8307_v32 = vld [vmem:[%s12253_s1 + $0x64c] ss:$16 sps:$4 sm:$0xff]  }
  0x8f   :  { %5522 = vmatpush1.bf16.msra.mxu0 %v8211_v33  ;;  %6096 = vmatpush1.bf16.msra.mxu1 %v8214_v34  ;;  %v8302_v33 = vld [vmem:[%s12253_s1 + $0x640] ss:$16 sps:$4 sm:$0xff]   ;;  %v8305_v34 = vld [vmem:[%s12253_s1 + $0x648] ss:$16 sps:$4 sm:$0xff]  }
  0x90   :  { %5523 = vmatprep.subr.bf16.mxu0 %v8219_v35  ;;  %6097 = vmatprep.subr.bf16.mxu1 %v8222_v36  ;;  %v8310_v35 = vld [vmem:[%s12253_s1 + $0x664] ss:$16 sps:$4 sm:$0xff]   ;;  %v8313_v36 = vld [vmem:[%s12253_s1 + $0x66c] ss:$16 sps:$4 sm:$0xff]  }
  0x93   :  { %5524 = vmatpush1.bf16.msra.mxu0 %v8217_v37  ;;  %6098 = vmatpush1.bf16.msra.mxu1 %v8220_v38  ;;  %v8308_v37 = vld [vmem:[%s12253_s1 + $0x660] ss:$16 sps:$4 sm:$0xff]   ;;  %v8311_v38 = vld [vmem:[%s12253_s1 + $0x668] ss:$16 sps:$4 sm:$0xff]  }
  0x94   :  { %5525 = vmatprep.subr.bf16.mxu0 %v8225_v39  ;;  %6099 = vmatprep.subr.bf16.mxu1 %v8228_v40  ;;  %v8316_v39 = vld [vmem:[%s12253_s1 + $0x684] ss:$16 sps:$4 sm:$0xff]   ;;  %v8319_v40 = vld [vmem:[%s12253_s1 + $0x68c] ss:$16 sps:$4 sm:$0xff]  }
  0x97   :  { %5526 = vmatpush1.bf16.msra.mxu0 %v8223_v41  ;;  %6100 = vmatpush1.bf16.msra.mxu1 %v8226_v43  ;;  %v8314_v41 = vld [vmem:[%s12253_s1 + $0x680] ss:$16 sps:$4 sm:$0xff]   ;;  %v8317_v43 = vld [vmem:[%s12253_s1 + $0x688] ss:$16 sps:$4 sm:$0xff]  }
  0x98   :  { %5527 = vmatprep.subr.bf16.mxu0 %v8231_v44  ;;  %6101 = vmatprep.subr.bf16.mxu1 %v8234_v45  ;;  %v8322_v44 = vld [vmem:[%s12253_s1 + $0x6a4] ss:$16 sps:$4 sm:$0xff]   ;;  %v8325_v45 = vld [vmem:[%s12253_s1 + $0x6ac] ss:$16 sps:$4 sm:$0xff]  }
  0x9b   :  { %5528 = vmatpush1.bf16.msra.mxu0 %v8229_v46  ;;  %6102 = vmatpush1.bf16.msra.mxu1 %v8232_v47  ;;  %v8320_v46 = vld [vmem:[%s12253_s1 + $0x6a0] ss:$16 sps:$4 sm:$0xff]   ;;  %v8323_v47 = vld [vmem:[%s12253_s1 + $0x6a8] ss:$16 sps:$4 sm:$0xff]  }
  0x9c   :  { %5529 = vmatprep.subr.bf16.mxu0 %v8237_v48  ;;  %6103 = vmatprep.subr.bf16.mxu1 %v8240_v50  ;;  %v8328_v48 = vld [vmem:[%s12253_s1 + $0x6c4] ss:$16 sps:$4 sm:$0xff]   ;;  %v8331_v50 = vld [vmem:[%s12253_s1 + $0x6cc] ss:$16 sps:$4 sm:$0xff]  }
  0x9f   :  { %5530 = vmatpush1.bf16.msra.mxu0 %v8235_v51  ;;  %6104 = vmatpush1.bf16.msra.mxu1 %v8238_v53  ;;  %v8326_v51 = vld [vmem:[%s12253_s1 + $0x6c0] ss:$16 sps:$4 sm:$0xff]   ;;  %v8329_v53 = vld [vmem:[%s12253_s1 + $0x6c8] ss:$16 sps:$4 sm:$0xff]  }
  0xa0   :  { %5531 = vmatprep.subr.bf16.mxu0 %v8243_v54  ;;  %6105 = vmatprep.subr.bf16.mxu1 %v8246_v55  ;;  %v8334_v54 = vld [vmem:[%s12253_s1 + $0x6e4] ss:$16 sps:$4 sm:$0xff]   ;;  %v8337_v55 = vld [vmem:[%s12253_s1 + $0x6ec] ss:$16 sps:$4 sm:$0xff]  }
  0xa3   :  { %5532 = vmatpush1.bf16.msra.mxu0 %v8241_v56  ;;  %6106 = vmatpush1.bf16.msra.mxu1 %v8244_v57  ;;  %v8332_v56 = vld [vmem:[%s12253_s1 + $0x6e0] ss:$16 sps:$4 sm:$0xff]   ;;  %v8335_v57 = vld [vmem:[%s12253_s1 + $0x6e8] ss:$16 sps:$4 sm:$0xff]  }
  0xa4   :  { %5533 = vmatprep.subr.bf16.mxu0 %v8249_v58  ;;  %6107 = vmatprep.subr.bf16.mxu1 %v8252_v59  ;;  %v8340_v58 = vld [vmem:[%s12253_s1 + $0x704] ss:$16 sps:$4 sm:$0xff]   ;;  %v8343_v59 = vld [vmem:[%s12253_s1 + $0x70c] ss:$16 sps:$4 sm:$0xff]  }
  0xa7   :  { %5534 = vmatpush1.bf16.msra.mxu0 %v8247_v60  ;;  %6108 = vmatpush1.bf16.msra.mxu1 %v8250_v61  ;;  %v8338_v60 = vld [vmem:[%s12253_s1 + $0x700] ss:$16 sps:$4 sm:$0xff]   ;;  %v8341_v61 = vld [vmem:[%s12253_s1 + $0x708] ss:$16 sps:$4 sm:$0xff]  }
  0xa8   :  { %5535 = vmatprep.subr.bf16.mxu0 %v8255_v62  ;;  %6109 = vmatprep.subr.bf16.mxu1 %v8258_v63  ;;  %v8346_v62 = vld [vmem:[%s12253_s1 + $0x724] ss:$16 sps:$4 sm:$0xff]   ;;  %v8349_v63 = vld [vmem:[%s12253_s1 + $0x72c] ss:$16 sps:$4 sm:$0xff]  }
  0xab   :  { %5536 = vmatpush1.bf16.msra.mxu0 %v8253_v0  ;;  %6110 = vmatpush1.bf16.msra.mxu1 %v8256_v1  ;;  %v8344_v0 = vld [vmem:[%s12253_s1 + $0x720] ss:$16 sps:$4 sm:$0xff]   ;;  %v8347_v1 = vld [vmem:[%s12253_s1 + $0x728] ss:$16 sps:$4 sm:$0xff]  }
  0xac   :  { %5537 = vmatprep.subr.bf16.mxu0 %v8261_v2  ;;  %6111 = vmatprep.subr.bf16.mxu1 %v8264_v3  ;;  %v8352_v2 = vld [vmem:[%s12253_s1 + $0x744] ss:$16 sps:$4 sm:$0xff]   ;;  %v8355_v3 = vld [vmem:[%s12253_s1 + $0x74c] ss:$16 sps:$4 sm:$0xff]  }
  0xaf   :  { %5538 = vmatpush1.bf16.msra.mxu0 %v8259_v4  ;;  %6112 = vmatpush1.bf16.msra.mxu1 %v8262_v5  ;;  %v8350_v4 = vld [vmem:[%s12253_s1 + $0x740] ss:$16 sps:$4 sm:$0xff]   ;;  %v8353_v5 = vld [vmem:[%s12253_s1 + $0x748] ss:$16 sps:$4 sm:$0xff]  }
  0xb0   :  { %5539 = vmatprep.subr.bf16.mxu0 %v8267_v6  ;;  %6113 = vmatprep.subr.bf16.mxu1 %v8270_v7  ;;  %v8358_v6 = vld [vmem:[%s12253_s1 + $0x764] ss:$16 sps:$4 sm:$0xff]   ;;  %v8361_v7 = vld [vmem:[%s12253_s1 + $0x76c] ss:$16 sps:$4 sm:$0xff]  }
  0xb3   :  { %5540 = vmatpush1.bf16.msra.mxu0 %v8265_v8  ;;  %6114 = vmatpush1.bf16.msra.mxu1 %v8268_v9  ;;  %v8356_v8 = vld [vmem:[%s12253_s1 + $0x760] ss:$16 sps:$4 sm:$0xff]   ;;  %v8359_v9 = vld [vmem:[%s12253_s1 + $0x768] ss:$16 sps:$4 sm:$0xff]  }
  0xb4   :  { %5541 = vmatprep.subr.bf16.mxu0 %v8273_v10  ;;  %6115 = vmatprep.subr.bf16.mxu1 %v8276_v11  ;;  %v8364_v10 = vld [vmem:[%s12253_s1 + $0x784] ss:$16 sps:$4 sm:$0xff]   ;;  %v8367_v11 = vld [vmem:[%s12253_s1 + $0x78c] ss:$16 sps:$4 sm:$0xff]  }
  0xb7   :  { %5542 = vmatpush1.bf16.msra.mxu0 %v8271_v12  ;;  %6116 = vmatpush1.bf16.msra.mxu1 %v8274_v52  ;;  %v8362_v12 = vld [vmem:[%s12253_s1 + $0x780] ss:$16 sps:$4 sm:$0xff]   ;;  %v8365_v52 = vld [vmem:[%s12253_s1 + $0x788] ss:$16 sps:$4 sm:$0xff]  }
  0xb8   :  { %5543 = vmatprep.subr.bf16.mxu0 %v8279_v15  ;;  %6117 = vmatprep.subr.bf16.mxu1 %v8282_v16  ;;  %v8370_v15 = vld [vmem:[%s12253_s1 + $0x7a4] ss:$16 sps:$4 sm:$0xff]   ;;  %v8373_v16 = vld [vmem:[%s12253_s1 + $0x7ac] ss:$16 sps:$4 sm:$0xff]  }
  0xbb   :  { %5544 = vmatpush1.bf16.msra.mxu0 %v8277_v17  ;;  %6118 = vmatpush1.bf16.msra.mxu1 %v8280_v18  ;;  %v8368_v17 = vld [vmem:[%s12253_s1 + $0x7a0] ss:$16 sps:$4 sm:$0xff]   ;;  %v8371_v18 = vld [vmem:[%s12253_s1 + $0x7a8] ss:$16 sps:$4 sm:$0xff]  }
  0xbc   :  { %5545 = vmatprep.subr.bf16.mxu0 %v8285_v19  ;;  %6119 = vmatprep.subr.bf16.mxu1 %v8288_v20  ;;  %v8376_v19 = vld [vmem:[%s12253_s1 + $0x7c4] ss:$16 sps:$4 sm:$0xff]   ;;  %v8379_v20 = vld [vmem:[%s12253_s1 + $0x7cc] ss:$16 sps:$4 sm:$0xff]  }
  0xbf   :  { %5546 = vmatpush1.bf16.msra.mxu0 %v8283_v21  ;;  %6120 = vmatpush1.bf16.msra.mxu1 %v8286_v22  ;;  %v10184_v21 = vld.sshfl [vmem:[%s12252_s0 + $0x8] sm:$0xff pattern:$0x75316420]  ;;  %v8374_v22 = vld [vmem:[%s12253_s1 + $0x7c0] ss:$16 sps:$4 sm:$0xff]  }
  0xc0   :  { %5556 = vmatprep.subr.bf16.mxu0 %v8292_v23  ;;  %6130 = vmatprep.subr.bf16.mxu1 %v8295_v24  ;;  %v8377_v23 = vld [vmem:[%s12253_s1 + $0x7c8] ss:$16 sps:$4 sm:$0xff]   ;;  %v8382_v24 = vld [vmem:[%s12253_s1 + $0x7e4] ss:$16 sps:$4 sm:$0xff]  }
  0xc2   :  { %5548 = vmatmul.mubr.bf16.vlgmr.msra.gmra.mrb[0].mxu0 %v10010_v26  ;;  %6122 = vmatmul.mubr.bf16.vlgmr.msra.gmra.mrb[0].mxu1 %v10010_v26 }
  0xc3   :  { %5557 = vmatpush1.bf16.msra.mxu0 %v8290_v13  ;;  %6131 = vmatpush1.bf16.msra.mxu1 %v8293_v27  ;;  %v8385_v13 = vld [vmem:[%s12253_s1 + $0x7ec] ss:$16 sps:$4 sm:$0xff]   ;;  %v8380_v27 = vld [vmem:[%s12253_s1 + $0x7e0] ss:$16 sps:$4 sm:$0xff]  }
  0xc4   :  { %5558 = vmatprep.subr.bf16.mxu0 %v8298_v28  ;;  %6132 = vmatprep.subr.bf16.mxu1 %v8301_v29  ;;  %v8383_v28 = vld [vmem:[%s12253_s1 + $0x7e8] ss:$16 sps:$4 sm:$0xff]   ;;  %v8388_v29 = vld [vmem:[%s12253_s1 + $0x804] ss:$16 sps:$4 sm:$0xff]  }
  0xc5   :  { %5588 = vmatprep.mubr.bf16.mxu0 %v964_v14  ;;  %6162 = vmatprep.mubr.bf16.mxu1 %v964_v14  ;;  %v8391_v14 = vld [vmem:[%s12253_s1 + $0x80c] ss:$16 sps:$4 sm:$0xff]  }
  0xc7   :  { %5559 = vmatpush1.bf16.msra.mxu0 %v8296_v30  ;;  %6133 = vmatpush1.bf16.msra.mxu1 %v8299_v31  ;;  %v980_v30 = vcombine.high %v10184_v21, %v10184_v21  ;;  %v962_v31 = vcombine.high %v10010_v26, %v10010_v26  ;;  %v8397_v26 = vld [vmem:[%s12253_s1 + $0x82c] ss:$16 sps:$4 sm:$0xff]  }
  0xc8   :  { %5560 = vmatprep.subr.bf16.mxu0 %v8304_v25  ;;  %6134 = vmatprep.subr.bf16.mxu1 %v8307_v32  ;;  %v8386_v25 = vld [vmem:[%s12253_s1 + $0x800] ss:$16 sps:$4 sm:$0xff]   ;;  %v8389_v32 = vld [vmem:[%s12253_s1 + $0x808] ss:$16 sps:$4 sm:$0xff]  }
  0xcb   :  { %5561 = vmatpush1.bf16.msra.mxu0 %v8302_v33  ;;  %6135 = vmatpush1.bf16.msra.mxu1 %v8305_v34  ;;  %v8394_v33 = vld [vmem:[%s12253_s1 + $0x824] ss:$16 sps:$4 sm:$0xff]   ;;  %v10227_v34 = vrot.slane %v980_v30, %v9526_v49 }
  0xcc   :  { %5562 = vmatprep.subr.bf16.mxu0 %v8310_v35  ;;  %6136 = vmatprep.subr.bf16.mxu1 %v8313_v36  ;;  %v8392_v35 = vld [vmem:[%s12253_s1 + $0x820] ss:$16 sps:$4 sm:$0xff]   ;;  %v8395_v36 = vld [vmem:[%s12253_s1 + $0x828] ss:$16 sps:$4 sm:$0xff]   ;;  %v8478_v30 = vld [vmem:[%s12253_s1 + $0x9e4] ss:$16 sps:$4 sm:$0xff]  }
  0xcf   :  { %5563 = vmatpush1.bf16.msra.mxu0 %v8308_v37  ;;  %6137 = vmatpush1.bf16.msra.mxu1 %v8311_v38  ;;  %v8400_v37 = vld [vmem:[%s12253_s1 + $0x844] ss:$16 sps:$4 sm:$0xff]   ;;  %v8403_v38 = vld [vmem:[%s12253_s1 + $0x84c] ss:$16 sps:$4 sm:$0xff]  }
  0xd0   :  { %5564 = vmatprep.subr.bf16.mxu0 %v8316_v39  ;;  %6138 = vmatprep.subr.bf16.mxu1 %v8319_v40  ;;  %v8398_v39 = vld [vmem:[%s12253_s1 + $0x840] ss:$16 sps:$4 sm:$0xff]   ;;  %v8401_v40 = vld [vmem:[%s12253_s1 + $0x848] ss:$16 sps:$4 sm:$0xff]  }
  0xd3   :  { %5565 = vmatpush1.bf16.msra.mxu0 %v8314_v41  ;;  %6139 = vmatpush1.bf16.msra.mxu1 %v8317_v43  ;;  %v8406_v41 = vld [vmem:[%s12253_s1 + $0x864] ss:$16 sps:$4 sm:$0xff]   ;;  %v8409_v43 = vld [vmem:[%s12253_s1 + $0x86c] ss:$16 sps:$4 sm:$0xff]  }
  0xd4   :  { %5566 = vmatprep.subr.bf16.mxu0 %v8322_v44  ;;  %6140 = vmatprep.subr.bf16.mxu1 %v8325_v45  ;;  %v8404_v44 = vld [vmem:[%s12253_s1 + $0x860] ss:$16 sps:$4 sm:$0xff]   ;;  %v8407_v45 = vld [vmem:[%s12253_s1 + $0x868] ss:$16 sps:$4 sm:$0xff]  }
  0xd7   :  { %5567 = vmatpush1.bf16.msra.mxu0 %v8320_v46  ;;  %6141 = vmatpush1.bf16.msra.mxu1 %v8323_v47  ;;  %v8412_v46 = vld [vmem:[%s12253_s1 + $0x884] ss:$16 sps:$4 sm:$0xff]   ;;  %v8415_v47 = vld [vmem:[%s12253_s1 + $0x88c] ss:$16 sps:$4 sm:$0xff]  }
  0xd8   :  { %5568 = vmatprep.subr.bf16.mxu0 %v8328_v48  ;;  %6142 = vmatprep.subr.bf16.mxu1 %v8331_v50  ;;  %v8410_v48 = vld [vmem:[%s12253_s1 + $0x880] ss:$16 sps:$4 sm:$0xff]   ;;  %v8413_v50 = vld [vmem:[%s12253_s1 + $0x888] ss:$16 sps:$4 sm:$0xff]  }
  0xdb   :  { %5569 = vmatpush1.bf16.msra.mxu0 %v8326_v51  ;;  %6143 = vmatpush1.bf16.msra.mxu1 %v8329_v53  ;;  %v8418_v51 = vld [vmem:[%s12253_s1 + $0x8a4] ss:$16 sps:$4 sm:$0xff]   ;;  %v8421_v53 = vld [vmem:[%s12253_s1 + $0x8ac] ss:$16 sps:$4 sm:$0xff]  }
  0xdc   :  { %5570 = vmatprep.subr.bf16.mxu0 %v8334_v54  ;;  %6144 = vmatprep.subr.bf16.mxu1 %v8337_v55  ;;  %v8416_v54 = vld [vmem:[%s12253_s1 + $0x8a0] ss:$16 sps:$4 sm:$0xff]   ;;  %v8419_v55 = vld [vmem:[%s12253_s1 + $0x8a8] ss:$16 sps:$4 sm:$0xff]  }
  0xdf   :  { %5571 = vmatpush1.bf16.msra.mxu0 %v8332_v56  ;;  %6145 = vmatpush1.bf16.msra.mxu1 %v8335_v57  ;;  %v8424_v56 = vld [vmem:[%s12253_s1 + $0x8c4] ss:$16 sps:$4 sm:$0xff]   ;;  %v8427_v57 = vld [vmem:[%s12253_s1 + $0x8cc] ss:$16 sps:$4 sm:$0xff]  }
  0xe0   :  { %5572 = vmatprep.subr.bf16.mxu0 %v8340_v58  ;;  %6146 = vmatprep.subr.bf16.mxu1 %v8343_v59  ;;  %v8422_v58 = vld [vmem:[%s12253_s1 + $0x8c0] ss:$16 sps:$4 sm:$0xff]   ;;  %v8425_v59 = vld [vmem:[%s12253_s1 + $0x8c8] ss:$16 sps:$4 sm:$0xff]  }
  0xe3   :  { %5573 = vmatpush1.bf16.msra.mxu0 %v8338_v60  ;;  %6147 = vmatpush1.bf16.msra.mxu1 %v8341_v61  ;;  %v8430_v60 = vld [vmem:[%s12253_s1 + $0x8e4] ss:$16 sps:$4 sm:$0xff]   ;;  %v8433_v61 = vld [vmem:[%s12253_s1 + $0x8ec] ss:$16 sps:$4 sm:$0xff]  }
  0xe4   :  { %5574 = vmatprep.subr.bf16.mxu0 %v8346_v62  ;;  %6148 = vmatprep.subr.bf16.mxu1 %v8349_v63  ;;  %v8428_v62 = vld [vmem:[%s12253_s1 + $0x8e0] ss:$16 sps:$4 sm:$0xff]   ;;  %v8431_v63 = vld [vmem:[%s12253_s1 + $0x8e8] ss:$16 sps:$4 sm:$0xff]  }
  0xe7   :  { %5575 = vmatpush1.bf16.msra.mxu0 %v8344_v0  ;;  %6149 = vmatpush1.bf16.msra.mxu1 %v8347_v1  ;;  %v8436_v0 = vld [vmem:[%s12253_s1 + $0x904] ss:$16 sps:$4 sm:$0xff]   ;;  %v8439_v1 = vld [vmem:[%s12253_s1 + $0x90c] ss:$16 sps:$4 sm:$0xff]  }
  0xe8   :  { %5576 = vmatprep.subr.bf16.mxu0 %v8352_v2  ;;  %6150 = vmatprep.subr.bf16.mxu1 %v8355_v3  ;;  %v8434_v2 = vld [vmem:[%s12253_s1 + $0x900] ss:$16 sps:$4 sm:$0xff]   ;;  %v8437_v3 = vld [vmem:[%s12253_s1 + $0x908] ss:$16 sps:$4 sm:$0xff]  }
  0xeb   :  { %5577 = vmatpush1.bf16.msra.mxu0 %v8350_v4  ;;  %6151 = vmatpush1.bf16.msra.mxu1 %v8353_v5  ;;  %v8442_v4 = vld [vmem:[%s12253_s1 + $0x924] ss:$16 sps:$4 sm:$0xff]   ;;  %v8445_v5 = vld [vmem:[%s12253_s1 + $0x92c] ss:$16 sps:$4 sm:$0xff]  }
  0xec   :  { %5578 = vmatprep.subr.bf16.mxu0 %v8358_v6  ;;  %6152 = vmatprep.subr.bf16.mxu1 %v8361_v7  ;;  %v8440_v6 = vld [vmem:[%s12253_s1 + $0x920] ss:$16 sps:$4 sm:$0xff]   ;;  %v8443_v7 = vld [vmem:[%s12253_s1 + $0x928] ss:$16 sps:$4 sm:$0xff]  }
  0xef   :  { %5579 = vmatpush1.bf16.msra.mxu0 %v8356_v8  ;;  %6153 = vmatpush1.bf16.msra.mxu1 %v8359_v9  ;;  %v8448_v8 = vld [vmem:[%s12253_s1 + $0x944] ss:$16 sps:$4 sm:$0xff]   ;;  %v8451_v9 = vld [vmem:[%s12253_s1 + $0x94c] ss:$16 sps:$4 sm:$0xff]  }
  0xf0   :  { %5580 = vmatprep.subr.bf16.mxu0 %v8364_v10  ;;  %6154 = vmatprep.subr.bf16.mxu1 %v8367_v11  ;;  %v8446_v10 = vld [vmem:[%s12253_s1 + $0x940] ss:$16 sps:$4 sm:$0xff]   ;;  %v8449_v11 = vld [vmem:[%s12253_s1 + $0x948] ss:$16 sps:$4 sm:$0xff]  }
  0xf3   :  { %5581 = vmatpush1.bf16.msra.mxu0 %v8362_v12  ;;  %6155 = vmatpush1.bf16.msra.mxu1 %v8365_v52  ;;  %v8454_v12 = vld [vmem:[%s12253_s1 + $0x964] ss:$16 sps:$4 sm:$0xff]   ;;  %v8457_v52 = vld [vmem:[%s12253_s1 + $0x96c] ss:$16 sps:$4 sm:$0xff]  }
  0xf4   :  { %5582 = vmatprep.subr.bf16.mxu0 %v8370_v15  ;;  %6156 = vmatprep.subr.bf16.mxu1 %v8373_v16  ;;  %v8452_v15 = vld [vmem:[%s12253_s1 + $0x960] ss:$16 sps:$4 sm:$0xff]   ;;  %v8455_v16 = vld [vmem:[%s12253_s1 + $0x968] ss:$16 sps:$4 sm:$0xff]  }
  0xf7   :  { %5583 = vmatpush1.bf16.msra.mxu0 %v8368_v17  ;;  %6157 = vmatpush1.bf16.msra.mxu1 %v8371_v18  ;;  %v8460_v17 = vld [vmem:[%s12253_s1 + $0x984] ss:$16 sps:$4 sm:$0xff]   ;;  %v8463_v18 = vld [vmem:[%s12253_s1 + $0x98c] ss:$16 sps:$4 sm:$0xff]  }
  0xf8   :  { %5584 = vmatprep.subr.bf16.mxu0 %v8376_v19  ;;  %6158 = vmatprep.subr.bf16.mxu1 %v8379_v20  ;;  %v8458_v19 = vld [vmem:[%s12253_s1 + $0x980] ss:$16 sps:$4 sm:$0xff]   ;;  %v8461_v20 = vld [vmem:[%s12253_s1 + $0x988] ss:$16 sps:$4 sm:$0xff]  }
  0xfb   :  { %5585 = vmatpush1.bf16.msra.mxu0 %v8374_v22  ;;  %6159 = vmatpush1.bf16.msra.mxu1 %v8377_v23  ;;  %v8466_v22 = vld [vmem:[%s12253_s1 + $0x9a4] ss:$16 sps:$4 sm:$0xff]   ;;  %v8469_v23 = vld [vmem:[%s12253_s1 + $0x9ac] ss:$16 sps:$4 sm:$0xff]  }
  0xfc   :  { %5586 = vmatprep.subr.bf16.mxu0 %v8382_v24  ;;  %6160 = vmatprep.subr.bf16.mxu1 %v8385_v13  ;;  %v8464_v24 = vld [vmem:[%s12253_s1 + $0x9a0] ss:$16 sps:$4 sm:$0xff]   ;;  %v8467_v13 = vld [vmem:[%s12253_s1 + $0x9a8] ss:$16 sps:$4 sm:$0xff]  }
  0xff   :  { %5587 = vmatpush1.bf16.msra.mxu0 %v8380_v27  ;;  %6161 = vmatpush1.bf16.msra.mxu1 %v8383_v28  ;;  %v8472_v27 = vld [vmem:[%s12253_s1 + $0x9c4] ss:$16 sps:$4 sm:$0xff]   ;;  %v8475_v28 = vld [vmem:[%s12253_s1 + $0x9cc] ss:$16 sps:$4 sm:$0xff]  }
 0x100   :  { %5597 = vmatprep.subr.bf16.mxu0 %v8388_v29  ;;  %6171 = vmatprep.subr.bf16.mxu1 %v8391_v14  ;;  %v8470_v29 = vld [vmem:[%s12253_s1 + $0x9c0] ss:$16 sps:$4 sm:$0xff]   ;;  %v8473_v14 = vld [vmem:[%s12253_s1 + $0x9c8] ss:$16 sps:$4 sm:$0xff]  }
 0x102   :  { %5589 = vmatmul.mubr.bf16.vlgmr.msra.gmra.mrb[0].mxu0 %v962_v31  ;;  %6163 = vmatmul.mubr.bf16.vlgmr.msra.gmra.mrb[0].mxu1 %v962_v31  ;;  %v8481_v31 = vld [vmem:[%s12253_s1 + $0x9ec] ss:$16 sps:$4 sm:$0xff]  }
 0x103   :  { %5598 = vmatpush1.bf16.msra.mxu0 %v8386_v25  ;;  %6172 = vmatpush1.bf16.msra.mxu1 %v8389_v32  ;;  %v8476_v25 = vld [vmem:[%s12253_s1 + $0x9e0] ss:$16 sps:$4 sm:$0xff]   ;;  %v8479_v32 = vld [vmem:[%s12253_s1 + $0x9e8] ss:$16 sps:$4 sm:$0xff]  }
 0x104   :  { %5599 = vmatprep.subr.bf16.mxu0 %v8394_v33  ;;  %6173 = vmatprep.subr.bf16.mxu1 %v8397_v26  ;;  %v8484_v33 = vld [vmem:[%s12253_s1 + $0xa04] ss:$16 sps:$4 sm:$0xff]   ;;  %v8487_v26 = vld [vmem:[%s12253_s1 + $0xa0c] ss:$16 sps:$4 sm:$0xff]  }
 0x105   :  { %5629 = vmatprep.mubr.bf16.mxu0 %v10227_v34  ;;  %6203 = vmatprep.mubr.bf16.mxu1 %v10227_v34 }
 0x107   :  { %5600 = vmatpush1.bf16.msra.mxu0 %v8392_v35  ;;  %6174 = vmatpush1.bf16.msra.mxu1 %v8395_v36  ;;  %v10413_v35 = vrot.slane %v10184_v21, %v9526_v49  ;;  %v8482_v36 = vld [vmem:[%s12253_s1 + $0xa00] ss:$16 sps:$4 sm:$0xff]   ;;  %v8493_v21 = vld [vmem:[%s12253_s1 + $0xa2c] ss:$16 sps:$4 sm:$0xff]  }
 0x108   :  { %5601 = vmatprep.subr.bf16.mxu0 %v8400_v37  ;;  %6175 = vmatprep.subr.bf16.mxu1 %v8403_v38  ;;  %v8485_v37 = vld [vmem:[%s12253_s1 + $0xa08] ss:$16 sps:$4 sm:$0xff]   ;;  %v8490_v38 = vld [vmem:[%s12253_s1 + $0xa24] ss:$16 sps:$4 sm:$0xff]  }
 0x10b   :  { %5602 = vmatpush1.bf16.msra.mxu0 %v8398_v39  ;;  %6176 = vmatpush1.bf16.msra.mxu1 %v8401_v40  ;;  %v1012_v39 = vcombine.high %v10227_v34, %v10227_v34  ;;  %v8488_v40 = vld [vmem:[%s12253_s1 + $0xa20] ss:$16 sps:$4 sm:$0xff]   ;;  %v8496_v34 = vld [vmem:[%s12253_s1 + $0xa44] ss:$16 sps:$4 sm:$0xff]  }
 0x10c   :  { %5603 = vmatprep.subr.bf16.mxu0 %v8406_v41  ;;  %6177 = vmatprep.subr.bf16.mxu1 %v8409_v43  ;;  %v8491_v41 = vld [vmem:[%s12253_s1 + $0xa28] ss:$16 sps:$4 sm:$0xff]   ;;  %v8499_v43 = vld [vmem:[%s12253_s1 + $0xa4c] ss:$16 sps:$4 sm:$0xff]  }
 0x10f   :  { %5604 = vmatpush1.bf16.msra.mxu0 %v8404_v44  ;;  %6178 = vmatpush1.bf16.msra.mxu1 %v8407_v45  ;;  %v8494_v44 = vld [vmem:[%s12253_s1 + $0xa40] ss:$16 sps:$4 sm:$0xff]   ;;  %v8497_v45 = vld [vmem:[%s12253_s1 + $0xa48] ss:$16 sps:$4 sm:$0xff]  }
 0x110   :  { %5605 = vmatprep.subr.bf16.mxu0 %v8412_v46  ;;  %6179 = vmatprep.subr.bf16.mxu1 %v8415_v47  ;;  %v8502_v46 = vld [vmem:[%s12253_s1 + $0xa64] ss:$16 sps:$4 sm:$0xff]   ;;  %v8505_v47 = vld [vmem:[%s12253_s1 + $0xa6c] ss:$16 sps:$4 sm:$0xff]  }
 0x113   :  { %5606 = vmatpush1.bf16.msra.mxu0 %v8410_v48  ;;  %6180 = vmatpush1.bf16.msra.mxu1 %v8413_v50  ;;  %v8500_v48 = vld [vmem:[%s12253_s1 + $0xa60] ss:$16 sps:$4 sm:$0xff]   ;;  %v8503_v50 = vld [vmem:[%s12253_s1 + $0xa68] ss:$16 sps:$4 sm:$0xff]  }
 0x114   :  { %5607 = vmatprep.subr.bf16.mxu0 %v8418_v51  ;;  %6181 = vmatprep.subr.bf16.mxu1 %v8421_v53  ;;  %v8508_v51 = vld [vmem:[%s12253_s1 + $0xa84] ss:$16 sps:$4 sm:$0xff]   ;;  %v8511_v53 = vld [vmem:[%s12253_s1 + $0xa8c] ss:$16 sps:$4 sm:$0xff]  }
 0x117   :  { %5608 = vmatpush1.bf16.msra.mxu0 %v8416_v54  ;;  %6182 = vmatpush1.bf16.msra.mxu1 %v8419_v55  ;;  %v8506_v54 = vld [vmem:[%s12253_s1 + $0xa80] ss:$16 sps:$4 sm:$0xff]   ;;  %v8509_v55 = vld [vmem:[%s12253_s1 + $0xa88] ss:$16 sps:$4 sm:$0xff]  }
 0x118   :  { %5609 = vmatprep.subr.bf16.mxu0 %v8424_v56  ;;  %6183 = vmatprep.subr.bf16.mxu1 %v8427_v57  ;;  %v8514_v56 = vld [vmem:[%s12253_s1 + $0xaa4] ss:$16 sps:$4 sm:$0xff]   ;;  %v8517_v57 = vld [vmem:[%s12253_s1 + $0xaac] ss:$16 sps:$4 sm:$0xff]  }
 0x11b   :  { %5610 = vmatpush1.bf16.msra.mxu0 %v8422_v58  ;;  %6184 = vmatpush1.bf16.msra.mxu1 %v8425_v59  ;;  %v8512_v58 = vld [vmem:[%s12253_s1 + $0xaa0] ss:$16 sps:$4 sm:$0xff]   ;;  %v8515_v59 = vld [vmem:[%s12253_s1 + $0xaa8] ss:$16 sps:$4 sm:$0xff]  }
 0x11c   :  { %5611 = vmatprep.subr.bf16.mxu0 %v8430_v60  ;;  %6185 = vmatprep.subr.bf16.mxu1 %v8433_v61  ;;  %v8520_v60 = vld [vmem:[%s12253_s1 + $0xac4] ss:$16 sps:$4 sm:$0xff]   ;;  %v8523_v61 = vld [vmem:[%s12253_s1 + $0xacc] ss:$16 sps:$4 sm:$0xff]  }
 0x11f   :  { %5612 = vmatpush1.bf16.msra.mxu0 %v8428_v62  ;;  %6186 = vmatpush1.bf16.msra.mxu1 %v8431_v63  ;;  %v8518_v62 = vld [vmem:[%s12253_s1 + $0xac0] ss:$16 sps:$4 sm:$0xff]   ;;  %v8521_v63 = vld [vmem:[%s12253_s1 + $0xac8] ss:$16 sps:$4 sm:$0xff]  }
 0x120   :  { %5613 = vmatprep.subr.bf16.mxu0 %v8436_v0  ;;  %6187 = vmatprep.subr.bf16.mxu1 %v8439_v1  ;;  %v8526_v0 = vld [vmem:[%s12253_s1 + $0xae4] ss:$16 sps:$4 sm:$0xff]   ;;  %v8529_v1 = vld [vmem:[%s12253_s1 + $0xaec] ss:$16 sps:$4 sm:$0xff]  }
 0x123   :  { %5614 = vmatpush1.bf16.msra.mxu0 %v8434_v2  ;;  %6188 = vmatpush1.bf16.msra.mxu1 %v8437_v3  ;;  %v8524_v2 = vld [vmem:[%s12253_s1 + $0xae0] ss:$16 sps:$4 sm:$0xff]   ;;  %v8527_v3 = vld [vmem:[%s12253_s1 + $0xae8] ss:$16 sps:$4 sm:$0xff]  }
 0x124   :  { %5615 = vmatprep.subr.bf16.mxu0 %v8442_v4  ;;  %6189 = vmatprep.subr.bf16.mxu1 %v8445_v5  ;;  %v8532_v4 = vld [vmem:[%s12253_s1 + $0xb04] ss:$16 sps:$4 sm:$0xff]   ;;  %v8535_v5 = vld [vmem:[%s12253_s1 + $0xb0c] ss:$16 sps:$4 sm:$0xff]  }
 0x127   :  { %5616 = vmatpush1.bf16.msra.mxu0 %v8440_v6  ;;  %6190 = vmatpush1.bf16.msra.mxu1 %v8443_v7  ;;  %v8530_v6 = vld [vmem:[%s12253_s1 + $0xb00] ss:$16 sps:$4 sm:$0xff]   ;;  %v8533_v7 = vld [vmem:[%s12253_s1 + $0xb08] ss:$16 sps:$4 sm:$0xff]  }
 0x128   :  { %5617 = vmatprep.subr.bf16.mxu0 %v8448_v8  ;;  %6191 = vmatprep.subr.bf16.mxu1 %v8451_v9  ;;  %v8538_v8 = vld [vmem:[%s12253_s1 + $0xb24] ss:$16 sps:$4 sm:$0xff]   ;;  %v8541_v9 = vld [vmem:[%s12253_s1 + $0xb2c] ss:$16 sps:$4 sm:$0xff]  }
 0x12b   :  { %5618 = vmatpush1.bf16.msra.mxu0 %v8446_v10  ;;  %6192 = vmatpush1.bf16.msra.mxu1 %v8449_v11  ;;  %v8536_v10 = vld [vmem:[%s12253_s1 + $0xb20] ss:$16 sps:$4 sm:$0xff]   ;;  %v8539_v11 = vld [vmem:[%s12253_s1 + $0xb28] ss:$16 sps:$4 sm:$0xff]  }
 0x12c   :  { %5619 = vmatprep.subr.bf16.mxu0 %v8454_v12  ;;  %6193 = vmatprep.subr.bf16.mxu1 %v8457_v52  ;;  %v8544_v12 = vld [vmem:[%s12253_s1 + $0xb44] ss:$16 sps:$4 sm:$0xff]   ;;  %v8547_v52 = vld [vmem:[%s12253_s1 + $0xb4c] ss:$16 sps:$4 sm:$0xff]  }
 0x12f   :  { %5620 = vmatpush1.bf16.msra.mxu0 %v8452_v15  ;;  %6194 = vmatpush1.bf16.msra.mxu1 %v8455_v16  ;;  %v8542_v15 = vld [vmem:[%s12253_s1 + $0xb40] ss:$16 sps:$4 sm:$0xff]   ;;  %v8545_v16 = vld [vmem:[%s12253_s1 + $0xb48] ss:$16 sps:$4 sm:$0xff]  }
 0x130   :  { %5621 = vmatprep.subr.bf16.mxu0 %v8460_v17  ;;  %6195 = vmatprep.subr.bf16.mxu1 %v8463_v18  ;;  %v8550_v17 = vld [vmem:[%s12253_s1 + $0xb64] ss:$16 sps:$4 sm:$0xff]   ;;  %v8553_v18 = vld [vmem:[%s12253_s1 + $0xb6c] ss:$16 sps:$4 sm:$0xff]  }
 0x133   :  { %5622 = vmatpush1.bf16.msra.mxu0 %v8458_v19  ;;  %6196 = vmatpush1.bf16.msra.mxu1 %v8461_v20  ;;  %v8548_v19 = vld [vmem:[%s12253_s1 + $0xb60] ss:$16 sps:$4 sm:$0xff]   ;;  %v8551_v20 = vld [vmem:[%s12253_s1 + $0xb68] ss:$16 sps:$4 sm:$0xff]  }
 0x134   :  { %5623 = vmatprep.subr.bf16.mxu0 %v8466_v22  ;;  %6197 = vmatprep.subr.bf16.mxu1 %v8469_v23  ;;  %v8556_v22 = vld [vmem:[%s12253_s1 + $0xb84] ss:$16 sps:$4 sm:$0xff]   ;;  %v8559_v23 = vld [vmem:[%s12253_s1 + $0xb8c] ss:$16 sps:$4 sm:$0xff]  }
 0x137   :  { %5624 = vmatpush1.bf16.msra.mxu0 %v8464_v24  ;;  %6198 = vmatpush1.bf16.msra.mxu1 %v8467_v13  ;;  %v8554_v24 = vld [vmem:[%s12253_s1 + $0xb80] ss:$16 sps:$4 sm:$0xff]   ;;  %v8557_v13 = vld [vmem:[%s12253_s1 + $0xb88] ss:$16 sps:$4 sm:$0xff]  }
 0x138   :  { %5625 = vmatprep.subr.bf16.mxu0 %v8472_v27  ;;  %6199 = vmatprep.subr.bf16.mxu1 %v8475_v28  ;;  %v8562_v27 = vld [vmem:[%s12253_s1 + $0xba4] ss:$16 sps:$4 sm:$0xff]   ;;  %v8565_v28 = vld [vmem:[%s12253_s1 + $0xbac] ss:$16 sps:$4 sm:$0xff]  }
 0x13b   :  { %5626 = vmatpush1.bf16.msra.mxu0 %v8470_v29  ;;  %6200 = vmatpush1.bf16.msra.mxu1 %v8473_v14  ;;  %v8560_v29 = vld [vmem:[%s12253_s1 + $0xba0] ss:$16 sps:$4 sm:$0xff]   ;;  %v8563_v14 = vld [vmem:[%s12253_s1 + $0xba8] ss:$16 sps:$4 sm:$0xff]  }
 0x13c   :  { %5627 = vmatprep.subr.bf16.mxu0 %v8478_v30  ;;  %6201 = vmatprep.subr.bf16.mxu1 %v8481_v31  ;;  %v8568_v30 = vld [vmem:[%s12253_s1 + $0xbc4] ss:$16 sps:$4 sm:$0xff]   ;;  %v8571_v31 = vld [vmem:[%s12253_s1 + $0xbcc] ss:$16 sps:$4 sm:$0xff]  }
 0x13f   :  { %5628 = vmatpush1.bf16.msra.mxu0 %v8476_v25  ;;  %6202 = vmatpush1.bf16.msra.mxu1 %v8479_v32  ;;  %v9332_v25 = vld [vmem:[%s12252_s0 + $0x8] sm:$0xff] }
 0x140   :  { %5638 = vmatprep.subr.bf16.mxu0 %v8484_v33  ;;  %6212 = vmatprep.subr.bf16.mxu1 %v8487_v26  ;;  %v965_v32 = vcombine.high %v9332_v25, %v9332_v25  ;;  %v8566_v33 = vld [vmem:[%s12253_s1 + $0xbc0] ss:$16 sps:$4 sm:$0xff]   ;;  %v8569_v26 = vld [vmem:[%s12253_s1 + $0xbc8] ss:$16 sps:$4 sm:$0xff]  }
 0x141   :  { %v8650_v25 = vld [vmem:[%s12253_s1 + $0xd80] ss:$16 sps:$4 sm:$0xff]  }
 0x142   :  { %5630 = vmatmul.mubr.bf16.vlgmr.msra.gmra.mrb[0].mxu0 %v10413_v35  ;;  %6204 = vmatmul.mubr.bf16.vlgmr.msra.gmra.mrb[0].mxu1 %v10413_v35 }
 0x143   :  { %5639 = vmatpush1.bf16.msra.mxu0 %v8482_v36  ;;  %6213 = vmatpush1.bf16.msra.mxu1 %v8485_v37  ;;  %v8574_v36 = vld [vmem:[%s12253_s1 + $0xbe4] ss:$16 sps:$4 sm:$0xff]   ;;  %v8577_v37 = vld [vmem:[%s12253_s1 + $0xbec] ss:$16 sps:$4 sm:$0xff]  }
 0x144   :  { %5640 = vmatprep.subr.bf16.mxu0 %v8490_v38  ;;  %6214 = vmatprep.subr.bf16.mxu1 %v8493_v21  ;;  %v10603_v38 = vrot.slane %v965_v32, %v9526_v49  ;;  %v8572_v21 = vld [vmem:[%s12253_s1 + $0xbe0] ss:$16 sps:$4 sm:$0xff]   ;;  %v8653_v32 = vld [vmem:[%s12253_s1 + $0xd88] ss:$16 sps:$4 sm:$0xff]  }
 0x145   :  { %5670 = vmatprep.mubr.bf16.mxu0 %v1012_v39  ;;  %6244 = vmatprep.mubr.bf16.mxu1 %v1012_v39  ;;  %v8575_v39 = vld [vmem:[%s12253_s1 + $0xbe8] ss:$16 sps:$4 sm:$0xff]  }
 0x147   :  { %5641 = vmatpush1.bf16.msra.mxu0 %v8488_v40  ;;  %6215 = vmatpush1.bf16.msra.mxu1 %v8491_v41  ;;  %v8580_v40 = vld [vmem:[%s12253_s1 + $0xc04] ss:$16 sps:$4 sm:$0xff]   ;;  %v8583_v41 = vld [vmem:[%s12253_s1 + $0xc0c] ss:$16 sps:$4 sm:$0xff]  }
 0x148   :  { %5642 = vmatprep.subr.bf16.mxu0 %v8496_v34  ;;  %6216 = vmatprep.subr.bf16.mxu1 %v8499_v43  ;;  %v981_v34 = vcombine.high %v10603_v38, %v10603_v38  ;;  %v1010_v43 = vcombine.high %v10413_v35, %v10413_v35  ;;  %v8589_v35 = vld [vmem:[%s12253_s1 + $0xc2c] ss:$16 sps:$4 sm:$0xff]  }
 0x14b   :  { %5643 = vmatpush1.bf16.msra.mxu0 %v8494_v44  ;;  %6217 = vmatpush1.bf16.msra.mxu1 %v8497_v45  ;;  %v8578_v44 = vld [vmem:[%s12253_s1 + $0xc00] ss:$16 sps:$4 sm:$0xff]   ;;  %v8581_v45 = vld [vmem:[%s12253_s1 + $0xc08] ss:$16 sps:$4 sm:$0xff]  }
 0x14c   :  { %5644 = vmatprep.subr.bf16.mxu0 %v8502_v46  ;;  %6218 = vmatprep.subr.bf16.mxu1 %v8505_v47  ;;  %v8586_v46 = vld [vmem:[%s12253_s1 + $0xc24] ss:$16 sps:$4 sm:$0xff]   ;;  %v10634_v47 = vrot.slane %v981_v34, %v9526_v49 }
 0x14d   :  { %v8670_v34 = vld [vmem:[%s12253_s1 + $0xde4] ss:$16 sps:$4 sm:$0xff]  }
 0x14f   :  { %5645 = vmatpush1.bf16.msra.mxu0 %v8500_v48  ;;  %6219 = vmatpush1.bf16.msra.mxu1 %v8503_v50  ;;  %v8584_v48 = vld [vmem:[%s12253_s1 + $0xc20] ss:$16 sps:$4 sm:$0xff]   ;;  %v8587_v50 = vld [vmem:[%s12253_s1 + $0xc28] ss:$16 sps:$4 sm:$0xff]  }
 0x150   :  { %5646 = vmatprep.subr.bf16.mxu0 %v8508_v51  ;;  %6220 = vmatprep.subr.bf16.mxu1 %v8511_v53  ;;  %v8592_v51 = vld [vmem:[%s12253_s1 + $0xc44] ss:$16 sps:$4 sm:$0xff]   ;;  %v8595_v53 = vld [vmem:[%s12253_s1 + $0xc4c] ss:$16 sps:$4 sm:$0xff]  }
 0x153   :  { %5647 = vmatpush1.bf16.msra.mxu0 %v8506_v54  ;;  %6221 = vmatpush1.bf16.msra.mxu1 %v8509_v55  ;;  %v8590_v54 = vld [vmem:[%s12253_s1 + $0xc40] ss:$16 sps:$4 sm:$0xff]   ;;  %v8593_v55 = vld [vmem:[%s12253_s1 + $0xc48] ss:$16 sps:$4 sm:$0xff]  }
 0x154   :  { %5648 = vmatprep.subr.bf16.mxu0 %v8514_v56  ;;  %6222 = vmatprep.subr.bf16.mxu1 %v8517_v57  ;;  %v8598_v56 = vld [vmem:[%s12253_s1 + $0xc64] ss:$16 sps:$4 sm:$0xff]   ;;  %v8601_v57 = vld [vmem:[%s12253_s1 + $0xc6c] ss:$16 sps:$4 sm:$0xff]  }
 0x157   :  { %5649 = vmatpush1.bf16.msra.mxu0 %v8512_v58  ;;  %6223 = vmatpush1.bf16.msra.mxu1 %v8515_v59  ;;  %v8596_v58 = vld [vmem:[%s12253_s1 + $0xc60] ss:$16 sps:$4 sm:$0xff]   ;;  %v8599_v59 = vld [vmem:[%s12253_s1 + $0xc68] ss:$16 sps:$4 sm:$0xff]  }
 0x158   :  { %5650 = vmatprep.subr.bf16.mxu0 %v8520_v60  ;;  %6224 = vmatprep.subr.bf16.mxu1 %v8523_v61  ;;  %v8604_v60 = vld [vmem:[%s12253_s1 + $0xc84] ss:$16 sps:$4 sm:$0xff]   ;;  %v8607_v61 = vld [vmem:[%s12253_s1 + $0xc8c] ss:$16 sps:$4 sm:$0xff]  }
 0x15b   :  { %5651 = vmatpush1.bf16.msra.mxu0 %v8518_v62  ;;  %6225 = vmatpush1.bf16.msra.mxu1 %v8521_v63  ;;  %v8602_v62 = vld [vmem:[%s12253_s1 + $0xc80] ss:$16 sps:$4 sm:$0xff]   ;;  %v8605_v63 = vld [vmem:[%s12253_s1 + $0xc88] ss:$16 sps:$4 sm:$0xff]  }
 0x15c   :  { %5652 = vmatprep.subr.bf16.mxu0 %v8526_v0  ;;  %6226 = vmatprep.subr.bf16.mxu1 %v8529_v1  ;;  %v8610_v0 = vld [vmem:[%s12253_s1 + $0xca4] ss:$16 sps:$4 sm:$0xff]   ;;  %v8613_v1 = vld [vmem:[%s12253_s1 + $0xcac] ss:$16 sps:$4 sm:$0xff]  }
 0x15f   :  { %5653 = vmatpush1.bf16.msra.mxu0 %v8524_v2  ;;  %6227 = vmatpush1.bf16.msra.mxu1 %v8527_v3  ;;  %v8608_v2 = vld [vmem:[%s12253_s1 + $0xca0] ss:$16 sps:$4 sm:$0xff]   ;;  %v8611_v3 = vld [vmem:[%s12253_s1 + $0xca8] ss:$16 sps:$4 sm:$0xff]  }
 0x160   :  { %5654 = vmatprep.subr.bf16.mxu0 %v8532_v4  ;;  %6228 = vmatprep.subr.bf16.mxu1 %v8535_v5  ;;  %v8616_v4 = vld [vmem:[%s12253_s1 + $0xcc4] ss:$16 sps:$4 sm:$0xff]   ;;  %v8619_v5 = vld [vmem:[%s12253_s1 + $0xccc] ss:$16 sps:$4 sm:$0xff]  }
 0x163   :  { %5655 = vmatpush1.bf16.msra.mxu0 %v8530_v6  ;;  %6229 = vmatpush1.bf16.msra.mxu1 %v8533_v7  ;;  %v8614_v6 = vld [vmem:[%s12253_s1 + $0xcc0] ss:$16 sps:$4 sm:$0xff]   ;;  %v8617_v7 = vld [vmem:[%s12253_s1 + $0xcc8] ss:$16 sps:$4 sm:$0xff]  }
 0x164   :  { %5656 = vmatprep.subr.bf16.mxu0 %v8538_v8  ;;  %6230 = vmatprep.subr.bf16.mxu1 %v8541_v9  ;;  %v8622_v8 = vld [vmem:[%s12253_s1 + $0xce4] ss:$16 sps:$4 sm:$0xff]   ;;  %v8625_v9 = vld [vmem:[%s12253_s1 + $0xcec] ss:$16 sps:$4 sm:$0xff]  }
 0x167   :  { %5657 = vmatpush1.bf16.msra.mxu0 %v8536_v10  ;;  %6231 = vmatpush1.bf16.msra.mxu1 %v8539_v11  ;;  %v8620_v10 = vld [vmem:[%s12253_s1 + $0xce0] ss:$16 sps:$4 sm:$0xff]   ;;  %v8623_v11 = vld [vmem:[%s12253_s1 + $0xce8] ss:$16 sps:$4 sm:$0xff]  }
 0x168   :  { %5658 = vmatprep.subr.bf16.mxu0 %v8544_v12  ;;  %6232 = vmatprep.subr.bf16.mxu1 %v8547_v52  ;;  %v8628_v12 = vld [vmem:[%s12253_s1 + $0xd04] ss:$16 sps:$4 sm:$0xff]   ;;  %v8631_v52 = vld [vmem:[%s12253_s1 + $0xd0c] ss:$16 sps:$4 sm:$0xff]  }
 0x16b   :  { %5659 = vmatpush1.bf16.msra.mxu0 %v8542_v15  ;;  %6233 = vmatpush1.bf16.msra.mxu1 %v8545_v16  ;;  %v8626_v15 = vld [vmem:[%s12253_s1 + $0xd00] ss:$16 sps:$4 sm:$0xff]   ;;  %v8629_v16 = vld [vmem:[%s12253_s1 + $0xd08] ss:$16 sps:$4 sm:$0xff]  }
 0x16c   :  { %5660 = vmatprep.subr.bf16.mxu0 %v8550_v17  ;;  %6234 = vmatprep.subr.bf16.mxu1 %v8553_v18  ;;  %v8634_v17 = vld [vmem:[%s12253_s1 + $0xd24] ss:$16 sps:$4 sm:$0xff]   ;;  %v8637_v18 = vld [vmem:[%s12253_s1 + $0xd2c] ss:$16 sps:$4 sm:$0xff]  }
 0x16f   :  { %5661 = vmatpush1.bf16.msra.mxu0 %v8548_v19  ;;  %6235 = vmatpush1.bf16.msra.mxu1 %v8551_v20  ;;  %v8632_v19 = vld [vmem:[%s12253_s1 + $0xd20] ss:$16 sps:$4 sm:$0xff]   ;;  %v8635_v20 = vld [vmem:[%s12253_s1 + $0xd28] ss:$16 sps:$4 sm:$0xff]  }
 0x170   :  { %5662 = vmatprep.subr.bf16.mxu0 %v8556_v22  ;;  %6236 = vmatprep.subr.bf16.mxu1 %v8559_v23  ;;  %v8640_v22 = vld [vmem:[%s12253_s1 + $0xd44] ss:$16 sps:$4 sm:$0xff]   ;;  %v8643_v23 = vld [vmem:[%s12253_s1 + $0xd4c] ss:$16 sps:$4 sm:$0xff]  }
 0x173   :  { %5663 = vmatpush1.bf16.msra.mxu0 %v8554_v24  ;;  %6237 = vmatpush1.bf16.msra.mxu1 %v8557_v13  ;;  %v8638_v24 = vld [vmem:[%s12253_s1 + $0xd40] ss:$16 sps:$4 sm:$0xff]   ;;  %v8641_v13 = vld [vmem:[%s12253_s1 + $0xd48] ss:$16 sps:$4 sm:$0xff]  }
 0x174   :  { %5664 = vmatprep.subr.bf16.mxu0 %v8562_v27  ;;  %6238 = vmatprep.subr.bf16.mxu1 %v8565_v28  ;;  %v8646_v27 = vld [vmem:[%s12253_s1 + $0xd64] ss:$16 sps:$4 sm:$0xff]   ;;  %v8649_v28 = vld [vmem:[%s12253_s1 + $0xd6c] ss:$16 sps:$4 sm:$0xff]  }
 0x177   :  { %5665 = vmatpush1.bf16.msra.mxu0 %v8560_v29  ;;  %6239 = vmatpush1.bf16.msra.mxu1 %v8563_v14  ;;  %v8644_v29 = vld [vmem:[%s12253_s1 + $0xd60] ss:$16 sps:$4 sm:$0xff]   ;;  %v8647_v14 = vld [vmem:[%s12253_s1 + $0xd68] ss:$16 sps:$4 sm:$0xff]  }
 0x178   :  { %5666 = vmatprep.subr.bf16.mxu0 %v8568_v30  ;;  %6240 = vmatprep.subr.bf16.mxu1 %v8571_v31  ;;  %v8652_v30 = vld [vmem:[%s12253_s1 + $0xd84] ss:$16 sps:$4 sm:$0xff]   ;;  %v8655_v31 = vld [vmem:[%s12253_s1 + $0xd8c] ss:$16 sps:$4 sm:$0xff]  }
 0x17b   :  { %5667 = vmatpush1.bf16.msra.mxu0 %v8566_v33  ;;  %6241 = vmatpush1.bf16.msra.mxu1 %v8569_v26  ;;  %v8658_v33 = vld [vmem:[%s12253_s1 + $0xda4] ss:$16 sps:$4 sm:$0xff]   ;;  %v8661_v26 = vld [vmem:[%s12253_s1 + $0xdac] ss:$16 sps:$4 sm:$0xff]  }
 0x17c   :  { %5668 = vmatprep.subr.bf16.mxu0 %v8574_v36  ;;  %6242 = vmatprep.subr.bf16.mxu1 %v8577_v37  ;;  %v8656_v36 = vld [vmem:[%s12253_s1 + $0xda0] ss:$16 sps:$4 sm:$0xff]   ;;  %v8659_v37 = vld [vmem:[%s12253_s1 + $0xda8] ss:$16 sps:$4 sm:$0xff]  }
 0x17f   :  { %5669 = vmatpush1.bf16.msra.mxu0 %v8572_v21  ;;  %6243 = vmatpush1.bf16.msra.mxu1 %v8575_v39  ;;  %v8664_v21 = vld [vmem:[%s12253_s1 + $0xdc4] ss:$16 sps:$4 sm:$0xff]   ;;  %v8667_v39 = vld [vmem:[%s12253_s1 + $0xdcc] ss:$16 sps:$4 sm:$0xff]  }
 0x180   :  { %5679 = vmatprep.subr.bf16.mxu0 %v8580_v40  ;;  %6253 = vmatprep.subr.bf16.mxu1 %v8583_v41  ;;  %v8662_v40 = vld [vmem:[%s12253_s1 + $0xdc0] ss:$16 sps:$4 sm:$0xff]   ;;  %v8665_v41 = vld [vmem:[%s12253_s1 + $0xdc8] ss:$16 sps:$4 sm:$0xff]  }
 0x182   :  { %5671 = vmatmul.mubr.bf16.vlgmr.msra.gmra.mrb[0].mxu0 %v1010_v43  ;;  %6245 = vmatmul.mubr.bf16.vlgmr.msra.gmra.mrb[0].mxu1 %v1010_v43  ;;  %v8673_v43 = vld [vmem:[%s12253_s1 + $0xdec] ss:$16 sps:$4 sm:$0xff]  }
 0x183   :  { %5680 = vmatpush1.bf16.msra.mxu0 %v8578_v44  ;;  %6254 = vmatpush1.bf16.msra.mxu1 %v8581_v45  ;;  %v8668_v44 = vld [vmem:[%s12253_s1 + $0xde0] ss:$16 sps:$4 sm:$0xff]   ;;  %v8671_v45 = vld [vmem:[%s12253_s1 + $0xde8] ss:$16 sps:$4 sm:$0xff]  }
 0x184   :  { %5681 = vmatprep.subr.bf16.mxu0 %v8586_v46  ;;  %6255 = vmatprep.subr.bf16.mxu1 %v8589_v35  ;;  %v8677_v46 = vld [vmem:[%s12253_s1 + $0xe04] ss:$16 sps:$4 sm:$0xff]   ;;  %v8680_v35 = vld [vmem:[%s12253_s1 + $0xe0c] ss:$16 sps:$4 sm:$0xff]  }
 0x185   :  { %5711 = vmatprep.mubr.bf16.mxu0 %v10634_v47  ;;  %6285 = vmatprep.mubr.bf16.mxu1 %v10634_v47 }
 0x187   :  { %5682 = vmatpush1.bf16.msra.mxu0 %v8584_v48  ;;  %6256 = vmatpush1.bf16.msra.mxu1 %v8587_v50  ;;  %v10820_v48 = vrot.slane %v10603_v38, %v9526_v49  ;;  %v8675_v50 = vld [vmem:[%s12253_s1 + $0xe00] ss:$16 sps:$4 sm:$0xff]   ;;  %v8686_v38 = vld [vmem:[%s12253_s1 + $0xe2c] ss:$16 sps:$4 sm:$0xff]  }
 0x188   :  { %5683 = vmatprep.subr.bf16.mxu0 %v8592_v51  ;;  %6257 = vmatprep.subr.bf16.mxu1 %v8595_v53  ;;  %v8678_v51 = vld [vmem:[%s12253_s1 + $0xe08] ss:$16 sps:$4 sm:$0xff]   ;;  %v8683_v53 = vld [vmem:[%s12253_s1 + $0xe24] ss:$16 sps:$4 sm:$0xff]  }
 0x18b   :  { %5684 = vmatpush1.bf16.msra.mxu0 %v8590_v54  ;;  %6258 = vmatpush1.bf16.msra.mxu1 %v8593_v55  ;;  %v1013_v54 = vcombine.high %v10634_v47, %v10634_v47  ;;  %v8681_v55 = vld [vmem:[%s12253_s1 + $0xe20] ss:$16 sps:$4 sm:$0xff]   ;;  %v8689_v47 = vld [vmem:[%s12253_s1 + $0xe44] ss:$16 sps:$4 sm:$0xff]  }
 0x18c   :  { %5685 = vmatprep.subr.bf16.mxu0 %v8598_v56  ;;  %6259 = vmatprep.subr.bf16.mxu1 %v8601_v57  ;;  %v8684_v56 = vld [vmem:[%s12253_s1 + $0xe28] ss:$16 sps:$4 sm:$0xff]   ;;  %v8692_v57 = vld [vmem:[%s12253_s1 + $0xe4c] ss:$16 sps:$4 sm:$0xff]  }
 0x18f   :  { %5686 = vmatpush1.bf16.msra.mxu0 %v8596_v58  ;;  %6260 = vmatpush1.bf16.msra.mxu1 %v8599_v59  ;;  %v8687_v58 = vld [vmem:[%s12253_s1 + $0xe40] ss:$16 sps:$4 sm:$0xff]   ;;  %v8690_v59 = vld [vmem:[%s12253_s1 + $0xe48] ss:$16 sps:$4 sm:$0xff]  }
 0x190   :  { %5687 = vmatprep.subr.bf16.mxu0 %v8604_v60  ;;  %6261 = vmatprep.subr.bf16.mxu1 %v8607_v61  ;;  %v8695_v60 = vld [vmem:[%s12253_s1 + $0xe64] ss:$16 sps:$4 sm:$0xff]   ;;  %v8698_v61 = vld [vmem:[%s12253_s1 + $0xe6c] ss:$16 sps:$4 sm:$0xff]  }
 0x193   :  { %5688 = vmatpush1.bf16.msra.mxu0 %v8602_v62  ;;  %6262 = vmatpush1.bf16.msra.mxu1 %v8605_v63  ;;  %v8693_v62 = vld [vmem:[%s12253_s1 + $0xe60] ss:$16 sps:$4 sm:$0xff]   ;;  %v8696_v63 = vld [vmem:[%s12253_s1 + $0xe68] ss:$16 sps:$4 sm:$0xff]  }
 0x194   :  { %5689 = vmatprep.subr.bf16.mxu0 %v8610_v0  ;;  %6263 = vmatprep.subr.bf16.mxu1 %v8613_v1  ;;  %v8701_v0 = vld [vmem:[%s12253_s1 + $0xe84] ss:$16 sps:$4 sm:$0xff]   ;;  %v8704_v1 = vld [vmem:[%s12253_s1 + $0xe8c] ss:$16 sps:$4 sm:$0xff]  }
 0x197   :  { %5690 = vmatpush1.bf16.msra.mxu0 %v8608_v2  ;;  %6264 = vmatpush1.bf16.msra.mxu1 %v8611_v3  ;;  %v8699_v2 = vld [vmem:[%s12253_s1 + $0xe80] ss:$16 sps:$4 sm:$0xff]   ;;  %v8702_v3 = vld [vmem:[%s12253_s1 + $0xe88] ss:$16 sps:$4 sm:$0xff]  }
 0x198   :  { %5691 = vmatprep.subr.bf16.mxu0 %v8616_v4  ;;  %6265 = vmatprep.subr.bf16.mxu1 %v8619_v5  ;;  %v8707_v4 = vld [vmem:[%s12253_s1 + $0xea4] ss:$16 sps:$4 sm:$0xff]   ;;  %v8710_v5 = vld [vmem:[%s12253_s1 + $0xeac] ss:$16 sps:$4 sm:$0xff]  }
 0x19b   :  { %5692 = vmatpush1.bf16.msra.mxu0 %v8614_v6  ;;  %6266 = vmatpush1.bf16.msra.mxu1 %v8617_v7  ;;  %v8705_v6 = vld [vmem:[%s12253_s1 + $0xea0] ss:$16 sps:$4 sm:$0xff]   ;;  %v8708_v7 = vld [vmem:[%s12253_s1 + $0xea8] ss:$16 sps:$4 sm:$0xff]  }
 0x19c   :  { %5693 = vmatprep.subr.bf16.mxu0 %v8622_v8  ;;  %6267 = vmatprep.subr.bf16.mxu1 %v8625_v9  ;;  %v8713_v8 = vld [vmem:[%s12253_s1 + $0xec4] ss:$16 sps:$4 sm:$0xff]   ;;  %v8716_v9 = vld [vmem:[%s12253_s1 + $0xecc] ss:$16 sps:$4 sm:$0xff]  }
 0x19f   :  { %5694 = vmatpush1.bf16.msra.mxu0 %v8620_v10  ;;  %6268 = vmatpush1.bf16.msra.mxu1 %v8623_v11  ;;  %v8711_v10 = vld [vmem:[%s12253_s1 + $0xec0] ss:$16 sps:$4 sm:$0xff]   ;;  %v8714_v11 = vld [vmem:[%s12253_s1 + $0xec8] ss:$16 sps:$4 sm:$0xff]  }
 0x1a0   :  { %5695 = vmatprep.subr.bf16.mxu0 %v8628_v12  ;;  %6269 = vmatprep.subr.bf16.mxu1 %v8631_v52  ;;  %v8719_v12 = vld [vmem:[%s12253_s1 + $0xee4] ss:$16 sps:$4 sm:$0xff]   ;;  %v8722_v52 = vld [vmem:[%s12253_s1 + $0xeec] ss:$16 sps:$4 sm:$0xff]  }
 0x1a3   :  { %5696 = vmatpush1.bf16.msra.mxu0 %v8626_v15  ;;  %6270 = vmatpush1.bf16.msra.mxu1 %v8629_v16  ;;  %v8717_v15 = vld [vmem:[%s12253_s1 + $0xee0] ss:$16 sps:$4 sm:$0xff]   ;;  %v8720_v16 = vld [vmem:[%s12253_s1 + $0xee8] ss:$16 sps:$4 sm:$0xff]  }
 0x1a4   :  { %5697 = vmatprep.subr.bf16.mxu0 %v8634_v17  ;;  %6271 = vmatprep.subr.bf16.mxu1 %v8637_v18  ;;  %v8725_v17 = vld [vmem:[%s12253_s1 + $0xf04] ss:$16 sps:$4 sm:$0xff]   ;;  %v8728_v18 = vld [vmem:[%s12253_s1 + $0xf0c] ss:$16 sps:$4 sm:$0xff]  }
 0x1a7   :  { %5698 = vmatpush1.bf16.msra.mxu0 %v8632_v19  ;;  %6272 = vmatpush1.bf16.msra.mxu1 %v8635_v20  ;;  %v8723_v19 = vld [vmem:[%s12253_s1 + $0xf00] ss:$16 sps:$4 sm:$0xff]   ;;  %v8726_v20 = vld [vmem:[%s12253_s1 + $0xf08] ss:$16 sps:$4 sm:$0xff]  }
 0x1a8   :  { %5699 = vmatprep.subr.bf16.mxu0 %v8640_v22  ;;  %6273 = vmatprep.subr.bf16.mxu1 %v8643_v23  ;;  %v8731_v22 = vld [vmem:[%s12253_s1 + $0xf24] ss:$16 sps:$4 sm:$0xff]   ;;  %v8734_v23 = vld [vmem:[%s12253_s1 + $0xf2c] ss:$16 sps:$4 sm:$0xff]  }
 0x1ab   :  { %5700 = vmatpush1.bf16.msra.mxu0 %v8638_v24  ;;  %6274 = vmatpush1.bf16.msra.mxu1 %v8641_v13  ;;  %v8729_v24 = vld [vmem:[%s12253_s1 + $0xf20] ss:$16 sps:$4 sm:$0xff]   ;;  %v8732_v13 = vld [vmem:[%s12253_s1 + $0xf28] ss:$16 sps:$4 sm:$0xff]  }
 0x1ac   :  { %5701 = vmatprep.subr.bf16.mxu0 %v8646_v27  ;;  %6275 = vmatprep.subr.bf16.mxu1 %v8649_v28  ;;  %v8737_v27 = vld [vmem:[%s12253_s1 + $0xf44] ss:$16 sps:$4 sm:$0xff]   ;;  %v8740_v28 = vld [vmem:[%s12253_s1 + $0xf4c] ss:$16 sps:$4 sm:$0xff]  }
 0x1af   :  { %5702 = vmatpush1.bf16.msra.mxu0 %v8644_v29  ;;  %6276 = vmatpush1.bf16.msra.mxu1 %v8647_v14  ;;  %v8735_v29 = vld [vmem:[%s12253_s1 + $0xf40] ss:$16 sps:$4 sm:$0xff]   ;;  %v8738_v14 = vld [vmem:[%s12253_s1 + $0xf48] ss:$16 sps:$4 sm:$0xff]  }
 0x1b0   :  { %5703 = vmatprep.subr.bf16.mxu0 %v8652_v30  ;;  %6277 = vmatprep.subr.bf16.mxu1 %v8655_v31  ;;  %v8743_v30 = vld [vmem:[%s12253_s1 + $0xf64] ss:$16 sps:$4 sm:$0xff]   ;;  %v8746_v31 = vld [vmem:[%s12253_s1 + $0xf6c] ss:$16 sps:$4 sm:$0xff]  }
 0x1b3   :  { %5704 = vmatpush1.bf16.msra.mxu0 %v8650_v25  ;;  %6278 = vmatpush1.bf16.msra.mxu1 %v8653_v32  ;;  %v8741_v25 = vld [vmem:[%s12253_s1 + $0xf60] ss:$16 sps:$4 sm:$0xff]   ;;  %v8744_v32 = vld [vmem:[%s12253_s1 + $0xf68] ss:$16 sps:$4 sm:$0xff]  }
 0x1b4   :  { %5705 = vmatprep.subr.bf16.mxu0 %v8658_v33  ;;  %6279 = vmatprep.subr.bf16.mxu1 %v8661_v26  ;;  %v8749_v33 = vld [vmem:[%s12253_s1 + $0xf84] ss:$16 sps:$4 sm:$0xff]   ;;  %v8752_v26 = vld [vmem:[%s12253_s1 + $0xf8c] ss:$16 sps:$4 sm:$0xff]  }
 0x1b7   :  { %5706 = vmatpush1.bf16.msra.mxu0 %v8656_v36  ;;  %6280 = vmatpush1.bf16.msra.mxu1 %v8659_v37  ;;  %v8747_v36 = vld [vmem:[%s12253_s1 + $0xf80] ss:$16 sps:$4 sm:$0xff]   ;;  %v8750_v37 = vld [vmem:[%s12253_s1 + $0xf88] ss:$16 sps:$4 sm:$0xff]  }
 0x1b8   :  { %5707 = vmatprep.subr.bf16.mxu0 %v8664_v21  ;;  %6281 = vmatprep.subr.bf16.mxu1 %v8667_v39  ;;  %v8755_v21 = vld [vmem:[%s12253_s1 + $0xfa4] ss:$16 sps:$4 sm:$0xff]   ;;  %v8758_v39 = vld [vmem:[%s12253_s1 + $0xfac] ss:$16 sps:$4 sm:$0xff]  }
 0x1bb   :  { %5708 = vmatpush1.bf16.msra.mxu0 %v8662_v40  ;;  %6282 = vmatpush1.bf16.msra.mxu1 %v8665_v41  ;;  %v8753_v40 = vld [vmem:[%s12253_s1 + $0xfa0] ss:$16 sps:$4 sm:$0xff]   ;;  %v8756_v41 = vld [vmem:[%s12253_s1 + $0xfa8] ss:$16 sps:$4 sm:$0xff]  }
 0x1bc   :  { %5709 = vmatprep.subr.bf16.mxu0 %v8670_v34  ;;  %6283 = vmatprep.subr.bf16.mxu1 %v8673_v43  ;;  %v8761_v34 = vld [vmem:[%s12253_s1 + $0xfc4] ss:$16 sps:$4 sm:$0xff]   ;;  %v8764_v43 = vld [vmem:[%s12253_s1 + $0xfcc] ss:$16 sps:$4 sm:$0xff]  }
 0x1bf   :  { %5710 = vmatpush1.bf16.msra.mxu0 %v8668_v44  ;;  %6284 = vmatpush1.bf16.msra.mxu1 %v8671_v45  ;;  %v10997_v44 = vld [vmem:[%s12252_s0 + $0x10] sm:$0xff] }
 0x1c0   :  { %5720 = vmatprep.subr.bf16.mxu0 %v8677_v46  ;;  %6294 = vmatprep.subr.bf16.mxu1 %v8680_v35  ;;  %v8759_v45 = vld [vmem:[%s12253_s1 + $0xfc0] ss:$16 sps:$4 sm:$0xff]   ;;  %v8762_v46 = vld [vmem:[%s12253_s1 + $0xfc8] ss:$16 sps:$4 sm:$0xff]   ;;  %v8767_v35 = vld [vmem:[%s12253_s1 + $0xfe4] ss:$16 sps:$4 sm:$0xff]  }
 0x1c2   :  { %5712 = vmatmul.mubr.bf16.vlgmr.msra.gmra.mrb[0].mxu0 %v10820_v48  ;;  %6286 = vmatmul.mubr.bf16.vlgmr.msra.gmra.mrb[0].mxu1 %v10820_v48 }
 0x1c3   :  { %5721 = vmatpush1.bf16.msra.mxu0 %v8675_v50  ;;  %6295 = vmatpush1.bf16.msra.mxu1 %v8678_v51  ;;  %v8770_v50 = vld [vmem:[%s12253_s1 + $0xfec] ss:$16 sps:$4 sm:$0xff]   ;;  %v11013_v51 = vrot.slane %v10997_v44, %v9526_v49 }
 0x1c4   :  { %5722 = vmatprep.subr.bf16.mxu0 %v8683_v53  ;;  %6296 = vmatprep.subr.bf16.mxu1 %v8686_v38  ;;  %v8765_v53 = vld [vmem:[%s12253_s1 + $0xfe0] ss:$16 sps:$4 sm:$0xff]   ;;  %v8768_v38 = vld [vmem:[%s12253_s1 + $0xfe8] ss:$16 sps:$4 sm:$0xff]  }
 0x1c5   :  { %5752 = vmatprep.mubr.bf16.mxu0 %v1013_v54  ;;  %6326 = vmatprep.mubr.bf16.mxu1 %v1013_v54  ;;  %v8773_v54 = vld [vmem:[%s12253_s1 + $0x1004] ss:$16 sps:$4 sm:$0xff]  }
 0x1c7   :  { %5723 = vmatpush1.bf16.msra.mxu0 %v8681_v55  ;;  %6297 = vmatpush1.bf16.msra.mxu1 %v8684_v56  ;;  %v8776_v55 = vld [vmem:[%s12253_s1 + $0x100c] ss:$16 sps:$4 sm:$0xff]   ;;  %v1029_v56 = vcombine.high %v11013_v51, %v11013_v51 }
 0x1c8   :  { %5724 = vmatprep.subr.bf16.mxu0 %v8689_v47  ;;  %6298 = vmatprep.subr.bf16.mxu1 %v8692_v57  ;;  %v1011_v47 = vcombine.high %v10820_v48, %v10820_v48  ;;  %v8771_v57 = vld [vmem:[%s12253_s1 + $0x1000] ss:$16 sps:$4 sm:$0xff]   ;;  %v8782_v48 = vld [vmem:[%s12253_s1 + $0x102c] ss:$16 sps:$4 sm:$0xff]  }
 0x1cb   :  { %5725 = vmatpush1.bf16.msra.mxu0 %v8687_v58  ;;  %6299 = vmatpush1.bf16.msra.mxu1 %v8690_v59  ;;  %v8774_v58 = vld [vmem:[%s12253_s1 + $0x1008] ss:$16 sps:$4 sm:$0xff]   ;;  %v8779_v59 = vld [vmem:[%s12253_s1 + $0x1024] ss:$16 sps:$4 sm:$0xff]  }
 0x1cc   :  { %5726 = vmatprep.subr.bf16.mxu0 %v8695_v60  ;;  %6300 = vmatprep.subr.bf16.mxu1 %v8698_v61  ;;  %v11044_v60 = vrot.slane %v1029_v56, %v9526_v49  ;;  %v8777_v61 = vld [vmem:[%s12253_s1 + $0x1020] ss:$16 sps:$4 sm:$0xff]  }
 0x1cf   :  { %5727 = vmatpush1.bf16.msra.mxu0 %v8693_v62  ;;  %6301 = vmatpush1.bf16.msra.mxu1 %v8696_v63  ;;  %v8780_v62 = vld [vmem:[%s12253_s1 + $0x1028] ss:$16 sps:$4 sm:$0xff]   ;;  %v8785_v63 = vld [vmem:[%s12253_s1 + $0x1044] ss:$16 sps:$4 sm:$0xff]  }
 0x1d0   :  { %5728 = vmatprep.subr.bf16.mxu0 %v8701_v0  ;;  %6302 = vmatprep.subr.bf16.mxu1 %v8704_v1  ;;  %v8788_v0 = vld [vmem:[%s12253_s1 + $0x104c] ss:$16 sps:$4 sm:$0xff]   ;;  %v8783_v1 = vld [vmem:[%s12253_s1 + $0x1040] ss:$16 sps:$4 sm:$0xff]  }
 0x1d3   :  { %5729 = vmatpush1.bf16.msra.mxu0 %v8699_v2  ;;  %6303 = vmatpush1.bf16.msra.mxu1 %v8702_v3  ;;  %v8786_v2 = vld [vmem:[%s12253_s1 + $0x1048] ss:$16 sps:$4 sm:$0xff]   ;;  %v8791_v3 = vld [vmem:[%s12253_s1 + $0x1064] ss:$16 sps:$4 sm:$0xff]  }
 0x1d4   :  { %5730 = vmatprep.subr.bf16.mxu0 %v8707_v4  ;;  %6304 = vmatprep.subr.bf16.mxu1 %v8710_v5  ;;  %v8794_v4 = vld [vmem:[%s12253_s1 + $0x106c] ss:$16 sps:$4 sm:$0xff]   ;;  %v8789_v5 = vld [vmem:[%s12253_s1 + $0x1060] ss:$16 sps:$4 sm:$0xff]  }
 0x1d7   :  { %5731 = vmatpush1.bf16.msra.mxu0 %v8705_v6  ;;  %6305 = vmatpush1.bf16.msra.mxu1 %v8708_v7  ;;  %v8792_v6 = vld [vmem:[%s12253_s1 + $0x1068] ss:$16 sps:$4 sm:$0xff]   ;;  %v8797_v7 = vld [vmem:[%s12253_s1 + $0x1084] ss:$16 sps:$4 sm:$0xff]  }
 0x1d8   :  { %5732 = vmatprep.subr.bf16.mxu0 %v8713_v8  ;;  %6306 = vmatprep.subr.bf16.mxu1 %v8716_v9  ;;  %v8800_v8 = vld [vmem:[%s12253_s1 + $0x108c] ss:$16 sps:$4 sm:$0xff]   ;;  %v8795_v9 = vld [vmem:[%s12253_s1 + $0x1080] ss:$16 sps:$4 sm:$0xff]  }
 0x1db   :  { %5733 = vmatpush1.bf16.msra.mxu0 %v8711_v10  ;;  %6307 = vmatpush1.bf16.msra.mxu1 %v8714_v11  ;;  %v8798_v10 = vld [vmem:[%s12253_s1 + $0x1088] ss:$16 sps:$4 sm:$0xff]   ;;  %v8803_v11 = vld [vmem:[%s12253_s1 + $0x10a4] ss:$16 sps:$4 sm:$0xff]  }
 0x1dc   :  { %5734 = vmatprep.subr.bf16.mxu0 %v8719_v12  ;;  %6308 = vmatprep.subr.bf16.mxu1 %v8722_v52  ;;  %v8806_v12 = vld [vmem:[%s12253_s1 + $0x10ac] ss:$16 sps:$4 sm:$0xff]  }
 0x1df   :  { %5735 = vmatpush1.bf16.msra.mxu0 %v8717_v15  ;;  %6309 = vmatpush1.bf16.msra.mxu1 %v8720_v16 }
 0x1e0   :  { %5736 = vmatprep.subr.bf16.mxu0 %v8725_v17  ;;  %6310 = vmatprep.subr.bf16.mxu1 %v8728_v18 }
 0x1e3   :  { %5737 = vmatpush1.bf16.msra.mxu0 %v8723_v19  ;;  %6311 = vmatpush1.bf16.msra.mxu1 %v8726_v20 }
 0x1e4   :  { %5738 = vmatprep.subr.bf16.mxu0 %v8731_v22  ;;  %6312 = vmatprep.subr.bf16.mxu1 %v8734_v23 }
 0x1e7   :  { %5739 = vmatpush1.bf16.msra.mxu0 %v8729_v24  ;;  %6313 = vmatpush1.bf16.msra.mxu1 %v8732_v13 }
 0x1e8   :  { %5740 = vmatprep.subr.bf16.mxu0 %v8737_v27  ;;  %6314 = vmatprep.subr.bf16.mxu1 %v8740_v28 }
 0x1eb   :  { %5741 = vmatpush1.bf16.msra.mxu0 %v8735_v29  ;;  %6315 = vmatpush1.bf16.msra.mxu1 %v8738_v14 }
 0x1ec   :  { %5742 = vmatprep.subr.bf16.mxu0 %v8743_v30  ;;  %6316 = vmatprep.subr.bf16.mxu1 %v8746_v31 }
 0x1ef   :  { %5743 = vmatpush1.bf16.msra.mxu0 %v8741_v25  ;;  %6317 = vmatpush1.bf16.msra.mxu1 %v8744_v32 }
 0x1f0   :  { %5744 = vmatprep.subr.bf16.mxu0 %v8749_v33  ;;  %6318 = vmatprep.subr.bf16.mxu1 %v8752_v26 }
 0x1f3   :  { %5745 = vmatpush1.bf16.msra.mxu0 %v8747_v36  ;;  %6319 = vmatpush1.bf16.msra.mxu1 %v8750_v37 }
 0x1f4   :  { %5746 = vmatprep.subr.bf16.mxu0 %v8755_v21  ;;  %6320 = vmatprep.subr.bf16.mxu1 %v8758_v39 }
 0x1f7   :  { %5747 = vmatpush1.bf16.msra.mxu0 %v8753_v40  ;;  %6321 = vmatpush1.bf16.msra.mxu1 %v8756_v41 }
 0x1f8   :  { %5748 = vmatprep.subr.bf16.mxu0 %v8761_v34  ;;  %6322 = vmatprep.subr.bf16.mxu1 %v8764_v43 }
 0x1fb   :  { %5749 = vmatpush1.bf16.msra.mxu0 %v8759_v45  ;;  %6323 = vmatpush1.bf16.msra.mxu1 %v8762_v46 }
 0x1fc   :  { %5750 = vmatprep.subr.bf16.mxu0 %v8767_v35  ;;  %6324 = vmatprep.subr.bf16.mxu1 %v8770_v50 }
 0x1ff   :  { %5751 = vmatpush1.bf16.msra.mxu0 %v8765_v53  ;;  %6325 = vmatpush1.bf16.msra.mxu1 %v8768_v38 }
 0x200   :  { %5761 = vmatprep.subr.bf16.mxu0 %v8773_v54  ;;  %6335 = vmatprep.subr.bf16.mxu1 %v8776_v55 }
 0x202   :  { %5753 = vmatmul.mubr.bf16.vlgmr.msra.gmra.mrb[0].mxu0 %v1011_v47  ;;  %6327 = vmatmul.mubr.bf16.vlgmr.msra.gmra.mrb[0].mxu1 %v1011_v47 }
 0x203   :  { %5762 = vmatpush1.bf16.msra.mxu0 %v8771_v57  ;;  %6336 = vmatpush1.bf16.msra.mxu1 %v8774_v58 }
 0x204   :  { %5763 = vmatprep.subr.bf16.mxu0 %v8779_v59  ;;  %6337 = vmatprep.subr.bf16.mxu1 %v8782_v48 }
 0x205   :  { %5793 = vmatprep.mubr.bf16.mxu0 %v11044_v60  ;;  %6367 = vmatprep.mubr.bf16.mxu1 %v11044_v60 }
 0x207   :  { %5764 = vmatpush1.bf16.msra.mxu0 %v8777_v61  ;;  %6338 = vmatpush1.bf16.msra.mxu1 %v8780_v62 }
 0x208   :  { %5765 = vmatprep.subr.bf16.mxu0 %v8785_v63  ;;  %6339 = vmatprep.subr.bf16.mxu1 %v8788_v0 }
 0x20b   :  { %5766 = vmatpush1.bf16.msra.mxu0 %v8783_v1  ;;  %6340 = vmatpush1.bf16.msra.mxu1 %v8786_v2 }
 0x20c   :  { %5767 = vmatprep.subr.bf16.mxu0 %v8791_v3  ;;  %6341 = vmatprep.subr.bf16.mxu1 %v8794_v4 }
 0x20f   :  { %5768 = vmatpush1.bf16.msra.mxu0 %v8789_v5  ;;  %6342 = vmatpush1.bf16.msra.mxu1 %v8792_v6 }
 0x210   :  { %5769 = vmatprep.subr.bf16.mxu0 %v8797_v7  ;;  %6343 = vmatprep.subr.bf16.mxu1 %v8800_v8 }
 0x211   :  { %10 = vsyncpa [#allocation3], 0  ;;  %v8801_v52 = vld [vmem:[%s12253_s1 + $0x10a0] ss:$16 sps:$4 sm:$0xff]   ;;  %v8804_v15 = vld [vmem:[%s12253_s1 + $0x10a8] ss:$16 sps:$4 sm:$0xff]   ;;  %v11230_v62 = vrot.slane %v11013_v51, %v9526_v49  ;;  %v1061_v2 = vcombine.high %v11044_v60, %v11044_v60 }
 0x212   :  { %v8809_v16 = vld [vmem:[%s12253_s1 + $0x10c4] ss:$16 sps:$4 sm:$0xff]   ;;  %v8812_v17 = vld [vmem:[%s12253_s1 + $0x10cc] ss:$16 sps:$4 sm:$0xff]   ;;  %v8807_v18 = vld [vmem:[%s12253_s1 + $0x10c0] ss:$16 sps:$4 sm:$0xff]  }
 0x213   :  { %5770 = vmatpush1.bf16.msra.mxu0 %v8795_v9  ;;  %6344 = vmatpush1.bf16.msra.mxu1 %v8798_v10  ;;  %v8810_v19 = vld [vmem:[%s12253_s1 + $0x10c8] ss:$16 sps:$4 sm:$0xff]   ;;  %v8815_v20 = vld [vmem:[%s12253_s1 + $0x10e4] ss:$16 sps:$4 sm:$0xff]   ;;  %v8818_v22 = vld [vmem:[%s12253_s1 + $0x10ec] ss:$16 sps:$4 sm:$0xff]  }
 0x214   :  { %5771 = vmatprep.subr.bf16.mxu0 %v8803_v11  ;;  %6345 = vmatprep.subr.bf16.mxu1 %v8806_v12  ;;  %v8813_v23 = vld [vmem:[%s12253_s1 + $0x10e0] ss:$16 sps:$4 sm:$0xff]   ;;  %v8816_v24 = vld [vmem:[%s12253_s1 + $0x10e8] ss:$16 sps:$4 sm:$0xff]   ;;  %v8821_v13 = vld [vmem:[%s12253_s1 + $0x1104] ss:$16 sps:$4 sm:$0xff]  }
 0x215   :  { %v8824_v27 = vld [vmem:[%s12253_s1 + $0x110c] ss:$16 sps:$4 sm:$0xff]   ;;  %v8819_v28 = vld [vmem:[%s12253_s1 + $0x1100] ss:$16 sps:$4 sm:$0xff]   ;;  %v8822_v29 = vld [vmem:[%s12253_s1 + $0x1108] ss:$16 sps:$4 sm:$0xff]  }
 0x216   :  { %v8827_v14 = vld [vmem:[%s12253_s1 + $0x1124] ss:$16 sps:$4 sm:$0xff]   ;;  %v8830_v30 = vld [vmem:[%s12253_s1 + $0x112c] ss:$16 sps:$4 sm:$0xff]   ;;  %v8825_v31 = vld [vmem:[%s12253_s1 + $0x1120] ss:$16 sps:$4 sm:$0xff]  }
 0x217   :  { %5772 = vmatpush1.bf16.msra.mxu0 %v8801_v52  ;;  %6346 = vmatpush1.bf16.msra.mxu1 %v8804_v15  ;;  %v8828_v25 = vld [vmem:[%s12253_s1 + $0x1128] ss:$16 sps:$4 sm:$0xff]   ;;  %v8833_v32 = vld [vmem:[%s12253_s1 + $0x1144] ss:$16 sps:$4 sm:$0xff]   ;;  %v8836_v33 = vld [vmem:[%s12253_s1 + $0x114c] ss:$16 sps:$4 sm:$0xff]  }
 0x218   :  { %5773 = vmatprep.subr.bf16.mxu0 %v8809_v16  ;;  %6347 = vmatprep.subr.bf16.mxu1 %v8812_v17  ;;  %v8831_v26 = vld [vmem:[%s12253_s1 + $0x1140] ss:$16 sps:$4 sm:$0xff]   ;;  %v8834_v36 = vld [vmem:[%s12253_s1 + $0x1148] ss:$16 sps:$4 sm:$0xff]   ;;  %v8839_v37 = vld [vmem:[%s12253_s1 + $0x1164] ss:$16 sps:$4 sm:$0xff]  }
 0x219   :  { %v8842_v21 = vld [vmem:[%s12253_s1 + $0x116c] ss:$16 sps:$4 sm:$0xff]   ;;  %v8837_v39 = vld [vmem:[%s12253_s1 + $0x1160] ss:$16 sps:$4 sm:$0xff]   ;;  %v8840_v40 = vld [vmem:[%s12253_s1 + $0x1168] ss:$16 sps:$4 sm:$0xff]  }
 0x21a   :  { %v8845_v41 = vld [vmem:[%s12253_s1 + $0x1184] ss:$16 sps:$4 sm:$0xff]   ;;  %v8848_v34 = vld [vmem:[%s12253_s1 + $0x118c] ss:$16 sps:$4 sm:$0xff]   ;;  %v8843_v43 = vld [vmem:[%s12253_s1 + $0x1180] ss:$16 sps:$4 sm:$0xff]  }
 0x21b   :  { %5774 = vmatpush1.bf16.msra.mxu0 %v8807_v18  ;;  %6348 = vmatpush1.bf16.msra.mxu1 %v8810_v19  ;;  %v8846_v45 = vld [vmem:[%s12253_s1 + $0x1188] ss:$16 sps:$4 sm:$0xff]   ;;  %v8851_v46 = vld [vmem:[%s12253_s1 + $0x11a4] ss:$16 sps:$4 sm:$0xff]   ;;  %v8854_v35 = vld [vmem:[%s12253_s1 + $0x11ac] ss:$16 sps:$4 sm:$0xff]  }
 0x21c   :  { %5775 = vmatprep.subr.bf16.mxu0 %v8815_v20  ;;  %6349 = vmatprep.subr.bf16.mxu1 %v8818_v22  ;;  %v8849_v50 = vld [vmem:[%s12253_s1 + $0x11a0] ss:$16 sps:$4 sm:$0xff]   ;;  %v8852_v53 = vld [vmem:[%s12253_s1 + $0x11a8] ss:$16 sps:$4 sm:$0xff]   ;;  %v8857_v38 = vld [vmem:[%s12253_s1 + $0x11c4] ss:$16 sps:$4 sm:$0xff]  }
 0x21d   :  { %v8860_v54 = vld [vmem:[%s12253_s1 + $0x11cc] ss:$16 sps:$4 sm:$0xff]   ;;  %v8855_v55 = vld [vmem:[%s12253_s1 + $0x11c0] ss:$16 sps:$4 sm:$0xff]   ;;  %v8858_v56 = vld [vmem:[%s12253_s1 + $0x11c8] ss:$16 sps:$4 sm:$0xff]  }
 0x21e   :  { %v8863_v47 = vld [vmem:[%s12253_s1 + $0x11e4] ss:$16 sps:$4 sm:$0xff]   ;;  %v8866_v57 = vld [vmem:[%s12253_s1 + $0x11ec] ss:$16 sps:$4 sm:$0xff]   ;;  %v8861_v58 = vld [vmem:[%s12253_s1 + $0x11e0] ss:$16 sps:$4 sm:$0xff]  }
 0x21f   :  { %5776 = vmatpush1.bf16.msra.mxu0 %v8813_v23  ;;  %6350 = vmatpush1.bf16.msra.mxu1 %v8816_v24  ;;  %v8864_v59 = vld [vmem:[%s12253_s1 + $0x11e8] ss:$16 sps:$4 sm:$0xff]   ;;  %v8869_v48 = vld [vmem:[%s12253_s1 + $0x1204] ss:$16 sps:$4 sm:$0xff]   ;;  %v8872_v61 = vld [vmem:[%s12253_s1 + $0x120c] ss:$16 sps:$4 sm:$0xff]  }
 0x220   :  { %5777 = vmatprep.subr.bf16.mxu0 %v8821_v13  ;;  %6351 = vmatprep.subr.bf16.mxu1 %v8824_v27  ;;  %v8867_v63 = vld [vmem:[%s12253_s1 + $0x1200] ss:$16 sps:$4 sm:$0xff]   ;;  %v8870_v0 = vld [vmem:[%s12253_s1 + $0x1208] ss:$16 sps:$4 sm:$0xff]   ;;  %v8875_v1 = vld [vmem:[%s12253_s1 + $0x1224] ss:$16 sps:$4 sm:$0xff]  }
 0x221   :  { %v8878_v51 = vld [vmem:[%s12253_s1 + $0x122c] ss:$16 sps:$4 sm:$0xff]   ;;  %v8873_v3 = vld [vmem:[%s12253_s1 + $0x1220] ss:$16 sps:$4 sm:$0xff]   ;;  %v8876_v4 = vld [vmem:[%s12253_s1 + $0x1228] ss:$16 sps:$4 sm:$0xff]  }
 0x222   :  { %v8881_v60 = vld [vmem:[%s12253_s1 + $0x1244] ss:$16 sps:$4 sm:$0xff]   ;;  %v8884_v5 = vld [vmem:[%s12253_s1 + $0x124c] ss:$16 sps:$4 sm:$0xff]   ;;  %v8879_v6 = vld [vmem:[%s12253_s1 + $0x1240] ss:$16 sps:$4 sm:$0xff]  }
 0x223   :  { %5778 = vmatpush1.bf16.msra.mxu0 %v8819_v28  ;;  %6352 = vmatpush1.bf16.msra.mxu1 %v8822_v29  ;;  %v8882_v7 = vld [vmem:[%s12253_s1 + $0x1248] ss:$16 sps:$4 sm:$0xff]   ;;  %v8887_v8 = vld [vmem:[%s12253_s1 + $0x1264] ss:$16 sps:$4 sm:$0xff]   ;;  %v8890_v9 = vld [vmem:[%s12253_s1 + $0x126c] ss:$16 sps:$4 sm:$0xff]  }
 0x224   :  { %5779 = vmatprep.subr.bf16.mxu0 %v8827_v14  ;;  %6353 = vmatprep.subr.bf16.mxu1 %v8830_v30  ;;  %v8885_v10 = vld [vmem:[%s12253_s1 + $0x1260] ss:$16 sps:$4 sm:$0xff]   ;;  %v8888_v11 = vld [vmem:[%s12253_s1 + $0x1268] ss:$16 sps:$4 sm:$0xff]   ;;  %v8893_v12 = vld [vmem:[%s12253_s1 + $0x1284] ss:$16 sps:$4 sm:$0xff]  }
 0x225   :  { %v8896_v52 = vld [vmem:[%s12253_s1 + $0x128c] ss:$16 sps:$4 sm:$0xff]   ;;  %v8891_v15 = vld [vmem:[%s12253_s1 + $0x1280] ss:$16 sps:$4 sm:$0xff]   ;;  %v8894_v16 = vld [vmem:[%s12253_s1 + $0x1288] ss:$16 sps:$4 sm:$0xff]  }
 0x226   :  { %v8899_v17 = vld [vmem:[%s12253_s1 + $0x12a4] ss:$16 sps:$4 sm:$0xff]   ;;  %v8902_v18 = vld [vmem:[%s12253_s1 + $0x12ac] ss:$16 sps:$4 sm:$0xff]   ;;  %v8897_v19 = vld [vmem:[%s12253_s1 + $0x12a0] ss:$16 sps:$4 sm:$0xff]  }
 0x227   :  { %5780 = vmatpush1.bf16.msra.mxu0 %v8825_v31  ;;  %6354 = vmatpush1.bf16.msra.mxu1 %v8828_v25  ;;  %v8900_v20 = vld [vmem:[%s12253_s1 + $0x12a8] ss:$16 sps:$4 sm:$0xff]   ;;  %v8905_v22 = vld [vmem:[%s12253_s1 + $0x12c4] ss:$16 sps:$4 sm:$0xff]   ;;  %v8908_v23 = vld [vmem:[%s12253_s1 + $0x12cc] ss:$16 sps:$4 sm:$0xff]  }
 0x228   :  { %5781 = vmatprep.subr.bf16.mxu0 %v8833_v32  ;;  %6355 = vmatprep.subr.bf16.mxu1 %v8836_v33  ;;  %v8903_v24 = vld [vmem:[%s12253_s1 + $0x12c0] ss:$16 sps:$4 sm:$0xff]   ;;  %v8906_v13 = vld [vmem:[%s12253_s1 + $0x12c8] ss:$16 sps:$4 sm:$0xff]   ;;  %v8911_v27 = vld [vmem:[%s12253_s1 + $0x12e4] ss:$16 sps:$4 sm:$0xff]  }
 0x229   :  { %v8914_v28 = vld [vmem:[%s12253_s1 + $0x12ec] ss:$16 sps:$4 sm:$0xff]   ;;  %v8909_v29 = vld [vmem:[%s12253_s1 + $0x12e0] ss:$16 sps:$4 sm:$0xff]   ;;  %v8912_v14 = vld [vmem:[%s12253_s1 + $0x12e8] ss:$16 sps:$4 sm:$0xff]  }
 0x22a   :  { %v8917_v30 = vld [vmem:[%s12253_s1 + $0x1304] ss:$16 sps:$4 sm:$0xff]   ;;  %v8920_v31 = vld [vmem:[%s12253_s1 + $0x130c] ss:$16 sps:$4 sm:$0xff]   ;;  %v8915_v25 = vld [vmem:[%s12253_s1 + $0x1300] ss:$16 sps:$4 sm:$0xff]  }
 0x22b   :  { %5782 = vmatpush1.bf16.msra.mxu0 %v8831_v26  ;;  %6356 = vmatpush1.bf16.msra.mxu1 %v8834_v36  ;;  %v8918_v32 = vld [vmem:[%s12253_s1 + $0x1308] ss:$16 sps:$4 sm:$0xff]   ;;  %v8923_v33 = vld [vmem:[%s12253_s1 + $0x1324] ss:$16 sps:$4 sm:$0xff]   ;;  %v8926_v26 = vld [vmem:[%s12253_s1 + $0x132c] ss:$16 sps:$4 sm:$0xff]  }
 0x22c   :  { %5783 = vmatprep.subr.bf16.mxu0 %v8839_v37  ;;  %6357 = vmatprep.subr.bf16.mxu1 %v8842_v21  ;;  %v8921_v36 = vld [vmem:[%s12253_s1 + $0x1320] ss:$16 sps:$4 sm:$0xff]   ;;  %v8924_v37 = vld [vmem:[%s12253_s1 + $0x1328] ss:$16 sps:$4 sm:$0xff]   ;;  %v8929_v21 = vld [vmem:[%s12253_s1 + $0x1344] ss:$16 sps:$4 sm:$0xff]  }
 0x22d   :  { %s9360_s9 = smov [#allocation2]   ;;  %vm6932_vm0 = vcmask 41984  }
 0x22e   :  { %s6940_s10 = sshll.u32 %s9360_s9, 4  ;;  %s6941_s10 = int_to_ptr.vmem [resolvable:$true] %s6940_s10 }
 0x22f   :  { %5784 = vmatpush1.bf16.msra.mxu0 %v8837_v39  ;;  %6358 = vmatpush1.bf16.msra.mxu1 %v8840_v40  ;;  %v8932_v39 = vld [vmem:[%s12253_s1 + $0x134c] ss:$16 sps:$4 sm:$0xff]   ;;  %v8927_v40 = vld [vmem:[%s12253_s1 + $0x1340] ss:$16 sps:$4 sm:$0xff]   ;;  %s9334_s11 = scalar_lea.vmem %s6941_s10, 32  ;;  %p9339_p1 = scmp.lt.s32.totalorder %s6941_s10, %s6941_s10 }
 0x230   :  { %5785 = vmatprep.subr.bf16.mxu0 %v8845_v41  ;;  %6359 = vmatprep.subr.bf16.mxu1 %v8848_v34  ;;  %v8930_v41 = vld [vmem:[%s12253_s1 + $0x1348] ss:$16 sps:$4 sm:$0xff]   ;;  %v8935_v34 = vld [vmem:[%s12253_s1 + $0x1364] ss:$16 sps:$4 sm:$0xff]   ;;  %p9335_p0 = scmp.ne.s32.totalorder %s6941_s10, %s9334_s11  ;;  %p9340_p2 = scmp.lt.s32.totalorder %s9334_s11, %s9334_s11 }
 0x232   :  { %p9341_p3 = por %p9340_p2, %p9339_p1 }
 0x233   :  { %5786 = vmatpush1.bf16.msra.mxu0 %v8843_v43  ;;  %6360 = vmatpush1.bf16.msra.mxu1 %v8846_v45  ;;  %v8938_v43 = vld [vmem:[%s12253_s1 + $0x136c] ss:$16 sps:$4 sm:$0xff]   ;;  %v8933_v45 = vld [vmem:[%s12253_s1 + $0x1360] ss:$16 sps:$4 sm:$0xff]  }
 0x234   :  { %5787 = vmatprep.subr.bf16.mxu0 %v8851_v46  ;;  %6361 = vmatprep.subr.bf16.mxu1 %v8854_v35  ;;  %v8936_v46 = vld [vmem:[%s12253_s1 + $0x1368] ss:$16 sps:$4 sm:$0xff]   ;;  %v8941_v35 = vld [vmem:[%s12253_s1 + $0x1384] ss:$16 sps:$4 sm:$0xff]   ;;  %p9342_p4 = pnand %p9341_p3, %p9335_p0 }
 0x237   :  { %5788 = vmatpush1.bf16.msra.mxu0 %v8849_v50  ;;  %6362 = vmatpush1.bf16.msra.mxu1 %v8852_v53  ;;  %v8944_v50 = vld [vmem:[%s12253_s1 + $0x138c] ss:$16 sps:$4 sm:$0xff]   ;;  %v8939_v53 = vld [vmem:[%s12253_s1 + $0x1380] ss:$16 sps:$4 sm:$0xff]  }
 0x238   :  { %5789 = vmatprep.subr.bf16.mxu0 %v8857_v38  ;;  %6363 = vmatprep.subr.bf16.mxu1 %v8860_v54  ;;  %v8942_v38 = vld [vmem:[%s12253_s1 + $0x1388] ss:$16 sps:$4 sm:$0xff]   ;;  %v8947_v54 = vld [vmem:[%s12253_s1 + $0x13a4] ss:$16 sps:$4 sm:$0xff]  }
 0x23b   :  { %5790 = vmatpush1.bf16.msra.mxu0 %v8855_v55  ;;  %6364 = vmatpush1.bf16.msra.mxu1 %v8858_v56  ;;  %v8950_v55 = vld [vmem:[%s12253_s1 + $0x13ac] ss:$16 sps:$4 sm:$0xff]   ;;  %v8945_v56 = vld [vmem:[%s12253_s1 + $0x13a0] ss:$16 sps:$4 sm:$0xff]  }
 0x23c   :  { %5791 = vmatprep.subr.bf16.mxu0 %v8863_v47  ;;  %6365 = vmatprep.subr.bf16.mxu1 %v8866_v57  ;;  %v8948_v47 = vld [vmem:[%s12253_s1 + $0x13a8] ss:$16 sps:$4 sm:$0xff]   ;;  %v8953_v57 = vld [vmem:[%s12253_s1 + $0x13c4] ss:$16 sps:$4 sm:$0xff]  }
 0x23f   :  { %5792 = vmatpush1.bf16.msra.mxu0 %v8861_v58  ;;  %6366 = vmatpush1.bf16.msra.mxu1 %v8864_v59  ;;  %v8956_v58 = vld [vmem:[%s12253_s1 + $0x13cc] ss:$16 sps:$4 sm:$0xff]   ;;  %v1014_v59 = vcombine.high %v10997_v44, %v10997_v44 }
 0x240   :  { %5802 = vmatprep.subr.bf16.mxu0 %v8869_v48  ;;  %6376 = vmatprep.subr.bf16.mxu1 %v8872_v61  ;;  %v8951_v48 = vld [vmem:[%s12253_s1 + $0x13c0] ss:$16 sps:$4 sm:$0xff]   ;;  %v8954_v61 = vld [vmem:[%s12253_s1 + $0x13c8] ss:$16 sps:$4 sm:$0xff]   ;;  %v8962_v44 = vld [vmem:[%s12253_s1 + $0x13ec] ss:$16 sps:$4 sm:$0xff]  }
 0x242   :  { %5794 = vmatmul.mubr.bf16.vlgmr.msra.gmra.mrb[0].mxu0 %v11230_v62  ;;  %6368 = vmatmul.mubr.bf16.vlgmr.msra.gmra.mrb[0].mxu1 %v11230_v62 }
 0x243   :  { %5803 = vmatpush1.bf16.msra.mxu0 %v8867_v63  ;;  %6377 = vmatpush1.bf16.msra.mxu1 %v8870_v0  ;;  %v8959_v63 = vld [vmem:[%s12253_s1 + $0x13e4] ss:$16 sps:$4 sm:$0xff]   ;;  %v11419_v0 = vrot.slane %v1014_v59, %v9526_v49  ;;  %v9038_v59 = vld [vmem:[%s12253_s1 + $0x1588] ss:$16 sps:$4 sm:$0xff]  }
 0x244   :  { %5804 = vmatprep.subr.bf16.mxu0 %v8875_v1  ;;  %6378 = vmatprep.subr.bf16.mxu1 %v8878_v51  ;;  %v8957_v1 = vld [vmem:[%s12253_s1 + $0x13e0] ss:$16 sps:$4 sm:$0xff]   ;;  %v8960_v51 = vld [vmem:[%s12253_s1 + $0x13e8] ss:$16 sps:$4 sm:$0xff]  }
 0x245   :  { %5834 = vmatprep.mubr.bf16.mxu0 %v1061_v2  ;;  %6408 = vmatprep.mubr.bf16.mxu1 %v1061_v2  ;;  %v8965_v2 = vld [vmem:[%s12253_s1 + $0x1404] ss:$16 sps:$4 sm:$0xff]  }
 0x247   :  { %5805 = vmatpush1.bf16.msra.mxu0 %v8873_v3  ;;  %6379 = vmatpush1.bf16.msra.mxu1 %v8876_v4  ;;  %v8968_v3 = vld [vmem:[%s12253_s1 + $0x140c] ss:$16 sps:$4 sm:$0xff]   ;;  %v1030_v4 = vcombine.high %v11419_v0, %v11419_v0 }
 0x248   :  { %5806 = vmatprep.subr.bf16.mxu0 %v8881_v60  ;;  %6380 = vmatprep.subr.bf16.mxu1 %v8884_v5  ;;  %v1059_v60 = vcombine.high %v11230_v62, %v11230_v62  ;;  %v8963_v5 = vld [vmem:[%s12253_s1 + $0x1400] ss:$16 sps:$4 sm:$0xff]   ;;  %v8974_v62 = vld [vmem:[%s12253_s1 + $0x142c] ss:$16 sps:$4 sm:$0xff]  }
 0x24b   :  { %5807 = vmatpush1.bf16.msra.mxu0 %v8879_v6  ;;  %6381 = vmatpush1.bf16.msra.mxu1 %v8882_v7  ;;  %v8966_v6 = vld [vmem:[%s12253_s1 + $0x1408] ss:$16 sps:$4 sm:$0xff]   ;;  %v8971_v7 = vld [vmem:[%s12253_s1 + $0x1424] ss:$16 sps:$4 sm:$0xff]  }
 0x24c   :  { %5808 = vmatprep.subr.bf16.mxu0 %v8887_v8  ;;  %6382 = vmatprep.subr.bf16.mxu1 %v8890_v9  ;;  %v11450_v8 = vrot.slane %v1030_v4, %v9526_v49  ;;  %v8969_v9 = vld [vmem:[%s12253_s1 + $0x1420] ss:$16 sps:$4 sm:$0xff]   ;;  %v9055_v4 = vld [vmem:[%s12253_s1 + $0x15e4] ss:$16 sps:$4 sm:$0xff]  }
 0x24f   :  { %5809 = vmatpush1.bf16.msra.mxu0 %v8885_v10  ;;  %6383 = vmatpush1.bf16.msra.mxu1 %v8888_v11  ;;  %v8972_v10 = vld [vmem:[%s12253_s1 + $0x1428] ss:$16 sps:$4 sm:$0xff]   ;;  %v8977_v11 = vld [vmem:[%s12253_s1 + $0x1444] ss:$16 sps:$4 sm:$0xff]  }
 0x250   :  { %5810 = vmatprep.subr.bf16.mxu0 %v8893_v12  ;;  %6384 = vmatprep.subr.bf16.mxu1 %v8896_v52  ;;  %v8980_v12 = vld [vmem:[%s12253_s1 + $0x144c] ss:$16 sps:$4 sm:$0xff]   ;;  %v8975_v52 = vld [vmem:[%s12253_s1 + $0x1440] ss:$16 sps:$4 sm:$0xff]  }
 0x253   :  { %5811 = vmatpush1.bf16.msra.mxu0 %v8891_v15  ;;  %6385 = vmatpush1.bf16.msra.mxu1 %v8894_v16  ;;  %v8978_v15 = vld [vmem:[%s12253_s1 + $0x1448] ss:$16 sps:$4 sm:$0xff]   ;;  %v8983_v16 = vld [vmem:[%s12253_s1 + $0x1464] ss:$16 sps:$4 sm:$0xff]  }
 0x254   :  { %5812 = vmatprep.subr.bf16.mxu0 %v8899_v17  ;;  %6386 = vmatprep.subr.bf16.mxu1 %v8902_v18  ;;  %v8986_v17 = vld [vmem:[%s12253_s1 + $0x146c] ss:$16 sps:$4 sm:$0xff]   ;;  %v8981_v18 = vld [vmem:[%s12253_s1 + $0x1460] ss:$16 sps:$4 sm:$0xff]  }
 0x257   :  { %5813 = vmatpush1.bf16.msra.mxu0 %v8897_v19  ;;  %6387 = vmatpush1.bf16.msra.mxu1 %v8900_v20  ;;  %v8984_v19 = vld [vmem:[%s12253_s1 + $0x1468] ss:$16 sps:$4 sm:$0xff]   ;;  %v8989_v20 = vld [vmem:[%s12253_s1 + $0x1484] ss:$16 sps:$4 sm:$0xff]  }
 0x258   :  { %5814 = vmatprep.subr.bf16.mxu0 %v8905_v22  ;;  %6388 = vmatprep.subr.bf16.mxu1 %v8908_v23  ;;  %v8992_v22 = vld [vmem:[%s12253_s1 + $0x148c] ss:$16 sps:$4 sm:$0xff]   ;;  %v8987_v23 = vld [vmem:[%s12253_s1 + $0x1480] ss:$16 sps:$4 sm:$0xff]  }
 0x25b   :  { %5815 = vmatpush1.bf16.msra.mxu0 %v8903_v24  ;;  %6389 = vmatpush1.bf16.msra.mxu1 %v8906_v13  ;;  %v8990_v24 = vld [vmem:[%s12253_s1 + $0x1488] ss:$16 sps:$4 sm:$0xff]   ;;  %v8995_v13 = vld [vmem:[%s12253_s1 + $0x14a4] ss:$16 sps:$4 sm:$0xff]  }
 0x25c   :  { %5816 = vmatprep.subr.bf16.mxu0 %v8911_v27  ;;  %6390 = vmatprep.subr.bf16.mxu1 %v8914_v28  ;;  %v8998_v27 = vld [vmem:[%s12253_s1 + $0x14ac] ss:$16 sps:$4 sm:$0xff]   ;;  %v8993_v28 = vld [vmem:[%s12253_s1 + $0x14a0] ss:$16 sps:$4 sm:$0xff]  }
 0x25f   :  { %5817 = vmatpush1.bf16.msra.mxu0 %v8909_v29  ;;  %6391 = vmatpush1.bf16.msra.mxu1 %v8912_v14  ;;  %v8996_v29 = vld [vmem:[%s12253_s1 + $0x14a8] ss:$16 sps:$4 sm:$0xff]   ;;  %v9001_v14 = vld [vmem:[%s12253_s1 + $0x14c4] ss:$16 sps:$4 sm:$0xff]  }
 0x260   :  { %5818 = vmatprep.subr.bf16.mxu0 %v8917_v30  ;;  %6392 = vmatprep.subr.bf16.mxu1 %v8920_v31  ;;  %v9004_v30 = vld [vmem:[%s12253_s1 + $0x14cc] ss:$16 sps:$4 sm:$0xff]   ;;  %v8999_v31 = vld [vmem:[%s12253_s1 + $0x14c0] ss:$16 sps:$4 sm:$0xff]  }
 0x263   :  { %5819 = vmatpush1.bf16.msra.mxu0 %v8915_v25  ;;  %6393 = vmatpush1.bf16.msra.mxu1 %v8918_v32  ;;  %v9002_v25 = vld [vmem:[%s12253_s1 + $0x14c8] ss:$16 sps:$4 sm:$0xff]   ;;  %v9007_v32 = vld [vmem:[%s12253_s1 + $0x14e4] ss:$16 sps:$4 sm:$0xff]  }
 0x264   :  { %5820 = vmatprep.subr.bf16.mxu0 %v8923_v33  ;;  %6394 = vmatprep.subr.bf16.mxu1 %v8926_v26  ;;  %v9010_v33 = vld [vmem:[%s12253_s1 + $0x14ec] ss:$16 sps:$4 sm:$0xff]   ;;  %v9005_v26 = vld [vmem:[%s12253_s1 + $0x14e0] ss:$16 sps:$4 sm:$0xff]  }
 0x267   :  { %5821 = vmatpush1.bf16.msra.mxu0 %v8921_v36  ;;  %6395 = vmatpush1.bf16.msra.mxu1 %v8924_v37  ;;  %v9008_v36 = vld [vmem:[%s12253_s1 + $0x14e8] ss:$16 sps:$4 sm:$0xff]   ;;  %v9013_v37 = vld [vmem:[%s12253_s1 + $0x1504] ss:$16 sps:$4 sm:$0xff]  }
 0x268   :  { %5822 = vmatprep.subr.bf16.mxu0 %v8929_v21  ;;  %6396 = vmatprep.subr.bf16.mxu1 %v8932_v39  ;;  %v9016_v21 = vld [vmem:[%s12253_s1 + $0x150c] ss:$16 sps:$4 sm:$0xff]   ;;  %v9011_v39 = vld [vmem:[%s12253_s1 + $0x1500] ss:$16 sps:$4 sm:$0xff]  }
 0x26b   :  { %5823 = vmatpush1.bf16.msra.mxu0 %v8927_v40  ;;  %6397 = vmatpush1.bf16.msra.mxu1 %v8930_v41  ;;  %v9014_v40 = vld [vmem:[%s12253_s1 + $0x1508] ss:$16 sps:$4 sm:$0xff]   ;;  %v9019_v41 = vld [vmem:[%s12253_s1 + $0x1524] ss:$16 sps:$4 sm:$0xff]  }
 0x26c   :  { %5824 = vmatprep.subr.bf16.mxu0 %v8935_v34  ;;  %6398 = vmatprep.subr.bf16.mxu1 %v8938_v43  ;;  %v9022_v34 = vld [vmem:[%s12253_s1 + $0x152c] ss:$16 sps:$4 sm:$0xff]   ;;  %v9017_v43 = vld [vmem:[%s12253_s1 + $0x1520] ss:$16 sps:$4 sm:$0xff]  }
 0x26f   :  { %5825 = vmatpush1.bf16.msra.mxu0 %v8933_v45  ;;  %6399 = vmatpush1.bf16.msra.mxu1 %v8936_v46  ;;  %v9020_v45 = vld [vmem:[%s12253_s1 + $0x1528] ss:$16 sps:$4 sm:$0xff]   ;;  %v9025_v46 = vld [vmem:[%s12253_s1 + $0x1544] ss:$16 sps:$4 sm:$0xff]  }
 0x270   :  { %5826 = vmatprep.subr.bf16.mxu0 %v8941_v35  ;;  %6400 = vmatprep.subr.bf16.mxu1 %v8944_v50  ;;  %v9028_v35 = vld [vmem:[%s12253_s1 + $0x154c] ss:$16 sps:$4 sm:$0xff]   ;;  %v9023_v50 = vld [vmem:[%s12253_s1 + $0x1540] ss:$16 sps:$4 sm:$0xff]  }
 0x273   :  { %5827 = vmatpush1.bf16.msra.mxu0 %v8939_v53  ;;  %6401 = vmatpush1.bf16.msra.mxu1 %v8942_v38  ;;  %v9026_v53 = vld [vmem:[%s12253_s1 + $0x1548] ss:$16 sps:$4 sm:$0xff]   ;;  %v9031_v38 = vld [vmem:[%s12253_s1 + $0x1564] ss:$16 sps:$4 sm:$0xff]  }
 0x274   :  { %5828 = vmatprep.subr.bf16.mxu0 %v8947_v54  ;;  %6402 = vmatprep.subr.bf16.mxu1 %v8950_v55  ;;  %v9034_v54 = vld [vmem:[%s12253_s1 + $0x156c] ss:$16 sps:$4 sm:$0xff]   ;;  %v9029_v55 = vld [vmem:[%s12253_s1 + $0x1560] ss:$16 sps:$4 sm:$0xff]  }
 0x277   :  { %5829 = vmatpush1.bf16.msra.mxu0 %v8945_v56  ;;  %6403 = vmatpush1.bf16.msra.mxu1 %v8948_v47  ;;  %v9032_v56 = vld [vmem:[%s12253_s1 + $0x1568] ss:$16 sps:$4 sm:$0xff]   ;;  %v9037_v47 = vld [vmem:[%s12253_s1 + $0x1584] ss:$16 sps:$4 sm:$0xff]  }
 0x278   :  { %5830 = vmatprep.subr.bf16.mxu0 %v8953_v57  ;;  %6404 = vmatprep.subr.bf16.mxu1 %v8956_v58  ;;  %v9040_v57 = vld [vmem:[%s12253_s1 + $0x158c] ss:$16 sps:$4 sm:$0xff]   ;;  %v9035_v58 = vld [vmem:[%s12253_s1 + $0x1580] ss:$16 sps:$4 sm:$0xff]  }
 0x27b   :  { %5831 = vmatpush1.bf16.msra.mxu0 %v8951_v48  ;;  %6405 = vmatpush1.bf16.msra.mxu1 %v8954_v61  ;;  %v9043_v48 = vld [vmem:[%s12253_s1 + $0x15a4] ss:$16 sps:$4 sm:$0xff]   ;;  %v9046_v61 = vld [vmem:[%s12253_s1 + $0x15ac] ss:$16 sps:$4 sm:$0xff]  }
 0x27c   :  { %5832 = vmatprep.subr.bf16.mxu0 %v8959_v63  ;;  %6406 = vmatprep.subr.bf16.mxu1 %v8962_v44  ;;  %v9041_v63 = vld [vmem:[%s12253_s1 + $0x15a0] ss:$16 sps:$4 sm:$0xff]   ;;  %v9044_v44 = vld [vmem:[%s12253_s1 + $0x15a8] ss:$16 sps:$4 sm:$0xff]  }
 0x27f   :  { %5833 = vmatpush1.bf16.msra.mxu0 %v8957_v1  ;;  %6407 = vmatpush1.bf16.msra.mxu1 %v8960_v51  ;;  %v9049_v1 = vld [vmem:[%s12253_s1 + $0x15c4] ss:$16 sps:$4 sm:$0xff]   ;;  %v9052_v51 = vld [vmem:[%s12253_s1 + $0x15cc] ss:$16 sps:$4 sm:$0xff]  }
 0x280   :  { %5843 = vmatprep.subr.bf16.mxu0 %v8965_v2  ;;  %6417 = vmatprep.subr.bf16.mxu1 %v8968_v3  ;;  %v9047_v2 = vld [vmem:[%s12253_s1 + $0x15c0] ss:$16 sps:$4 sm:$0xff]   ;;  %v9050_v3 = vld [vmem:[%s12253_s1 + $0x15c8] ss:$16 sps:$4 sm:$0xff]  }
 0x282   :  { %5835 = vmatmul.mubr.bf16.vlgmr.msra.gmra.mrb[0].mxu0 %v1059_v60  ;;  %6409 = vmatmul.mubr.bf16.vlgmr.msra.gmra.mrb[0].mxu1 %v1059_v60  ;;  %v9058_v60 = vld [vmem:[%s12253_s1 + $0x15ec] ss:$16 sps:$4 sm:$0xff]  }
 0x283   :  { %5844 = vmatpush1.bf16.msra.mxu0 %v8963_v5  ;;  %6418 = vmatpush1.bf16.msra.mxu1 %v8966_v6  ;;  %v9053_v5 = vld [vmem:[%s12253_s1 + $0x15e0] ss:$16 sps:$4 sm:$0xff]   ;;  %v9056_v6 = vld [vmem:[%s12253_s1 + $0x15e8] ss:$16 sps:$4 sm:$0xff]  }
 0x284   :  { %5845 = vmatprep.subr.bf16.mxu0 %v8971_v7  ;;  %6419 = vmatprep.subr.bf16.mxu1 %v8974_v62  ;;  %v9062_v7 = vld [vmem:[%s12253_s1 + $0x1604] ss:$16 sps:$4 sm:$0xff]   ;;  %v9065_v62 = vld [vmem:[%s12253_s1 + $0x160c] ss:$16 sps:$4 sm:$0xff]  }
 0x285   :  { %5875 = vmatprep.mubr.bf16.mxu0 %v11450_v8  ;;  %6449 = vmatprep.mubr.bf16.mxu1 %v11450_v8 }
 0x287   :  { %5846 = vmatpush1.bf16.msra.mxu0 %v8969_v9  ;;  %6420 = vmatpush1.bf16.msra.mxu1 %v8972_v10  ;;  %v11636_v9 = vrot.slane %v11419_v0, %v9526_v49  ;;  %v9060_v10 = vld [vmem:[%s12253_s1 + $0x1600] ss:$16 sps:$4 sm:$0xff]   ;;  %v9071_v0 = vld [vmem:[%s12253_s1 + $0x162c] ss:$16 sps:$4 sm:$0xff]  }
 0x288   :  { %5847 = vmatprep.subr.bf16.mxu0 %v8977_v11  ;;  %6421 = vmatprep.subr.bf16.mxu1 %v8980_v12  ;;  %v9063_v11 = vld [vmem:[%s12253_s1 + $0x1608] ss:$16 sps:$4 sm:$0xff]   ;;  %v9068_v12 = vld [vmem:[%s12253_s1 + $0x1624] ss:$16 sps:$4 sm:$0xff]  }
 0x28b   :  { %5848 = vmatpush1.bf16.msra.mxu0 %v8975_v52  ;;  %6422 = vmatpush1.bf16.msra.mxu1 %v8978_v15  ;;  %v1062_v52 = vcombine.high %v11450_v8, %v11450_v8  ;;  %v9066_v15 = vld [vmem:[%s12253_s1 + $0x1620] ss:$16 sps:$4 sm:$0xff]   ;;  %v9074_v8 = vld [vmem:[%s12253_s1 + $0x1644] ss:$16 sps:$4 sm:$0xff]  }
 0x28c   :  { %5849 = vmatprep.subr.bf16.mxu0 %v8983_v16  ;;  %6423 = vmatprep.subr.bf16.mxu1 %v8986_v17  ;;  %v9069_v16 = vld [vmem:[%s12253_s1 + $0x1628] ss:$16 sps:$4 sm:$0xff]   ;;  %v9077_v17 = vld [vmem:[%s12253_s1 + $0x164c] ss:$16 sps:$4 sm:$0xff]  }
 0x28f   :  { %5850 = vmatpush1.bf16.msra.mxu0 %v8981_v18  ;;  %6424 = vmatpush1.bf16.msra.mxu1 %v8984_v19  ;;  %v9072_v18 = vld [vmem:[%s12253_s1 + $0x1640] ss:$16 sps:$4 sm:$0xff]   ;;  %v9075_v19 = vld [vmem:[%s12253_s1 + $0x1648] ss:$16 sps:$4 sm:$0xff]  }
 0x290   :  { %5851 = vmatprep.subr.bf16.mxu0 %v8989_v20  ;;  %6425 = vmatprep.subr.bf16.mxu1 %v8992_v22  ;;  %v9080_v20 = vld [vmem:[%s12253_s1 + $0x1664] ss:$16 sps:$4 sm:$0xff]   ;;  %v9083_v22 = vld [vmem:[%s12253_s1 + $0x166c] ss:$16 sps:$4 sm:$0xff]  }
 0x293   :  { %5852 = vmatpush1.bf16.msra.mxu0 %v8987_v23  ;;  %6426 = vmatpush1.bf16.msra.mxu1 %v8990_v24  ;;  %v9078_v23 = vld [vmem:[%s12253_s1 + $0x1660] ss:$16 sps:$4 sm:$0xff]   ;;  %v9081_v24 = vld [vmem:[%s12253_s1 + $0x1668] ss:$16 sps:$4 sm:$0xff]  }
 0x294   :  { %5853 = vmatprep.subr.bf16.mxu0 %v8995_v13  ;;  %6427 = vmatprep.subr.bf16.mxu1 %v8998_v27  ;;  %v9086_v13 = vld [vmem:[%s12253_s1 + $0x1684] ss:$16 sps:$4 sm:$0xff]   ;;  %v9089_v27 = vld [vmem:[%s12253_s1 + $0x168c] ss:$16 sps:$4 sm:$0xff]  }
 0x297   :  { %5854 = vmatpush1.bf16.msra.mxu0 %v8993_v28  ;;  %6428 = vmatpush1.bf16.msra.mxu1 %v8996_v29  ;;  %v9084_v28 = vld [vmem:[%s12253_s1 + $0x1680] ss:$16 sps:$4 sm:$0xff]   ;;  %v9087_v29 = vld [vmem:[%s12253_s1 + $0x1688] ss:$16 sps:$4 sm:$0xff]  }
 0x298   :  { %5855 = vmatprep.subr.bf16.mxu0 %v9001_v14  ;;  %6429 = vmatprep.subr.bf16.mxu1 %v9004_v30  ;;  %v9092_v14 = vld [vmem:[%s12253_s1 + $0x16a4] ss:$16 sps:$4 sm:$0xff]   ;;  %v9095_v30 = vld [vmem:[%s12253_s1 + $0x16ac] ss:$16 sps:$4 sm:$0xff]  }
 0x29b   :  { %5856 = vmatpush1.bf16.msra.mxu0 %v8999_v31  ;;  %6430 = vmatpush1.bf16.msra.mxu1 %v9002_v25  ;;  %v9090_v31 = vld [vmem:[%s12253_s1 + $0x16a0] ss:$16 sps:$4 sm:$0xff]   ;;  %v9093_v25 = vld [vmem:[%s12253_s1 + $0x16a8] ss:$16 sps:$4 sm:$0xff]  }
 0x29c   :  { %5857 = vmatprep.subr.bf16.mxu0 %v9007_v32  ;;  %6431 = vmatprep.subr.bf16.mxu1 %v9010_v33  ;;  %v9098_v32 = vld [vmem:[%s12253_s1 + $0x16c4] ss:$16 sps:$4 sm:$0xff]   ;;  %v9101_v33 = vld [vmem:[%s12253_s1 + $0x16cc] ss:$16 sps:$4 sm:$0xff]  }
 0x29f   :  { %5858 = vmatpush1.bf16.msra.mxu0 %v9005_v26  ;;  %6432 = vmatpush1.bf16.msra.mxu1 %v9008_v36  ;;  %v9096_v26 = vld [vmem:[%s12253_s1 + $0x16c0] ss:$16 sps:$4 sm:$0xff]   ;;  %v9099_v36 = vld [vmem:[%s12253_s1 + $0x16c8] ss:$16 sps:$4 sm:$0xff]  }
 0x2a0   :  { %5859 = vmatprep.subr.bf16.mxu0 %v9013_v37  ;;  %6433 = vmatprep.subr.bf16.mxu1 %v9016_v21  ;;  %v9104_v37 = vld [vmem:[%s12253_s1 + $0x16e4] ss:$16 sps:$4 sm:$0xff]   ;;  %v9107_v21 = vld [vmem:[%s12253_s1 + $0x16ec] ss:$16 sps:$4 sm:$0xff]  }
 0x2a3   :  { %5860 = vmatpush1.bf16.msra.mxu0 %v9011_v39  ;;  %6434 = vmatpush1.bf16.msra.mxu1 %v9014_v40  ;;  %v9102_v39 = vld [vmem:[%s12253_s1 + $0x16e0] ss:$16 sps:$4 sm:$0xff]   ;;  %v9105_v40 = vld [vmem:[%s12253_s1 + $0x16e8] ss:$16 sps:$4 sm:$0xff]  }
 0x2a4   :  { %5861 = vmatprep.subr.bf16.mxu0 %v9019_v41  ;;  %6435 = vmatprep.subr.bf16.mxu1 %v9022_v34  ;;  %v9110_v41 = vld [vmem:[%s12253_s1 + $0x1704] ss:$16 sps:$4 sm:$0xff]   ;;  %v9113_v34 = vld [vmem:[%s12253_s1 + $0x170c] ss:$16 sps:$4 sm:$0xff]  }
 0x2a7   :  { %5862 = vmatpush1.bf16.msra.mxu0 %v9017_v43  ;;  %6436 = vmatpush1.bf16.msra.mxu1 %v9020_v45  ;;  %v9108_v43 = vld [vmem:[%s12253_s1 + $0x1700] ss:$16 sps:$4 sm:$0xff]   ;;  %v9111_v45 = vld [vmem:[%s12253_s1 + $0x1708] ss:$16 sps:$4 sm:$0xff]  }
 0x2a8   :  { %5863 = vmatprep.subr.bf16.mxu0 %v9025_v46  ;;  %6437 = vmatprep.subr.bf16.mxu1 %v9028_v35  ;;  %v9116_v46 = vld [vmem:[%s12253_s1 + $0x1724] ss:$16 sps:$4 sm:$0xff]   ;;  %v9119_v35 = vld [vmem:[%s12253_s1 + $0x172c] ss:$16 sps:$4 sm:$0xff]  }
 0x2ab   :  { %5864 = vmatpush1.bf16.msra.mxu0 %v9023_v50  ;;  %6438 = vmatpush1.bf16.msra.mxu1 %v9026_v53  ;;  %v9114_v50 = vld [vmem:[%s12253_s1 + $0x1720] ss:$16 sps:$4 sm:$0xff]   ;;  %v9117_v53 = vld [vmem:[%s12253_s1 + $0x1728] ss:$16 sps:$4 sm:$0xff]  }
 0x2ac   :  { %5865 = vmatprep.subr.bf16.mxu0 %v9031_v38  ;;  %6439 = vmatprep.subr.bf16.mxu1 %v9034_v54  ;;  %v9122_v38 = vld [vmem:[%s12253_s1 + $0x1744] ss:$16 sps:$4 sm:$0xff]   ;;  %v9125_v54 = vld [vmem:[%s12253_s1 + $0x174c] ss:$16 sps:$4 sm:$0xff]  }
 0x2af   :  { %5866 = vmatpush1.bf16.msra.mxu0 %v9029_v55  ;;  %6440 = vmatpush1.bf16.msra.mxu1 %v9032_v56  ;;  %v9120_v55 = vld [vmem:[%s12253_s1 + $0x1740] ss:$16 sps:$4 sm:$0xff]   ;;  %v9123_v56 = vld [vmem:[%s12253_s1 + $0x1748] ss:$16 sps:$4 sm:$0xff]  }
 0x2b0   :  { %5867 = vmatprep.subr.bf16.mxu0 %v9037_v47  ;;  %6441 = vmatprep.subr.bf16.mxu1 %v9040_v57  ;;  %v9128_v47 = vld [vmem:[%s12253_s1 + $0x1764] ss:$16 sps:$4 sm:$0xff]   ;;  %v9131_v57 = vld [vmem:[%s12253_s1 + $0x176c] ss:$16 sps:$4 sm:$0xff]  }
 0x2b3   :  { %5868 = vmatpush1.bf16.msra.mxu0 %v9035_v58  ;;  %6442 = vmatpush1.bf16.msra.mxu1 %v9038_v59  ;;  %v9126_v58 = vld [vmem:[%s12253_s1 + $0x1760] ss:$16 sps:$4 sm:$0xff]   ;;  %v9129_v59 = vld [vmem:[%s12253_s1 + $0x1768] ss:$16 sps:$4 sm:$0xff]  }
 0x2b4   :  { %5869 = vmatprep.subr.bf16.mxu0 %v9043_v48  ;;  %6443 = vmatprep.subr.bf16.mxu1 %v9046_v61  ;;  %v9134_v48 = vld [vmem:[%s12253_s1 + $0x1784] ss:$16 sps:$4 sm:$0xff]   ;;  %v9137_v61 = vld [vmem:[%s12253_s1 + $0x178c] ss:$16 sps:$4 sm:$0xff]  }
 0x2b7   :  { %5870 = vmatpush1.bf16.msra.mxu0 %v9041_v63  ;;  %6444 = vmatpush1.bf16.msra.mxu1 %v9044_v44  ;;  %v9132_v63 = vld [vmem:[%s12253_s1 + $0x1780] ss:$16 sps:$4 sm:$0xff]   ;;  %v9135_v44 = vld [vmem:[%s12253_s1 + $0x1788] ss:$16 sps:$4 sm:$0xff]  }
 0x2b8   :  { %5871 = vmatprep.subr.bf16.mxu0 %v9049_v1  ;;  %6445 = vmatprep.subr.bf16.mxu1 %v9052_v51  ;;  %v9140_v1 = vld [vmem:[%s12253_s1 + $0x17a4] ss:$16 sps:$4 sm:$0xff]   ;;  %v9143_v51 = vld [vmem:[%s12253_s1 + $0x17ac] ss:$16 sps:$4 sm:$0xff]  }
 0x2bb   :  { %5872 = vmatpush1.bf16.msra.mxu0 %v9047_v2  ;;  %6446 = vmatpush1.bf16.msra.mxu1 %v9050_v3  ;;  %v9138_v2 = vld [vmem:[%s12253_s1 + $0x17a0] ss:$16 sps:$4 sm:$0xff]   ;;  %v9141_v3 = vld [vmem:[%s12253_s1 + $0x17a8] ss:$16 sps:$4 sm:$0xff]  }
 0x2bc   :  { %5873 = vmatprep.subr.bf16.mxu0 %v9055_v4  ;;  %6447 = vmatprep.subr.bf16.mxu1 %v9058_v60  ;;  %v9146_v4 = vld [vmem:[%s12253_s1 + $0x17c4] ss:$16 sps:$4 sm:$0xff]   ;;  %v9149_v60 = vld [vmem:[%s12253_s1 + $0x17cc] ss:$16 sps:$4 sm:$0xff]  }
 0x2bf   :  { %5874 = vmatpush1.bf16.msra.mxu0 %v9053_v5  ;;  %6448 = vmatpush1.bf16.msra.mxu1 %v9056_v6  ;;  %v9144_v5 = vld [vmem:[%s12253_s1 + $0x17c0] ss:$16 sps:$4 sm:$0xff]   ;;  %v9147_v6 = vld [vmem:[%s12253_s1 + $0x17c8] ss:$16 sps:$4 sm:$0xff]  }
 0x2c0   :  { %5884 = vmatprep.subr.bf16.mxu0 %v9062_v7  ;;  %6458 = vmatprep.subr.bf16.mxu1 %v9065_v62  ;;  %v9152_v7 = vld [vmem:[%s12253_s1 + $0x17e4] ss:$16 sps:$4 sm:$0xff]   ;;  %v9155_v62 = vld [vmem:[%s12253_s1 + $0x17ec] ss:$16 sps:$4 sm:$0xff]  }
 0x2c2   :  { %5876 = vmatmul.mubr.bf16.vlgmr.msra.gmra.mrb[0].mxu0 %v11636_v9  ;;  %6450 = vmatmul.mubr.bf16.vlgmr.msra.gmra.mrb[0].mxu1 %v11636_v9 }
 0x2c3   :  { %5885 = vmatpush1.bf16.msra.mxu0 %v9060_v10  ;;  %6459 = vmatpush1.bf16.msra.mxu1 %v9063_v11  ;;  %v11825_v10 = vld.sshfl [vmem:[%s12252_s0 + $0x18] sm:$0x13 pattern:$0x75316420]  ;;  %v9150_v11 = vld [vmem:[%s12253_s1 + $0x17e0] ss:$16 sps:$4 sm:$0xff]  }
 0x2c4   :  { %5886 = vmatprep.subr.bf16.mxu0 %v9068_v12  ;;  %6460 = vmatprep.subr.bf16.mxu1 %v9071_v0  ;;  %v9153_v12 = vld [vmem:[%s12253_s1 + $0x17e8] ss:$16 sps:$4 sm:$0xff]   ;;  %v9158_v0 = vld [vmem:[%s12253_s1 + $0x1804] ss:$16 sps:$4 sm:$0xff]  }
 0x2c5   :  { %5916 = vmatprep.mubr.bf16.mxu0 %v1062_v52  ;;  %6490 = vmatprep.mubr.bf16.mxu1 %v1062_v52  ;;  %v9161_v52 = vld [vmem:[%s12253_s1 + $0x180c] ss:$16 sps:$4 sm:$0xff]  }
 0x2c7   :  { %5887 = vmatpush1.bf16.msra.mxu0 %v9066_v15  ;;  %6461 = vmatpush1.bf16.msra.mxu1 %v9069_v16  ;;  %v1070_v15 = vcombine.high %v11825_v10, %v11825_v10  ;;  %v1060_v16 = vcombine.high %v11636_v9, %v11636_v9  ;;  %v9167_v9 = vld [vmem:[%s12253_s1 + $0x182c] ss:$16 sps:$4 sm:$0xff]  }
 0x2c8   :  { %5888 = vmatprep.subr.bf16.mxu0 %v9074_v8  ;;  %6462 = vmatprep.subr.bf16.mxu1 %v9077_v17  ;;  %v9156_v8 = vld [vmem:[%s12253_s1 + $0x1800] ss:$16 sps:$4 sm:$0xff]   ;;  %v9159_v17 = vld [vmem:[%s12253_s1 + $0x1808] ss:$16 sps:$4 sm:$0xff]  }
 0x2cb   :  { %5889 = vmatpush1.bf16.msra.mxu0 %v9072_v18  ;;  %6463 = vmatpush1.bf16.msra.mxu1 %v9075_v19  ;;  %v9164_v18 = vld [vmem:[%s12253_s1 + $0x1824] ss:$16 sps:$4 sm:$0xff]   ;;  %v1084_v19 = vrot.slane %v1070_v15, %v9526_v49 }
 0x2cc   :  { %5890 = vmatprep.subr.bf16.mxu0 %v9080_v20  ;;  %6464 = vmatprep.subr.bf16.mxu1 %v9083_v22  ;;  %v9162_v20 = vld [vmem:[%s12253_s1 + $0x1820] ss:$16 sps:$4 sm:$0xff]   ;;  %v9165_v22 = vld [vmem:[%s12253_s1 + $0x1828] ss:$16 sps:$4 sm:$0xff]   ;;  %v9248_v15 = vld [vmem:[%s12253_s1 + $0x19e4] ss:$16 sps:$4 sm:$0xff]  }
 0x2cf   :  { %5891 = vmatpush1.bf16.msra.mxu0 %v9078_v23  ;;  %6465 = vmatpush1.bf16.msra.mxu1 %v9081_v24  ;;  %v9170_v23 = vld [vmem:[%s12253_s1 + $0x1844] ss:$16 sps:$4 sm:$0xff]   ;;  %v9173_v24 = vld [vmem:[%s12253_s1 + $0x184c] ss:$16 sps:$4 sm:$0xff]  }
 0x2d0   :  { %5892 = vmatprep.subr.bf16.mxu0 %v9086_v13  ;;  %6466 = vmatprep.subr.bf16.mxu1 %v9089_v27  ;;  %v9168_v13 = vld [vmem:[%s12253_s1 + $0x1840] ss:$16 sps:$4 sm:$0xff]   ;;  %v9171_v27 = vld [vmem:[%s12253_s1 + $0x1848] ss:$16 sps:$4 sm:$0xff]  }
 0x2d3   :  { %5893 = vmatpush1.bf16.msra.mxu0 %v9084_v28  ;;  %6467 = vmatpush1.bf16.msra.mxu1 %v9087_v29  ;;  %v9176_v28 = vld [vmem:[%s12253_s1 + $0x1864] ss:$16 sps:$4 sm:$0xff]   ;;  %v9179_v29 = vld [vmem:[%s12253_s1 + $0x186c] ss:$16 sps:$4 sm:$0xff]  }
 0x2d4   :  { %5894 = vmatprep.subr.bf16.mxu0 %v9092_v14  ;;  %6468 = vmatprep.subr.bf16.mxu1 %v9095_v30  ;;  %v9174_v14 = vld [vmem:[%s12253_s1 + $0x1860] ss:$16 sps:$4 sm:$0xff]   ;;  %v9177_v30 = vld [vmem:[%s12253_s1 + $0x1868] ss:$16 sps:$4 sm:$0xff]  }
 0x2d7   :  { %5895 = vmatpush1.bf16.msra.mxu0 %v9090_v31  ;;  %6469 = vmatpush1.bf16.msra.mxu1 %v9093_v25  ;;  %v9182_v31 = vld [vmem:[%s12253_s1 + $0x1884] ss:$16 sps:$4 sm:$0xff]   ;;  %v9185_v25 = vld [vmem:[%s12253_s1 + $0x188c] ss:$16 sps:$4 sm:$0xff]  }
 0x2d8   :  { %5896 = vmatprep.subr.bf16.mxu0 %v9098_v32  ;;  %6470 = vmatprep.subr.bf16.mxu1 %v9101_v33  ;;  %v9180_v32 = vld [vmem:[%s12253_s1 + $0x1880] ss:$16 sps:$4 sm:$0xff]   ;;  %v9183_v33 = vld [vmem:[%s12253_s1 + $0x1888] ss:$16 sps:$4 sm:$0xff]  }
 0x2db   :  { %5897 = vmatpush1.bf16.msra.mxu0 %v9096_v26  ;;  %6471 = vmatpush1.bf16.msra.mxu1 %v9099_v36  ;;  %v9188_v26 = vld [vmem:[%s12253_s1 + $0x18a4] ss:$16 sps:$4 sm:$0xff]   ;;  %v9191_v36 = vld [vmem:[%s12253_s1 + $0x18ac] ss:$16 sps:$4 sm:$0xff]  }
 0x2dc   :  { %5898 = vmatprep.subr.bf16.mxu0 %v9104_v37  ;;  %6472 = vmatprep.subr.bf16.mxu1 %v9107_v21  ;;  %v9186_v37 = vld [vmem:[%s12253_s1 + $0x18a0] ss:$16 sps:$4 sm:$0xff]   ;;  %v9189_v21 = vld [vmem:[%s12253_s1 + $0x18a8] ss:$16 sps:$4 sm:$0xff]  }
 0x2df   :  { %5899 = vmatpush1.bf16.msra.mxu0 %v9102_v39  ;;  %6473 = vmatpush1.bf16.msra.mxu1 %v9105_v40  ;;  %v9194_v39 = vld [vmem:[%s12253_s1 + $0x18c4] ss:$16 sps:$4 sm:$0xff]   ;;  %v9197_v40 = vld [vmem:[%s12253_s1 + $0x18cc] ss:$16 sps:$4 sm:$0xff]  }
 0x2e0   :  { %5900 = vmatprep.subr.bf16.mxu0 %v9110_v41  ;;  %6474 = vmatprep.subr.bf16.mxu1 %v9113_v34  ;;  %v9192_v41 = vld [vmem:[%s12253_s1 + $0x18c0] ss:$16 sps:$4 sm:$0xff]   ;;  %v9195_v34 = vld [vmem:[%s12253_s1 + $0x18c8] ss:$16 sps:$4 sm:$0xff]  }
 0x2e3   :  { %5901 = vmatpush1.bf16.msra.mxu0 %v9108_v43  ;;  %6475 = vmatpush1.bf16.msra.mxu1 %v9111_v45  ;;  %v9200_v43 = vld [vmem:[%s12253_s1 + $0x18e4] ss:$16 sps:$4 sm:$0xff]   ;;  %v9203_v45 = vld [vmem:[%s12253_s1 + $0x18ec] ss:$16 sps:$4 sm:$0xff]  }
 0x2e4   :  { %5902 = vmatprep.subr.bf16.mxu0 %v9116_v46  ;;  %6476 = vmatprep.subr.bf16.mxu1 %v9119_v35  ;;  %v9198_v46 = vld [vmem:[%s12253_s1 + $0x18e0] ss:$16 sps:$4 sm:$0xff]   ;;  %v9201_v35 = vld [vmem:[%s12253_s1 + $0x18e8] ss:$16 sps:$4 sm:$0xff]  }
 0x2e7   :  { %5903 = vmatpush1.bf16.msra.mxu0 %v9114_v50  ;;  %6477 = vmatpush1.bf16.msra.mxu1 %v9117_v53  ;;  %v9206_v50 = vld [vmem:[%s12253_s1 + $0x1904] ss:$16 sps:$4 sm:$0xff]   ;;  %v9209_v53 = vld [vmem:[%s12253_s1 + $0x190c] ss:$16 sps:$4 sm:$0xff]  }
 0x2e8   :  { %5904 = vmatprep.subr.bf16.mxu0 %v9122_v38  ;;  %6478 = vmatprep.subr.bf16.mxu1 %v9125_v54  ;;  %v9204_v38 = vld [vmem:[%s12253_s1 + $0x1900] ss:$16 sps:$4 sm:$0xff]   ;;  %v9207_v54 = vld [vmem:[%s12253_s1 + $0x1908] ss:$16 sps:$4 sm:$0xff]  }
 0x2eb   :  { %5905 = vmatpush1.bf16.msra.mxu0 %v9120_v55  ;;  %6479 = vmatpush1.bf16.msra.mxu1 %v9123_v56  ;;  %v9212_v55 = vld [vmem:[%s12253_s1 + $0x1924] ss:$16 sps:$4 sm:$0xff]   ;;  %v9215_v56 = vld [vmem:[%s12253_s1 + $0x192c] ss:$16 sps:$4 sm:$0xff]  }
 0x2ec   :  { %5906 = vmatprep.subr.bf16.mxu0 %v9128_v47  ;;  %6480 = vmatprep.subr.bf16.mxu1 %v9131_v57  ;;  %v9210_v47 = vld [vmem:[%s12253_s1 + $0x1920] ss:$16 sps:$4 sm:$0xff]   ;;  %v9213_v57 = vld [vmem:[%s12253_s1 + $0x1928] ss:$16 sps:$4 sm:$0xff]  }
 0x2ef   :  { %5907 = vmatpush1.bf16.msra.mxu0 %v9126_v58  ;;  %6481 = vmatpush1.bf16.msra.mxu1 %v9129_v59  ;;  %v9218_v58 = vld [vmem:[%s12253_s1 + $0x1944] ss:$16 sps:$4 sm:$0xff]   ;;  %v9221_v59 = vld [vmem:[%s12253_s1 + $0x194c] ss:$16 sps:$4 sm:$0xff]  }
 0x2f0   :  { %5908 = vmatprep.subr.bf16.mxu0 %v9134_v48  ;;  %6482 = vmatprep.subr.bf16.mxu1 %v9137_v61  ;;  %v9216_v48 = vld [vmem:[%s12253_s1 + $0x1940] ss:$16 sps:$4 sm:$0xff]   ;;  %v9219_v61 = vld [vmem:[%s12253_s1 + $0x1948] ss:$16 sps:$4 sm:$0xff]  }
 0x2f3   :  { %5909 = vmatpush1.bf16.msra.mxu0 %v9132_v63  ;;  %6483 = vmatpush1.bf16.msra.mxu1 %v9135_v44  ;;  %v9224_v63 = vld [vmem:[%s12253_s1 + $0x1964] ss:$16 sps:$4 sm:$0xff]   ;;  %v9227_v44 = vld [vmem:[%s12253_s1 + $0x196c] ss:$16 sps:$4 sm:$0xff]  }
 0x2f4   :  { %5910 = vmatprep.subr.bf16.mxu0 %v9140_v1  ;;  %6484 = vmatprep.subr.bf16.mxu1 %v9143_v51  ;;  %v9222_v1 = vld [vmem:[%s12253_s1 + $0x1960] ss:$16 sps:$4 sm:$0xff]   ;;  %v9225_v51 = vld [vmem:[%s12253_s1 + $0x1968] ss:$16 sps:$4 sm:$0xff]  }
 0x2f7   :  { %5911 = vmatpush1.bf16.msra.mxu0 %v9138_v2  ;;  %6485 = vmatpush1.bf16.msra.mxu1 %v9141_v3  ;;  %v9230_v2 = vld [vmem:[%s12253_s1 + $0x1984] ss:$16 sps:$4 sm:$0xff]   ;;  %v9233_v3 = vld [vmem:[%s12253_s1 + $0x198c] ss:$16 sps:$4 sm:$0xff]  }
 0x2f8   :  { %5912 = vmatprep.subr.bf16.mxu0 %v9146_v4  ;;  %6486 = vmatprep.subr.bf16.mxu1 %v9149_v60  ;;  %v9228_v4 = vld [vmem:[%s12253_s1 + $0x1980] ss:$16 sps:$4 sm:$0xff]   ;;  %v9231_v60 = vld [vmem:[%s12253_s1 + $0x1988] ss:$16 sps:$4 sm:$0xff]  }
 0x2fb   :  { %5913 = vmatpush1.bf16.msra.mxu0 %v9144_v5  ;;  %6487 = vmatpush1.bf16.msra.mxu1 %v9147_v6  ;;  %v9236_v5 = vld [vmem:[%s12253_s1 + $0x19a4] ss:$16 sps:$4 sm:$0xff]   ;;  %v9239_v6 = vld [vmem:[%s12253_s1 + $0x19ac] ss:$16 sps:$4 sm:$0xff]  }
 0x2fc   :  { %5914 = vmatprep.subr.bf16.mxu0 %v9152_v7  ;;  %6488 = vmatprep.subr.bf16.mxu1 %v9155_v62  ;;  %v9234_v7 = vld [vmem:[%s12253_s1 + $0x19a0] ss:$16 sps:$4 sm:$0xff]   ;;  %v9237_v62 = vld [vmem:[%s12253_s1 + $0x19a8] ss:$16 sps:$4 sm:$0xff]  }
 0x2ff   :  { %5915 = vmatpush1.bf16.msra.mxu0 %v9150_v11  ;;  %6489 = vmatpush1.bf16.msra.mxu1 %v9153_v12  ;;  %v9242_v11 = vld [vmem:[%s12253_s1 + $0x19c4] ss:$16 sps:$4 sm:$0xff]   ;;  %v9245_v12 = vld [vmem:[%s12253_s1 + $0x19cc] ss:$16 sps:$4 sm:$0xff]  }
 0x300   :  { %5925 = vmatprep.subr.bf16.mxu0 %v9158_v0  ;;  %6499 = vmatprep.subr.bf16.mxu1 %v9161_v52  ;;  %v9240_v0 = vld [vmem:[%s12253_s1 + $0x19c0] ss:$16 sps:$4 sm:$0xff]   ;;  %v9243_v52 = vld [vmem:[%s12253_s1 + $0x19c8] ss:$16 sps:$4 sm:$0xff]  }
 0x302   :  { %5917 = vmatmul.mubr.bf16.vlgmr.msra.gmra.mrb[0].mxu0 %v1060_v16  ;;  %6491 = vmatmul.mubr.bf16.vlgmr.msra.gmra.mrb[0].mxu1 %v1060_v16  ;;  %v9251_v16 = vld [vmem:[%s12253_s1 + $0x19ec] ss:$16 sps:$4 sm:$0xff]  }
 0x303   :  { %5926 = vmatpush1.bf16.msra.mxu0 %v9156_v8  ;;  %6500 = vmatpush1.bf16.msra.mxu1 %v9159_v17  ;;  %v9246_v8 = vld [vmem:[%s12253_s1 + $0x19e0] ss:$16 sps:$4 sm:$0xff]   ;;  %v9249_v17 = vld [vmem:[%s12253_s1 + $0x19e8] ss:$16 sps:$4 sm:$0xff]  }
 0x304   :  { %5927 = vmatprep.subr.bf16.mxu0 %v9164_v18  ;;  %6501 = vmatprep.subr.bf16.mxu1 %v9167_v9  ;;  %v9254_v18 = vld [vmem:[%s12253_s1 + $0x1a04] ss:$16 sps:$4 sm:$0xff]   ;;  %v9257_v9 = vld [vmem:[%s12253_s1 + $0x1a0c] ss:$16 sps:$4 sm:$0xff]  }
 0x305   :  { %5957 = vmatprep.mubr.bf16.mxu0 %v1084_v19  ;;  %6531 = vmatprep.mubr.bf16.mxu1 %v1084_v19  ;;  %v12038_v19 = vrot.slane %v11825_v10, %v9526_v49  ;;  %v9263_v49 = vld [vmem:[%s12253_s1 + $0x1a2c] ss:$16 sps:$4 sm:$0xff]   ;;  %v9258_v10 = vld [vmem:[%s12253_s1 + $0x1a20] ss:$16 sps:$4 sm:$0xff]  }
 0x307   :  { %5928 = vmatpush1.bf16.msra.mxu0 %v9162_v20  ;;  %6502 = vmatpush1.bf16.msra.mxu1 %v9165_v22  ;;  %v9252_v20 = vld [vmem:[%s12253_s1 + $0x1a00] ss:$16 sps:$4 sm:$0xff]   ;;  %v9255_v22 = vld [vmem:[%s12253_s1 + $0x1a08] ss:$16 sps:$4 sm:$0xff]  }
 0x308   :  { %5929 = vmatprep.subr.bf16.mxu0 %v9170_v23  ;;  %6503 = vmatprep.subr.bf16.mxu1 %v9173_v24  ;;  %v9260_v23 = vld [vmem:[%s12253_s1 + $0x1a24] ss:$16 sps:$4 sm:$0xff]   ;;  %v9261_v24 = vld [vmem:[%s12253_s1 + $0x1a28] ss:$16 sps:$4 sm:$0xff]  }
 0x30b   :  { %5930 = vmatpush1.bf16.msra.mxu0 %v9168_v13  ;;  %6504 = vmatpush1.bf16.msra.mxu1 %v9171_v27  ;;  %v9266_v13 = vld [vmem:[%s12253_s1 + $0x1a44] ss:$16 sps:$4 sm:$0xff]   ;;  %v9269_v27 = vld [vmem:[%s12253_s1 + $0x1a4c] ss:$16 sps:$4 sm:$0xff]  }
 0x30c   :  { %5931 = vmatprep.subr.bf16.mxu0 %v9176_v28  ;;  %6505 = vmatprep.subr.bf16.mxu1 %v9179_v29  ;;  %v9359_v28 = vmov 0   ;;  %v9264_v29 = vld [vmem:[%s12253_s1 + $0x1a40] ss:$16 sps:$4 sm:$0xff]  }
 0x30f   :  { %5932 = vmatpush1.bf16.msra.mxu0 %v9174_v14  ;;  %6506 = vmatpush1.bf16.msra.mxu1 %v9177_v30  ;;  %v9267_v14 = vld [vmem:[%s12253_s1 + $0x1a48] ss:$16 sps:$4 sm:$0xff]   ;;  %v9272_v30 = vld [vmem:[%s12253_s1 + $0x1a64] ss:$16 sps:$4 sm:$0xff]  }
 0x310   :  { %5933 = vmatprep.subr.bf16.mxu0 %v9182_v31  ;;  %6507 = vmatprep.subr.bf16.mxu1 %v9185_v25  ;;  %v9275_v31 = vld [vmem:[%s12253_s1 + $0x1a6c] ss:$16 sps:$4 sm:$0xff]   ;;  %v9270_v25 = vld [vmem:[%s12253_s1 + $0x1a60] ss:$16 sps:$4 sm:$0xff]  }
 0x313   :  { %5934 = vmatpush1.bf16.msra.mxu0 %v9180_v32  ;;  %6508 = vmatpush1.bf16.msra.mxu1 %v9183_v33  ;;  %v9273_v32 = vld [vmem:[%s12253_s1 + $0x1a68] ss:$16 sps:$4 sm:$0xff]   ;;  %v9278_v33 = vld [vmem:[%s12253_s1 + $0x1a84] ss:$16 sps:$4 sm:$0xff]  }
 0x314   :  { %5935 = vmatprep.subr.bf16.mxu0 %v9188_v26  ;;  %6509 = vmatprep.subr.bf16.mxu1 %v9191_v36  ;;  %v9281_v26 = vld [vmem:[%s12253_s1 + $0x1a8c] ss:$16 sps:$4 sm:$0xff]   ;;  %v9276_v36 = vld [vmem:[%s12253_s1 + $0x1a80] ss:$16 sps:$4 sm:$0xff]  }
 0x317   :  { %5936 = vmatpush1.bf16.msra.mxu0 %v9186_v37  ;;  %6510 = vmatpush1.bf16.msra.mxu1 %v9189_v21  ;;  %v9279_v37 = vld [vmem:[%s12253_s1 + $0x1a88] ss:$16 sps:$4 sm:$0xff]   ;;  %v9284_v21 = vld [vmem:[%s12253_s1 + $0x1aa4] ss:$16 sps:$4 sm:$0xff]  }
 0x318   :  { %5937 = vmatprep.subr.bf16.mxu0 %v9194_v39  ;;  %6511 = vmatprep.subr.bf16.mxu1 %v9197_v40  ;;  %v9287_v39 = vld [vmem:[%s12253_s1 + $0x1aac] ss:$16 sps:$4 sm:$0xff]   ;;  %v9282_v40 = vld [vmem:[%s12253_s1 + $0x1aa0] ss:$16 sps:$4 sm:$0xff]  }
 0x31b   :  { %5938 = vmatpush1.bf16.msra.mxu0 %v9192_v41  ;;  %6512 = vmatpush1.bf16.msra.mxu1 %v9195_v34  ;;  %v9285_v41 = vld [vmem:[%s12253_s1 + $0x1aa8] ss:$16 sps:$4 sm:$0xff]   ;;  %v9290_v34 = vld [vmem:[%s12253_s1 + $0x1ac4] ss:$16 sps:$4 sm:$0xff]  }
 0x31c   :  { %5939 = vmatprep.subr.bf16.mxu0 %v9200_v43  ;;  %6513 = vmatprep.subr.bf16.mxu1 %v9203_v45  ;;  %v9293_v43 = vld [vmem:[%s12253_s1 + $0x1acc] ss:$16 sps:$4 sm:$0xff]   ;;  %v9288_v45 = vld [vmem:[%s12253_s1 + $0x1ac0] ss:$16 sps:$4 sm:$0xff]  }
 0x31f   :  { %5940 = vmatpush1.bf16.msra.mxu0 %v9198_v46  ;;  %6514 = vmatpush1.bf16.msra.mxu1 %v9201_v35  ;;  %v9291_v46 = vld [vmem:[%s12253_s1 + $0x1ac8] ss:$16 sps:$4 sm:$0xff]   ;;  %v9296_v35 = vld [vmem:[%s12253_s1 + $0x1ae4] ss:$16 sps:$4 sm:$0xff]  }
 0x320   :  { %5941 = vmatprep.subr.bf16.mxu0 %v9206_v50  ;;  %6515 = vmatprep.subr.bf16.mxu1 %v9209_v53  ;;  %v9299_v50 = vld [vmem:[%s12253_s1 + $0x1aec] ss:$16 sps:$4 sm:$0xff]   ;;  %v9294_v53 = vld [vmem:[%s12253_s1 + $0x1ae0] ss:$16 sps:$4 sm:$0xff]  }
 0x323   :  { %5942 = vmatpush1.bf16.msra.mxu0 %v9204_v38  ;;  %6516 = vmatpush1.bf16.msra.mxu1 %v9207_v54  ;;  %v9297_v38 = vld [vmem:[%s12253_s1 + $0x1ae8] ss:$16 sps:$4 sm:$0xff]   ;;  %v9300_v54 = vld [vmem:[%s12255_s3 + $0x40] sm:$0xff]  }
 0x324   :  { %5943 = vmatprep.subr.bf16.mxu0 %v9212_v55  ;;  %6517 = vmatprep.subr.bf16.mxu1 %v9215_v56  ;;  %v9301_v55 = vld [vmem:[%s12255_s3 + $0xc0] sm:$0xff]   ;;  %v1085_v56 = vcombine.high %v12038_v19, %v12038_v19 }
 0x327   :  { %5944 = vmatpush1.bf16.msra.mxu0 %v9210_v47  ;;  %6518 = vmatpush1.bf16.msra.mxu1 %v9213_v57  ;;  %v9302_v47 = vld [vmem:[%s12255_s3] sm:$0xff]  }
 0x328   :  { %5945 = vmatprep.subr.bf16.mxu0 %v9218_v58  ;;  %6519 = vmatprep.subr.bf16.mxu1 %v9221_v59  ;;  %v9303_v57 = vld [vmem:[%s12255_s3 + $0x80] sm:$0xff]   ;;  %v9304_v58 = vld [vmem:[%s12255_s3 + $0x48] sm:$0xff]  }
 0x329   :  { %v9305_v59 = vld [vmem:[%s12255_s3 + $0xc8] sm:$0xff]  }
 0x32b   :  { %5946 = vmatpush1.bf16.msra.mxu0 %v9216_v48  ;;  %6520 = vmatpush1.bf16.msra.mxu1 %v9219_v61  ;;  %v9306_v48 = vld [vmem:[%s12255_s3 + $0x8] sm:$0xff]  }
 0x32c   :  { %5947 = vmatprep.subr.bf16.mxu0 %v9224_v63  ;;  %6521 = vmatprep.subr.bf16.mxu1 %v9227_v44  ;;  %v9307_v61 = vld [vmem:[%s12255_s3 + $0x88] sm:$0xff]   ;;  %v9308_v63 = vld [vmem:[%s12255_s3 + $0x50] sm:$0xff]  }
 0x32d   :  { %v9309_v44 = vld [vmem:[%s12255_s3 + $0xd0] sm:$0xff]  }
 0x32f   :  { %5948 = vmatpush1.bf16.msra.mxu0 %v9222_v1  ;;  %6522 = vmatpush1.bf16.msra.mxu1 %v9225_v51  ;;  %v9310_v1 = vld [vmem:[%s12255_s3 + $0x10] sm:$0xff]  }
 0x330   :  { %5949 = vmatprep.subr.bf16.mxu0 %v9230_v2  ;;  %6523 = vmatprep.subr.bf16.mxu1 %v9233_v3  ;;  %v9311_v51 = vld [vmem:[%s12255_s3 + $0x90] sm:$0xff]   ;;  %v9312_v2 = vld [vmem:[%s12255_s3 + $0x58] sm:$0xff]  }
 0x331   :  { %v9313_v3 = vld [vmem:[%s12255_s3 + $0xd8] sm:$0xff]  }
 0x333   :  { %5950 = vmatpush1.bf16.msra.mxu0 %v9228_v4  ;;  %6524 = vmatpush1.bf16.msra.mxu1 %v9231_v60  ;;  %v9314_v4 = vld [vmem:[%s12255_s3 + $0x18] sm:$0xff]  }
 0x334   :  { %5951 = vmatprep.subr.bf16.mxu0 %v9236_v5  ;;  %6525 = vmatprep.subr.bf16.mxu1 %v9239_v6  ;;  %v9315_v60 = vld [vmem:[%s12255_s3 + $0x98] sm:$0xff]   ;;  %v9316_v5 = vld [vmem:[%s12255_s3 + $0x60] sm:$0xff]  }
 0x335   :  { %v9317_v6 = vld [vmem:[%s12255_s3 + $0xe0] sm:$0xff]  }
 0x337   :  { %5952 = vmatpush1.bf16.msra.mxu0 %v9234_v7  ;;  %6526 = vmatpush1.bf16.msra.mxu1 %v9237_v62  ;;  %v9318_v7 = vld [vmem:[%s12255_s3 + $0x20] sm:$0xff]  }
 0x338   :  { %5953 = vmatprep.subr.bf16.mxu0 %v9242_v11  ;;  %6527 = vmatprep.subr.bf16.mxu1 %v9245_v12  ;;  %v9319_v62 = vld [vmem:[%s12255_s3 + $0xa0] sm:$0xff]   ;;  %v9320_v11 = vld [vmem:[%s12255_s3 + $0x68] sm:$0xff]  }
 0x339   :  { %v9321_v12 = vld [vmem:[%s12255_s3 + $0xe8] sm:$0xff]  }
 0x33b   :  { %5954 = vmatpush1.bf16.msra.mxu0 %v9240_v0  ;;  %6528 = vmatpush1.bf16.msra.mxu1 %v9243_v52  ;;  %v9322_v0 = vld [vmem:[%s12255_s3 + $0x28] sm:$0xff]  }
 0x33c   :  { %5955 = vmatprep.subr.bf16.mxu0 %v9248_v15  ;;  %6529 = vmatprep.subr.bf16.mxu1 %v9251_v16  ;;  %v9323_v52 = vld [vmem:[%s12255_s3 + $0xa8] sm:$0xff]   ;;  %v9324_v15 = vld [vmem:[%s12255_s3 + $0x70] sm:$0xff]  }
 0x33d   :  { %v9325_v16 = vld [vmem:[%s12255_s3 + $0xf0] sm:$0xff]  }
 0x33f   :  { %5956 = vmatpush1.bf16.msra.mxu0 %v9246_v8  ;;  %6530 = vmatpush1.bf16.msra.mxu1 %v9249_v17  ;;  %v9326_v8 = vld [vmem:[%s12255_s3 + $0x30] sm:$0xff]  }
 0x340   :  { %5966 = vmatprep.subr.bf16.mxu0 %v9254_v18  ;;  %6540 = vmatprep.subr.bf16.mxu1 %v9257_v9  ;;  %v9327_v17 = vld [vmem:[%s12255_s3 + $0xb0] sm:$0xff]   ;;  %v9328_v18 = vld [vmem:[%s12255_s3 + $0x78] sm:$0xff]  }
 0x341   :  { %v9329_v9 = vld [vmem:[%s12255_s3 + $0xf8] sm:$0xff]  }
 0x342   :  { %5958 = vmatmul.mubr.bf16.vlgmr.msra.gmra.mrb[0].mxu0 %v12038_v19  ;;  %6532 = vmatmul.mubr.bf16.vlgmr.msra.gmra.mrb[0].mxu1 %v12038_v19  ;;  %v9330_v19 = vld [vmem:[%s12255_s3 + $0x38] sm:$0xff]  }
 0x343   :  { %5967 = vmatpush1.bf16.msra.mxu0 %v9252_v20  ;;  %6541 = vmatpush1.bf16.msra.mxu1 %v9255_v22  ;;  %v9331_v20 = vld [vmem:[%s12255_s3 + $0xb8] sm:$0xff]   ;;  %v894_v22 = vsub.s32 0, %v9508_v42 }
 0x344   :  { %5968 = vmatprep.subr.bf16.mxu0 %v9260_v23  ;;  %6542 = vmatprep.subr.bf16.mxu1 %v9263_v49  ;;  %v902_v23 = vsub.s32 2, %v9508_v42  ;;  %v890_v49 = vld [vmem:[%s12254_s2] sm:$0xf] }
 0x345   :  { %5998 = vmatprep.mubr.bf16.mxu0 %v9359_v28  ;;  %6572 = vmatprep.mubr.bf16.mxu1 %v9359_v28 }
 0x347   :  { %5969 = vmatpush1.bf16.msra.mxu0 %v9258_v10  ;;  %6543 = vmatpush1.bf16.msra.mxu1 %v9261_v24  ;;  %v898_v10 = vsub.s32 1, %v9508_v42  ;;  %v906_v24 = vsub.s32 3, %v9508_v42 }
 0x348   :  { %5970 = vmatprep.subr.bf16.mxu0 %v9266_v13  ;;  %6544 = vmatprep.subr.bf16.mxu1 %v9269_v27  ;;  %v895_v13 = vrot.slane %v890_v49, %v894_v22  ;;  %v903_v27 = vrot.slane %v890_v49, %v902_v23 }
 0x349   :  { %v899_v28 = vrot.slane %v890_v49, %v898_v10 }
 0x34b   :  { %5971 = vmatpush1.bf16.msra.mxu0 %v9264_v29  ;;  %6545 = vmatpush1.bf16.msra.mxu1 %v9267_v14  ;;  %v907_v29 = vrot.slane %v890_v49, %v906_v24 }
 0x34c   :  { %5972 = vmatprep.subr.bf16.mxu0 %v9272_v30  ;;  %6546 = vmatprep.subr.bf16.mxu1 %v9275_v31 }
 0x34f   :  { %5973 = vmatpush1.bf16.msra.mxu0 %v9270_v25  ;;  %6547 = vmatpush1.bf16.msra.mxu1 %v9273_v32 }
 0x350   :  { %5974 = vmatprep.subr.bf16.mxu0 %v9278_v33  ;;  %6548 = vmatprep.subr.bf16.mxu1 %v9281_v26 }
 0x353   :  { %5975 = vmatpush1.bf16.msra.mxu0 %v9276_v36  ;;  %6549 = vmatpush1.bf16.msra.mxu1 %v9279_v37 }
 0x354   :  { %5976 = vmatprep.subr.bf16.mxu0 %v9284_v21  ;;  %6550 = vmatprep.subr.bf16.mxu1 %v9287_v39 }
 0x357   :  { %5977 = vmatpush1.bf16.msra.mxu0 %v9282_v40  ;;  %6551 = vmatpush1.bf16.msra.mxu1 %v9285_v41 }
 0x358   :  { %5978 = vmatprep.subr.bf16.mxu0 %v9290_v34  ;;  %6552 = vmatprep.subr.bf16.mxu1 %v9293_v43 }
 0x35b   :  { %5979 = vmatpush1.bf16.msra.mxu0 %v9288_v45  ;;  %6553 = vmatpush1.bf16.msra.mxu1 %v9291_v46 }
 0x35c   :  { %5980 = vmatprep.subr.bf16.mxu0 %v9296_v35  ;;  %6554 = vmatprep.subr.bf16.mxu1 %v9299_v50 }
 0x35f   :  { %5981 = vmatpush1.bf16.msra.mxu0 %v9294_v53  ;;  %6555 = vmatpush1.bf16.msra.mxu1 %v9297_v38 }
 0x360   :  { %7846 = vmatprep.subr.bf16.mxu0 %v9300_v54  ;;  %7868 = vmatprep.subr.bf16.mxu1 %v9301_v55  ;;  %v7813_v54 = vld [vmem:[%s12256_s4] ss:$0 sm:$0xff] }
 0x362   :  { %5999 = vmatmul.mubr.bf16.vlgmr.msra.gmra.mrb[0].mxu0 %v1085_v56  ;;  %6573 = vmatmul.mubr.bf16.vlgmr.msra.gmra.mrb[0].mxu1 %v1085_v56 }
 0x363   :  { %7847 = vmatpush3.bf16.msra.mxu0 %v9302_v47  ;;  %7869 = vmatpush3.bf16.msra.mxu1 %v9303_v57 }
 0x364   :  { %7848 = vmatprep.subr.bf16.mxu0 %v9304_v58  ;;  %7870 = vmatprep.subr.bf16.mxu1 %v9305_v59 }
 0x367   :  { %7849 = vmatpush3.bf16.msra.mxu0 %v9306_v48  ;;  %7871 = vmatpush3.bf16.msra.mxu1 %v9307_v61 }
 0x368   :  { %7850 = vmatprep.subr.bf16.mxu0 %v9308_v63  ;;  %7872 = vmatprep.subr.bf16.mxu1 %v9309_v44 }
 0x36b   :  { %7851 = vmatpush3.bf16.msra.mxu0 %v9310_v1  ;;  %7873 = vmatpush3.bf16.msra.mxu1 %v9311_v51 }
 0x36c   :  { %7852 = vmatprep.subr.bf16.mxu0 %v9312_v2  ;;  %7874 = vmatprep.subr.bf16.mxu1 %v9313_v3 }
 0x36f   :  { %7853 = vmatpush3.bf16.msra.mxu0 %v9314_v4  ;;  %7875 = vmatpush3.bf16.msra.mxu1 %v9315_v60 }
 0x370   :  { %7854 = vmatprep.subr.bf16.mxu0 %v9316_v5  ;;  %7876 = vmatprep.subr.bf16.mxu1 %v9317_v6 }
 0x373   :  { %7855 = vmatpush3.bf16.msra.mxu0 %v9318_v7  ;;  %7877 = vmatpush3.bf16.msra.mxu1 %v9319_v62 }
 0x374   :  { %7856 = vmatprep.subr.bf16.mxu0 %v9320_v11  ;;  %7878 = vmatprep.subr.bf16.mxu1 %v9321_v12 }
 0x377   :  { %7857 = vmatpush3.bf16.msra.mxu0 %v9322_v0  ;;  %7879 = vmatpush3.bf16.msra.mxu1 %v9323_v52 }
 0x378   :  { %7858 = vmatprep.subr.bf16.mxu0 %v9324_v15  ;;  %7880 = vmatprep.subr.bf16.mxu1 %v9325_v16 }
 0x37b   :  { %7859 = vmatpush3.bf16.msra.mxu0 %v9326_v8  ;;  %7881 = vmatpush3.bf16.msra.mxu1 %v9327_v17 }
 0x37c   :  { %7860 = vmatprep.subr.bf16.mxu0 %v9328_v18  ;;  %7882 = vmatprep.subr.bf16.mxu1 %v9329_v9 }
 0x37f   :  { %7861 = vmatpush3.bf16.msra.mxu0 %v9330_v19  ;;  %7883 = vmatpush3.bf16.msra.mxu1 %v9331_v20 }
 0x435   :  { %v6000_v14 = vpop.f32.mrb[0].mxu0  ;;  %v6574_v30 = vpop.f32.mrb[0].mxu1 }
 0x436   :  { %v7890_v31 = vadd.f32 %v6000_v14, %v895_v13  ;;  %v7892_v25 = vadd.f32 %v6574_v30, %v903_v27  ;;  %v6002_v32 = vpop.f32.mrb[1].mxu0  ;;  %v6576_v33 = vpop.f32.mrb[1].mxu1 }
 0x437   :  { %v7891_v26 = vadd.f32 %v6002_v32, %v899_v28  ;;  %v7893_v36 = vadd.f32 %v6576_v33, %v907_v29  ;;  %v6004_v37 = vpop.f32.mrb[2].mxu0  ;;  %v6578_v21 = vpop.f32.mrb[2].mxu1 }
 0x438   :  { %v6581_v39 = vmax.f32 %v7890_v31, 0.0  ;;  %v6583_v40 = vmax.f32 %v7892_v25, 0.0  ;;  %v6005_v41 = vpop.f32.mrb[3].mxu0  ;;  %v6579_v34 = vpop.f32.mrb[3].mxu1 }
 0x439   :  { %v6582_v43 = vmax.f32 %v7891_v26, 0.0  ;;  %v6584_v42 = vmax.f32 %v7893_v36, 0.0 }
 0x43a   :  { %v6585_v35 = vpack.c.bf16 %v6581_v39, %v6581_v39  ;;  %v6587_v50 = vpack.c.bf16 %v6583_v40, %v6583_v40 }
 0x43b   :  { %v6586_v45 = vpack.c.bf16 %v6582_v43, %v6582_v43  ;;  %v6588_v46 = vpack.c.bf16 %v6584_v42, %v6584_v42 }
 0x43d   :  { %6884 = vmatprep.mubr.bf16.mxu0 %v6586_v45  ;;  %6924 = vmatprep.mubr.bf16.mxu1 %v6588_v46 }
 0x43e   :  { %6885 = vmatmul.mubr.bf16.vlgmr.msra.gmra.mrb[4].mxu0 %v6585_v35  ;;  %6925 = vmatmul.mubr.bf16.vlgmr.msra.gmra.mrb[4].mxu1 %v6587_v50 }
 0x511   :  { %v7862_v53 = vpop.f32.mrb[4].mxu0  ;;  %v7884_v38 = vpop.f32.mrb[4].mxu1 }
 0x512   :  { %v7863_v55 = vpop.f32.mrb[5].mxu0  ;;  %v7885_v56 = vpop.f32.mrb[5].mxu1 }
 0x513   :  { %v7864_v47 = vadd.f32 %v7863_v55, %v7862_v53  ;;  %v7886_v57 = vadd.f32 %v7885_v56, %v7884_v38  ;;  %v7865_v58 = vpop.f32.mrb[6].mxu0  ;;  %v7887_v59 = vpop.f32.mrb[6].mxu1 }
 0x514   :  { %v7866_v48 = vpop.f32.mrb[7].mxu0  ;;  %v7888_v61 = vpop.f32.mrb[7].mxu1 }
 0x515   :  { %v6887_v63 = vadd.f32 %v7864_v47, %v7813_v54 }
 0x517   :  { %v6927_v44 = vadd.f32 %v7886_v57, %v6887_v63 }
 0x519   :  { %6933 = vst.msk [vmem:[#allocation2] sm:$0x3] %vm6932_vm0, %v6927_v44 }
 0x51a   :  { %9345 = shalt.err (!%p9342_p4)
}
 0x51b   :  { %s9346_s13 = scalar_lea.hbm %s12257_s5, 32 }
 0x51c   :  { %p9347_p5 = scmp.ne.s32.totalorder %s12257_s5, %s9346_s13  ;;  %p9350_p6 = scmp.lt.u32.totalorder %s9346_s13, %s12257_s5 }
 0x51e   :  { %p9352_p7 = pnand %p9350_p6, %p9347_p5 }
 0x520   :  { %9355 = shalt.err (!%p9352_p7)
}
 0x521   :  { %6943 = dma.vmem_to_hbm [thread:$0]  %s6941_s10, 32, %s12257_s5, [#allocation3]  }
 0x522   :  { %9356 = dma.done.wait [#allocation3], 32  }
 0x523   :  { %9357 = vsyncadd [#allocation3], 4294967264 }
 0x524   :  { %6947 = vsyncpa [#allocation3], 1 }

</bundles_post_ra>
